<compile_context>
chip_gen: v7x
topology: tpu7x:2x2x1
jax: 0.10.0
libtpu: 0.0.40
codegen_flags: <defaults>
</compile_context>

<pallas_src>
import numpy as np
import jax
import jax.numpy as jnp
from jax.experimental import pallas as pl
from jax.experimental.pallas import tpu as pltpu


# ----------------------------------------------------------------------------
# Parameters (PyTorch layout)
# ----------------------------------------------------------------------------

def init_params(key):
    ks = jax.random.split(key, 12)
    s = 0.1
    return {
        "conv1_w": s * jax.random.normal(ks[0], (4, 1, 3, 3), jnp.float32),
        "conv1_b": s * jax.random.normal(ks[1], (4,), jnp.float32),
        "conv2_w": s * jax.random.normal(ks[2], (8, 4, 3, 3), jnp.float32),
        "conv2_b": s * jax.random.normal(ks[3], (8,), jnp.float32),
        "conv3_w": s * jax.random.normal(ks[4], (16, 8, 3, 3), jnp.float32),
        "conv3_b": s * jax.random.normal(ks[5], (16,), jnp.float32),
        "conv4_w": s * jax.random.normal(ks[6], (16, 16, 5, 5), jnp.float32),
        "conv4_b": s * jax.random.normal(ks[7], (16,), jnp.float32),
        "fc6_w": s * jax.random.normal(ks[8], (20, 64), jnp.float32),
        "fc6_b": s * jax.random.normal(ks[9], (20,), jnp.float32),
        "fc7_w": s * jax.random.normal(ks[10], (10, 20), jnp.float32),
        "fc7_b": s * jax.random.normal(ks[11], (10,), jnp.float32),
    }


# ----------------------------------------------------------------------------
# Host-side one-time repack: dense per-layer conv operators
# ----------------------------------------------------------------------------

def _conv_dense_operator(w, hin, win, stride, pad):
    """Dense A[Hin*Win*Cin, OH*OW*Cout] such that, for activations flattened
    channels-last (flat index q*Cin + ci with q = h*Win + w), `x_flat @ A` is
    the conv output flattened as p*Cout + co (p = oh*OW + ow).  Each entry of A
    is either 0 or exactly one weight tap (stride >= 1), so no summation error
    is introduced by the fold."""
    w = np.asarray(w, np.float32)
    co_n, ci_n, kh, kw = w.shape
    oh = (hin + 2 * pad - kh) // stride + 1
    ow = (win + 2 * pad - kw) // stride + 1
    A = np.zeros((hin * win * ci_n, oh * ow * co_n), np.float32)
    for a in range(kh):
        for b in range(kw):
            tap = w[:, :, a, b].T                       # [Cin, Cout]
            for p_h in range(oh):
                h = stride * p_h - pad + a
                if not (0 <= h < hin):
                    continue
                for p_w in range(ow):
                    w_ = stride * p_w - pad + b
                    if not (0 <= w_ < win):
                        continue
                    q = h * win + w_
                    p = p_h * ow + p_w
                    A[q * ci_n:(q + 1) * ci_n, p * co_n:(p + 1) * co_n] += tap
    return A


def prepare_params(params):
    """Outside the hot path: fold im2col gathers into dense bf16 operators,
    tile biases over spatial, and bake the (C,H,W) flatten order into fc6."""
    def op(name, hin, win, stride, pad):
        return jnp.asarray(
            _conv_dense_operator(params[name + "_w"], hin, win, stride, pad),
            jnp.bfloat16)

    def conv_bias(name, s_out):
        b = np.asarray(params[name + "_b"], np.float32)
        return jnp.asarray(np.tile(b, s_out).reshape(1, -1))      # [1, S*Cout]

    # fc6 columns are ordered (c, h, w) with h*2+w = p; our conv4 output rows
    # are ordered (p, c), so permute the weight once on the host.
    w6 = np.asarray(params["fc6_w"], np.float32)                  # [20, 64]
    w6 = w6.reshape(20, 16, 4).transpose(2, 1, 0).reshape(64, 20)  # rows p*16+c

    return {
        "A1": op("conv1", 32, 32, 2, 1), "b1": conv_bias("conv1", 256),
        "A2": op("conv2", 16, 16, 2, 1), "b2": conv_bias("conv2", 64),
        "A3": op("conv3", 8, 8, 2, 1),   "b3": conv_bias("conv3", 16),
        "A4": op("conv4", 4, 4, 2, 2),   "b4": conv_bias("conv4", 4),
        "W6": jnp.asarray(w6, jnp.bfloat16),
        "b6": jnp.asarray(np.asarray(params["fc6_b"], np.float32).reshape(1, 20)),
        "W7": jnp.asarray(np.asarray(params["fc7_w"], np.float32).T, jnp.bfloat16),
        "b7": jnp.asarray(np.asarray(params["fc7_b"], np.float32).reshape(1, 10)),
    }


# ----------------------------------------------------------------------------
# Fused Pallas kernel: 6 matmuls, f32 accumulation, bf16 operands
# ----------------------------------------------------------------------------

def _fused_kernel(x_ref,
                  a1_ref, b1_ref, a2_ref, b2_ref, a3_ref, b3_ref, a4_ref, b4_ref,
                  w6_ref, b6_ref, w7_ref, b7_ref,
                  o_ref):
    def dense_relu(x_bf16, a_ref, b_ref):
        y = jnp.dot(x_bf16, a_ref[...], preferred_element_type=jnp.float32)
        return jnp.maximum(y + b_ref[...], 0.0).astype(jnp.bfloat16)

    x = x_ref[...]                               # [B, 1024] bf16 (flat 32x32)
    y = dense_relu(x, a1_ref, b1_ref)            # conv1+relu -> [B, 1024]
    y = dense_relu(y, a2_ref, b2_ref)            # conv2+relu -> [B, 512]
    y = dense_relu(y, a3_ref, b3_ref)            # conv3+relu -> [B, 256]
    y = dense_relu(y, a4_ref, b4_ref)            # conv4+relu -> [B, 64]
    z = dense_relu(y, w6_ref, b6_ref)            # fc6+relu   -> [B, 20]
    logits = jnp.dot(z, w7_ref[...], preferred_element_type=jnp.float32)
    logits = logits + b7_ref[...]                # fc7        -> [B, 10]
    o_ref[...] = jax.nn.sigmoid(logits).astype(o_ref.dtype)


# ----------------------------------------------------------------------------
# Forward pass
# ----------------------------------------------------------------------------

@jax.jit
def classifier_forward(prep, x):
    if x.shape[1:] != (1, 32, 32):
        raise ValueError("Classifier requires NCHW input of shape [B, 1, 32, 32]")
    batch = x.shape[0]
    # Raw input, flattened h*32+w (channels-last with Cin=1) and cast to bf16.
    x_flat = x.reshape(batch, 32 * 32).astype(jnp.bfloat16)

    vmem = pl.BlockSpec(memory_space=pltpu.MemorySpace.VMEM)
    fused = pl.pallas_call(
        _fused_kernel,
        out_shape=jax.ShapeDtypeStruct((batch, 10), jnp.float32),
        in_specs=[vmem] * 13,
        out_specs=vmem,
    )
    return fused(x_flat,
                 prep["A1"], prep["b1"], prep["A2"], prep["b2"],
                 prep["A3"], prep["b3"], prep["A4"], prep["b4"],
                 prep["W6"], prep["b6"], prep["W7"], prep["b7"])


# ----------------------------------------------------------------------------
# Pure-JAX reference (for correctness check only)
# ----------------------------------------------------------------------------

def _reference_forward(params, x):
    def conv(x, w, b, stride, pad):
        y = jax.lax.conv_general_dilated(
            x, w, window_strides=(stride, stride),
            padding=((pad, pad), (pad, pad)),
            dimension_numbers=("NCHW", "OIHW", "NCHW"),
            precision=jax.lax.Precision.HIGHEST)
        return jnp.maximum(y + b.reshape(1, -1, 1, 1), 0.0)

    x = conv(x, params["conv1_w"], params["conv1_b"], 2, 1)
    x = conv(x, params["conv2_w"], params["conv2_b"], 2, 1)
    x = conv(x, params["conv3_w"], params["conv3_b"], 2, 1)
    x = conv(x, params["conv4_w"], params["conv4_b"], 2, 2)
    x = x.reshape(x.shape[0], 64)
    x = jnp.maximum(x @ params["fc6_w"].T + params["fc6_b"], 0.0)
    x = x @ params["fc7_w"].T + params["fc7_b"]
    return jax.nn.sigmoid(x)


if __name__ == "__main__":
    key = jax.random.PRNGKey(0)
    pkey, xkey = jax.random.split(key)
    params = init_params(pkey)
    x = jax.random.normal(xkey, (2, 1, 32, 32), jnp.float32)

    prep = prepare_params(params)

    out = classifier_forward(prep, x)
    out = jax.block_until_ready(out)

    ref = _reference_forward(params, x)
    assert out.shape == (2, 10)
    assert bool(jnp.all((out >= 0.0) & (out <= 1.0)))
    err = float(jnp.max(jnp.abs(out - ref)))
    assert err < 2e-2, f"mismatch vs JAX reference: {err}"
    print("KERNEL_OK")
</pallas_src>

<mosaic_0001>
module attributes {stable_mosaic.version = 11 : i64} {
  func.func @_fused_kernel(%arg0: memref<2x1024xbf16, #tpu.memory_space<vmem>>, %arg1: memref<1024x1024xbf16, #tpu.memory_space<vmem>>, %arg2: memref<1x1024xf32, #tpu.memory_space<vmem>>, %arg3: memref<1024x512xbf16, #tpu.memory_space<vmem>>, %arg4: memref<1x512xf32, #tpu.memory_space<vmem>>, %arg5: memref<512x256xbf16, #tpu.memory_space<vmem>>, %arg6: memref<1x256xf32, #tpu.memory_space<vmem>>, %arg7: memref<256x64xbf16, #tpu.memory_space<vmem>>, %arg8: memref<1x64xf32, #tpu.memory_space<vmem>>, %arg9: memref<64x20xbf16, #tpu.memory_space<vmem>>, %arg10: memref<1x20xf32, #tpu.memory_space<vmem>>, %arg11: memref<20x10xbf16, #tpu.memory_space<vmem>>, %arg12: memref<1x10xf32, #tpu.memory_space<vmem>>, %arg13: memref<2x10xf32, #tpu.memory_space<vmem>>) attributes {dimension_semantics = [], scalar_prefetch = 0 : i64, scratch_operands = 0 : i64, tpu.core_type = #tpu.core_type<tc>} {
    %c0 = arith.constant 0 : index
    %c0_0 = arith.constant 0 : index
    %0 = vector.load %arg0[%c0, %c0_0] : memref<2x1024xbf16, #tpu.memory_space<vmem>>, vector<2x1024xbf16>
    %c0_1 = arith.constant 0 : index
    %c0_2 = arith.constant 0 : index
    %1 = vector.load %arg1[%c0_1, %c0_2] : memref<1024x1024xbf16, #tpu.memory_space<vmem>>, vector<1024x1024xbf16>
    %cst = arith.constant dense<0.000000e+00> : vector<2x1024xf32>
    %2 = tpu.matmul %0, %1, %cst {dimension_numbers = #tpu.dot_dimension_numbers<[1], [0], [0], [1], [0, 0, 1, 1], [], []>} : vector<2x1024xbf16>, vector<1024x1024xbf16>, vector<2x1024xf32> -> vector<2x1024xf32>
    %c0_3 = arith.constant 0 : index
    %c0_4 = arith.constant 0 : index
    %3 = vector.load %arg2[%c0_3, %c0_4] : memref<1x1024xf32, #tpu.memory_space<vmem>>, vector<1x1024xf32>
    %4 = vector.broadcast %3 : vector<1x1024xf32> to vector<2x1024xf32>
    %5 = arith.addf %2, %4 : vector<2x1024xf32>
    %cst_5 = arith.constant 0.000000e+00 : f32
    %6 = vector.broadcast %cst_5 : f32 to vector<2x1024xf32>
    %7 = arith.maximumf %5, %6 : vector<2x1024xf32>
    %8 = arith.truncf %7 : vector<2x1024xf32> to vector<2x1024xbf16>
    %c0_6 = arith.constant 0 : index
    %c0_7 = arith.constant 0 : index
    %9 = vector.load %arg3[%c0_6, %c0_7] : memref<1024x512xbf16, #tpu.memory_space<vmem>>, vector<1024x512xbf16>
    %cst_8 = arith.constant dense<0.000000e+00> : vector<2x512xf32>
    %10 = tpu.matmul %8, %9, %cst_8 {dimension_numbers = #tpu.dot_dimension_numbers<[1], [0], [0], [1], [0, 0, 1, 1], [], []>} : vector<2x1024xbf16>, vector<1024x512xbf16>, vector<2x512xf32> -> vector<2x512xf32>
    %c0_9 = arith.constant 0 : index
    %c0_10 = arith.constant 0 : index
    %11 = vector.load %arg4[%c0_9, %c0_10] : memref<1x512xf32, #tpu.memory_space<vmem>>, vector<1x512xf32>
    %12 = vector.broadcast %11 : vector<1x512xf32> to vector<2x512xf32>
    %13 = arith.addf %10, %12 : vector<2x512xf32>
    %cst_11 = arith.constant 0.000000e+00 : f32
    %14 = vector.broadcast %cst_11 : f32 to vector<2x512xf32>
    %15 = arith.maximumf %13, %14 : vector<2x512xf32>
    %16 = arith.truncf %15 : vector<2x512xf32> to vector<2x512xbf16>
    %c0_12 = arith.constant 0 : index
    %c0_13 = arith.constant 0 : index
    %17 = vector.load %arg5[%c0_12, %c0_13] : memref<512x256xbf16, #tpu.memory_space<vmem>>, vector<512x256xbf16>
    %cst_14 = arith.constant dense<0.000000e+00> : vector<2x256xf32>
    %18 = tpu.matmul %16, %17, %cst_14 {dimension_numbers = #tpu.dot_dimension_numbers<[1], [0], [0], [1], [0, 0, 1, 1], [], []>} : vector<2x512xbf16>, vector<512x256xbf16>, vector<2x256xf32> -> vector<2x256xf32>
    %c0_15 = arith.constant 0 : index
    %c0_16 = arith.constant 0 : index
    %19 = vector.load %arg6[%c0_15, %c0_16] : memref<1x256xf32, #tpu.memory_space<vmem>>, vector<1x256xf32>
    %20 = vector.broadcast %19 : vector<1x256xf32> to vector<2x256xf32>
    %21 = arith.addf %18, %20 : vector<2x256xf32>
    %cst_17 = arith.constant 0.000000e+00 : f32
    %22 = vector.broadcast %cst_17 : f32 to vector<2x256xf32>
    %23 = arith.maximumf %21, %22 : vector<2x256xf32>
    %24 = arith.truncf %23 : vector<2x256xf32> to vector<2x256xbf16>
    %c0_18 = arith.constant 0 : index
    %c0_19 = arith.constant 0 : index
    %25 = vector.load %arg7[%c0_18, %c0_19] : memref<256x64xbf16, #tpu.memory_space<vmem>>, vector<256x64xbf16>
    %cst_20 = arith.constant dense<0.000000e+00> : vector<2x64xf32>
    %26 = tpu.matmul %24, %25, %cst_20 {dimension_numbers = #tpu.dot_dimension_numbers<[1], [0], [0], [1], [0, 0, 1, 1], [], []>} : vector<2x256xbf16>, vector<256x64xbf16>, vector<2x64xf32> -> vector<2x64xf32>
    %c0_21 = arith.constant 0 : index
    %c0_22 = arith.constant 0 : index
    %27 = vector.load %arg8[%c0_21, %c0_22] : memref<1x64xf32, #tpu.memory_space<vmem>>, vector<1x64xf32>
    %28 = vector.broadcast %27 : vector<1x64xf32> to vector<2x64xf32>
    %29 = arith.addf %26, %28 : vector<2x64xf32>
    %cst_23 = arith.constant 0.000000e+00 : f32
    %30 = vector.broadcast %cst_23 : f32 to vector<2x64xf32>
    %31 = arith.maximumf %29, %30 : vector<2x64xf32>
    %32 = arith.truncf %31 : vector<2x64xf32> to vector<2x64xbf16>
    %c0_24 = arith.constant 0 : index
    %c0_25 = arith.constant 0 : index
    %33 = vector.load %arg9[%c0_24, %c0_25] : memref<64x20xbf16, #tpu.memory_space<vmem>>, vector<64x20xbf16>
    %cst_26 = arith.constant dense<0.000000e+00> : vector<2x20xf32>
    %34 = tpu.matmul %32, %33, %cst_26 {dimension_numbers = #tpu.dot_dimension_numbers<[1], [0], [0], [1], [0, 0, 1, 1], [], []>} : vector<2x64xbf16>, vector<64x20xbf16>, vector<2x20xf32> -> vector<2x20xf32>
    %c0_27 = arith.constant 0 : index
    %c0_28 = arith.constant 0 : index
    %35 = vector.load %arg10[%c0_27, %c0_28] : memref<1x20xf32, #tpu.memory_space<vmem>>, vector<1x20xf32>
    %36 = vector.broadcast %35 : vector<1x20xf32> to vector<2x20xf32>
    %37 = arith.addf %34, %36 : vector<2x20xf32>
    %cst_29 = arith.constant 0.000000e+00 : f32
    %38 = vector.broadcast %cst_29 : f32 to vector<2x20xf32>
    %39 = arith.maximumf %37, %38 : vector<2x20xf32>
    %40 = arith.truncf %39 : vector<2x20xf32> to vector<2x20xbf16>
    %c0_30 = arith.constant 0 : index
    %c0_31 = arith.constant 0 : index
    %41 = vector.load %arg11[%c0_30, %c0_31] : memref<20x10xbf16, #tpu.memory_space<vmem>>, vector<20x10xbf16>
    %cst_32 = arith.constant dense<0.000000e+00> : vector<2x10xf32>
    %42 = tpu.matmul %40, %41, %cst_32 {dimension_numbers = #tpu.dot_dimension_numbers<[1], [0], [0], [1], [0, 0, 1, 1], [], []>} : vector<2x20xbf16>, vector<20x10xbf16>, vector<2x10xf32> -> vector<2x10xf32>
    %c0_33 = arith.constant 0 : index
    %c0_34 = arith.constant 0 : index
    %43 = vector.load %arg12[%c0_33, %c0_34] : memref<1x10xf32, #tpu.memory_space<vmem>>, vector<1x10xf32>
    %44 = vector.broadcast %43 : vector<1x10xf32> to vector<2x10xf32>
    %45 = arith.addf %42, %44 : vector<2x10xf32>
    %46 = arith.negf %45 : vector<2x10xf32>
    %47 = math.exp %46 : vector<2x10xf32>
    %cst_35 = arith.constant 1.000000e+00 : f32
    %48 = vector.broadcast %cst_35 : f32 to vector<2x10xf32>
    %49 = arith.addf %48, %47 : vector<2x10xf32>
    %50 = arith.divf %48, %49 : vector<2x10xf32>
    %c0_36 = arith.constant 0 : index
    %c0_37 = arith.constant 0 : index
    %51 = vector.load %arg13[%c0_36, %c0_37] : memref<2x10xf32, #tpu.memory_space<vmem>>, vector<2x10xf32>
    tpu.vector_store %arg13[%c0_36, %c0_37], %50 {strides = array<i32>} : memref<2x10xf32, #tpu.memory_space<vmem>>, vector<2x10xf32>,
    return
  }
}

</mosaic_0001>

<bundles_post_ra>
// kernel: classifier_forward.1
= control target key start
LH: loop header
LB: loop body
LE: loop exit
PB: predicated region body
PF: predicated region fallthrough
CT: control target
= control target key end

     0   :  { %18 = vsyncpa [#allocation3], 0  ;;  %s8932_s0 = inlined_call_operand.vmem [shape: bf16[2,1024], index: 0, kind: input, shape index: {}]   ;;  %s8933_s1 = inlined_call_operand.hbm [shape: bf16[1024,1024], index: 1, kind: input, shape index: {}]   ;;  %s8934_s2 = inlined_call_operand.hbm [shape: f32[1,1024], index: 2, kind: input, shape index: {}]   ;;  %s8935_s3 = inlined_call_operand.hbm [shape: bf16[1024,512], index: 3, kind: input, shape index: {}]   ;;  %s8936_s4 = inlined_call_operand.hbm [shape: f32[1,512], index: 4, kind: input, shape index: {}]   ;;  %s8937_s5 = inlined_call_operand.hbm [shape: bf16[512,256], index: 5, kind: input, shape index: {}]   ;;  %s8938_s6 = inlined_call_operand.hbm [shape: f32[1,256], index: 6, kind: input, shape index: {}]   ;;  %s8939_s7 = inlined_call_operand.vmem [shape: bf16[256,64], index: 7, kind: input, shape index: {}]   ;;  %s8940_s8 = inlined_call_operand.hbm [shape: f32[1,64], index: 8, kind: input, shape index: {}]   ;;  %s8941_s9 = inlined_call_operand.vmem [shape: bf16[64,20], index: 9, kind: input, shape index: {}]   ;;  %s8942_s10 = inlined_call_operand.hbm [shape: f32[1,20], index: 10, kind: input, shape index: {}]   ;;  %s8943_s11 = inlined_call_operand.vmem [shape: bf16[20,10], index: 11, kind: input, shape index: {}]   ;;  %s8944_s12 = inlined_call_operand.hbm [shape: f32[1,10], index: 12, kind: input, shape index: {}]   ;;  %s8945_s13 = inlined_call_operand.hbm [shape: f32[2,10], index: 13, kind: output, shape index: {}]  }
   0x1   :  { %19 = vsyncpa [#allocation6], 0 }
   0x2   :  { %20 = vsyncpa [#allocation9], 0 }
   0x3   :  { %21 = vsyncpa [#allocation12], 0 }
   0x4   :  { %22 = vsyncpa [#allocation15], 0 }
   0x5   :  { %23 = vsyncpa [#allocation4], 0  ;;  %s8490_s25 = smov [#allocation5]   ;;  %s8491_s27 = smov [#allocation8]  }
   0x6   :  { %s44_s26 = sshll.u32 %s8490_s25, 4  ;;  %s66_s28 = sshll.u32 %s8491_s27, 4  ;;  %s45_s26 = int_to_ptr.vmem [resolvable:$true] %s44_s26  ;;  %s67_s28 = int_to_ptr.vmem [resolvable:$true] %s66_s28 }
   0x7   :  { %s8258_s14 = scalar_lea.hbm %s8934_s2, 128 }
   0x8   :  { %p8259_p0 = scmp.ne.s32.totalorder %s8934_s2, %s8258_s14  ;;  %p8262_p1 = scmp.lt.u32.totalorder %s8258_s14, %s8934_s2 }
   0xa   :  { %p8264_p2 = pnand %p8262_p1, %p8259_p0 }
   0xc   :  { %8267 = shalt.err (!%p8264_p2)
}
   0xd   :  { %s8268_s19 = scalar_lea.vmem %s45_s26, 128  ;;  %p8273_p4 = scmp.lt.s32.totalorder %s45_s26, %s45_s26 }
   0xe   :  { %p8269_p3 = scmp.ne.s32.totalorder %s45_s26, %s8268_s19  ;;  %p8274_p5 = scmp.lt.s32.totalorder %s8268_s19, %s8268_s19 }
  0x10   :  { %p8275_p6 = por %p8274_p5, %p8273_p4 }
  0x12   :  { %p8276_p7 = pnand %p8275_p6, %p8269_p3 }
  0x14   :  { %8279 = shalt.err (!%p8276_p7)
}
  0x15   :  { %47 = dma.hbm_to_vmem [thread:$0]  %s8934_s2, 128, %s45_s26, [#allocation6]  }
  0x16   :  { %s8280_s24 = scalar_lea.hbm %s8936_s4, 64 }
  0x17   :  { %p8281_p8 = scmp.ne.s32.totalorder %s8936_s4, %s8280_s24  ;;  %p8284_p9 = scmp.lt.u32.totalorder %s8280_s24, %s8936_s4 }
  0x19   :  { %p8286_p10 = pnand %p8284_p9, %p8281_p8 }
  0x1b   :  { %8289 = shalt.err (!%p8286_p10)
}
  0x1c   :  { %s8290_s14 = scalar_lea.vmem %s67_s28, 64  ;;  %p8295_p12 = scmp.lt.s32.totalorder %s67_s28, %s67_s28 }
  0x1d   :  { %p8291_p11 = scmp.ne.s32.totalorder %s67_s28, %s8290_s14  ;;  %p8296_p13 = scmp.lt.s32.totalorder %s8290_s14, %s8290_s14 }
  0x1f   :  { %p8297_p0 = por %p8296_p13, %p8295_p12 }
  0x21   :  { %p8298_p1 = pnand %p8297_p0, %p8291_p11 }
  0x23   :  { %8301 = shalt.err (!%p8298_p1)
}
  0x24   :  { %69 = dma.hbm_to_vmem [thread:$0]  %s8936_s4, 64, %s67_s28, [#allocation9]  }
  0x25   :  { %s8492_s15 = smov [#allocation11]   ;;  %s8493_s17 = smov [#allocation14]  }
  0x26   :  { %s88_s16 = sshll.u32 %s8492_s15, 4  ;;  %s112_s18 = sshll.u32 %s8493_s17, 4  ;;  %s89_s16 = int_to_ptr.vmem [resolvable:$true] %s88_s16  ;;  %s113_s18 = int_to_ptr.vmem [resolvable:$true] %s112_s18 }
  0x27   :  { %s8302_s21 = scalar_lea.hbm %s8938_s6, 32 }
  0x28   :  { %p8303_p2 = scmp.ne.s32.totalorder %s8938_s6, %s8302_s21  ;;  %p8306_p3 = scmp.lt.u32.totalorder %s8302_s21, %s8938_s6 }
  0x2a   :  { %p8308_p4 = pnand %p8306_p3, %p8303_p2 }
  0x2c   :  { %8311 = shalt.err (!%p8308_p4)
}
  0x2d   :  { %s8312_s4 = scalar_lea.vmem %s89_s16, 32  ;;  %p8317_p6 = scmp.lt.s32.totalorder %s89_s16, %s89_s16 }
  0x2e   :  { %p8313_p5 = scmp.ne.s32.totalorder %s89_s16, %s8312_s4  ;;  %p8318_p7 = scmp.lt.s32.totalorder %s8312_s4, %s8312_s4 }
  0x30   :  { %p8319_p8 = por %p8318_p7, %p8317_p6 }
  0x32   :  { %p8320_p9 = pnand %p8319_p8, %p8313_p5 }
  0x34   :  { %8323 = shalt.err (!%p8320_p9)
}
  0x35   :  { %91 = dma.hbm_to_vmem [thread:$0]  %s8938_s6, 32, %s89_s16, [#allocation12]  }
  0x36   :  { %s8324_s14 = scalar_lea.hbm %s8942_s10, 16 }
  0x37   :  { %p8325_p10 = scmp.ne.s32.totalorder %s8942_s10, %s8324_s14  ;;  %p8328_p11 = scmp.lt.u32.totalorder %s8324_s14, %s8942_s10 }
  0x39   :  { %p8330_p12 = pnand %p8328_p11, %p8325_p10 }
  0x3b   :  { %8333 = shalt.err (!%p8330_p12)
}
  0x3c   :  { %s8334_s19 = scalar_lea.vmem %s113_s18, 16  ;;  %s8338_s20 = scalar_lea.vmem %s113_s18, 32 }
  0x3d   :  { %p8335_p13 = scmp.ne.s32.totalorder %s113_s18, %s8334_s19  ;;  %p8339_p0 = scmp.lt.s32.totalorder %s113_s18, %s113_s18 }
  0x3e   :  { %p8340_p1 = scmp.lt.s32.totalorder %s8338_s20, %s8334_s19 }
  0x40   :  { %p8341_p2 = por %p8340_p1, %p8339_p0 }
  0x42   :  { %p8342_p3 = pnand %p8341_p2, %p8335_p13 }
  0x44   :  { %8345 = shalt.err (!%p8342_p3)
}
  0x45   :  { %115 = dma.hbm_to_vmem [thread:$0]  %s8942_s10, 16, %s113_s18, [#allocation15]  }
  0x46   :  { %s8494_s21 = smov [#allocation2]   ;;  %s8346_s25 = scalar_lea.hbm %s8933_s1, 65536 }
  0x47   :  { %s31_s22 = sshll.u32 %s8494_s21, 4  ;;  %p8347_p4 = scmp.ne.s32.totalorder %s8933_s1, %s8346_s25  ;;  %s32_s22 = int_to_ptr.vmem [resolvable:$true] %s31_s22 }
  0x48   :  { %p8350_p5 = scmp.lt.u32.totalorder %s8346_s25, %s8933_s1 }
  0x4a   :  { %p8352_p6 = pnand %p8350_p5, %p8347_p4 }
  0x4c   :  { %8355 = shalt.err (!%p8352_p6)
}
  0x4d   :  { %s8356_s30 = scalar_lea.vmem %s32_s22, 65536  ;;  %p8361_p8 = scmp.lt.s32.totalorder %s32_s22, %s32_s22 }
  0x4e   :  { %p8357_p7 = scmp.ne.s32.totalorder %s32_s22, %s8356_s30  ;;  %p8362_p9 = scmp.lt.s32.totalorder %s8356_s30, %s8356_s30 }
  0x50   :  { %p8363_p10 = por %p8362_p9, %p8361_p8 }
  0x52   :  { %p8364_p11 = pnand %p8363_p10, %p8357_p7 }
  0x54   :  { %8367 = shalt.err (!%p8364_p11)
}
  0x55   :  { %s8495_s10 = smov 512   ;;  %s8496_s18 = smov 32  }
  0x56   :  { %37 = dma.hbm_to_vmem [thread:$0]  %s8933_s1, 65536, %s32_s22, [#allocation3], %s8495_s10, %s8495_s10, %s8496_s18  }
  0x57   :  { %s8497_s26 = smov [#allocation7]   ;;  %s8368_s20 = scalar_lea.hbm %s8935_s3, 32768 }
  0x58   :  { %s53_s15 = sshll.u32 %s8497_s26, 4  ;;  %p8369_p12 = scmp.ne.s32.totalorder %s8935_s3, %s8368_s20  ;;  %s54_s15 = int_to_ptr.vmem [resolvable:$true] %s53_s15 }
  0x59   :  { %p8372_p13 = scmp.lt.u32.totalorder %s8368_s20, %s8935_s3 }
  0x5b   :  { %p8374_p0 = pnand %p8372_p13, %p8369_p12 }
  0x5d   :  { %8377 = shalt.err (!%p8374_p0)
}
  0x5e   :  { %s8378_s24 = scalar_lea.vmem %s54_s15, 32768  ;;  %p8383_p2 = scmp.lt.s32.totalorder %s54_s15, %s54_s15 }
  0x5f   :  { %p8379_p1 = scmp.ne.s32.totalorder %s54_s15, %s8378_s24  ;;  %p8384_p3 = scmp.lt.s32.totalorder %s8378_s24, %s8378_s24 }
  0x61   :  { %p8385_p4 = por %p8384_p3, %p8383_p2 }
  0x63   :  { %p8386_p5 = pnand %p8385_p4, %p8379_p1 }
  0x65   :  { %8389 = shalt.err (!%p8386_p5)
}
  0x66   :  { %s8498_s1 = smov 256   ;;  %s8499_s22 = smov 16  }
  0x67   :  { %59 = dma.hbm_to_vmem [thread:$0]  %s8935_s3, 32768, %s54_s15, [#allocation6], %s8498_s1, %s8498_s1, %s8499_s22  }
  0x68   :  { %s8500_s28 = smov [#allocation10]   ;;  %s8390_s10 = scalar_lea.hbm %s8937_s5, 8192 }
  0x69   :  { %s75_s27 = sshll.u32 %s8500_s28, 4  ;;  %p8391_p6 = scmp.ne.s32.totalorder %s8937_s5, %s8390_s10  ;;  %s76_s27 = int_to_ptr.vmem [resolvable:$true] %s75_s27 }
  0x6a   :  { %p8394_p7 = scmp.lt.u32.totalorder %s8390_s10, %s8937_s5 }
  0x6c   :  { %p8396_p8 = pnand %p8394_p7, %p8391_p6 }
  0x6e   :  { %8399 = shalt.err (!%p8396_p8)
}
  0x6f   :  { %s8400_s17 = scalar_lea.vmem %s76_s27, 8192  ;;  %p8405_p10 = scmp.lt.s32.totalorder %s76_s27, %s76_s27 }
  0x70   :  { %p8401_p9 = scmp.ne.s32.totalorder %s76_s27, %s8400_s17  ;;  %p8406_p11 = scmp.lt.s32.totalorder %s8400_s17, %s8400_s17 }
  0x72   :  { %p8407_p12 = por %p8406_p11, %p8405_p10 }
  0x74   :  { %p8408_p13 = pnand %p8407_p12, %p8401_p9 }
  0x76   :  { %8411 = shalt.err (!%p8408_p13)
}
  0x77   :  { %s8501_s3 = smov 128   ;;  %s8502_s15 = smov 8  }
  0x78   :  { %81 = dma.hbm_to_vmem [thread:$0]  %s8937_s5, 8192, %s76_s27, [#allocation9], %s8501_s3, %s8501_s3, %s8502_s15  }
  0x79   :  { %s8503_s6 = smov [#allocation13]   ;;  %s8504_s21 = smov [#allocation16]  }
  0x7a   :  { %s100_s16 = sshll.u32 %s8503_s6, 4  ;;  %s124_s23 = sshll.u32 %s8504_s21, 4  ;;  %s101_s16 = int_to_ptr.vmem [resolvable:$true] %s100_s16  ;;  %s125_s23 = int_to_ptr.vmem [resolvable:$true] %s124_s23 }
  0x7b   :  { %s8412_s22 = scalar_lea.hbm %s8940_s8, 16 }
  0x7c   :  { %p8413_p0 = scmp.ne.s32.totalorder %s8940_s8, %s8412_s22  ;;  %p8416_p1 = scmp.lt.u32.totalorder %s8412_s22, %s8940_s8 }
  0x7e   :  { %p8418_p2 = pnand %p8416_p1, %p8413_p0 }
  0x80   :  { %8421 = shalt.err (!%p8418_p2)
}
  0x81   :  { %s8422_s5 = scalar_lea.vmem %s101_s16, 16  ;;  %s8426_s27 = scalar_lea.vmem %s101_s16, 32 }
  0x82   :  { %p8423_p3 = scmp.ne.s32.totalorder %s101_s16, %s8422_s5  ;;  %p8427_p4 = scmp.lt.s32.totalorder %s101_s16, %s101_s16 }
  0x83   :  { %p8428_p5 = scmp.lt.s32.totalorder %s8426_s27, %s8422_s5 }
  0x85   :  { %p8429_p6 = por %p8428_p5, %p8427_p4 }
  0x87   :  { %p8430_p7 = pnand %p8429_p6, %p8423_p3 }
  0x89   :  { %8433 = shalt.err (!%p8430_p7)
}
  0x8a   :  { %103 = dma.hbm_to_vmem [thread:$0]  %s8940_s8, 16, %s101_s16, [#allocation12]  }
  0x8b   :  { %s8434_s2 = scalar_lea.hbm %s8944_s12, 16 }
  0x8c   :  { %p8435_p8 = scmp.ne.s32.totalorder %s8944_s12, %s8434_s2  ;;  %p8438_p9 = scmp.lt.u32.totalorder %s8434_s2, %s8944_s12 }
  0x8e   :  { %p8440_p10 = pnand %p8438_p9, %p8435_p8 }
  0x90   :  { %8443 = shalt.err (!%p8440_p10)
}
  0x91   :  { %s8444_s19 = scalar_lea.vmem %s125_s23, 16  ;;  %s8448_s20 = scalar_lea.vmem %s125_s23, 32 }
  0x92   :  { %p8445_p11 = scmp.ne.s32.totalorder %s125_s23, %s8444_s19  ;;  %p8449_p12 = scmp.lt.s32.totalorder %s125_s23, %s125_s23 }
  0x93   :  { %p8450_p13 = scmp.lt.s32.totalorder %s8448_s20, %s8444_s19 }
  0x95   :  { %p8451_p0 = por %p8450_p13, %p8449_p12 }
  0x97   :  { %p8452_p1 = pnand %p8451_p0, %p8445_p11 }
  0x99   :  { %8455 = shalt.err (!%p8452_p1)
}
  0x9a   :  { %127 = dma.hbm_to_vmem [thread:$0]  %s8944_s12, 16, %s125_s23, [#allocation15]  }
  0x9b   :  { %8478 = dma.done.wait [#allocation3], 65536  }
  0x9c   :  { %8479 = vsyncadd [#allocation3], 4294901760 }
  0x9d   :  { %8480 = dma.done.wait [#allocation6], 32896  }
  0x9e   :  { %8481 = vsyncadd [#allocation6], 4294934400 }
  0x9f   :  { %8482 = dma.done.wait [#allocation9], 8256  }
  0xa0   :  { %8483 = vsyncadd [#allocation9], 4294959040 }
  0xa1   :  { %8484 = dma.done.wait [#allocation12], 48  }
  0xa2   :  { %8485 = vsyncadd [#allocation12], 4294967248 }
  0xa3   :  { %8486 = dma.done.wait [#allocation15], 32  }
  0xa4   :  { %8487 = vsyncadd [#allocation15], 4294967264  ;;  %v157_v0 = vld [vmem:[#allocation2] sm:$0xff]  ;;  %v671_v32 = vlaneseq  ;;  %v8505_v33 = vmov 1966171168   ;;  %vm8507_vm0 = vmmov 0  }
  0xa5   :  { %v161_v1 = vld [vmem:[#allocation2 + $0x20] sm:$0xff]  ;;  %v714_v34 = vunpack.c.l.s4 %v8505_v33  ;;  %vm6593_vm1 = vcmask 523264   ;;  %vm6662_vm2 = vcmask 1041408   ;;  %vm6658_vm3 = vcmask 162816  }
  0xa6   :  { %v285_v2 = vld [vmem:[#allocation2 + $0x400] sm:$0xff]  ;;  %v6734_v3 = vcombine.high %v157_v0, %v161_v1  ;;  %v6733_v5 = vcombine.low %v157_v0, %v161_v1  ;;  %v8687_v43 = vshrl.u32 %v671_v32, 7  ;;  %vm6712_vm4 = vcmask 74752  }
  0xa7   :  { %v289_v4 = vld [vmem:[#allocation2 + $0x420] sm:$0xff]  ;;  %v715_v44 = vunpack.c.0.s8 %v714_v34 }
  0xa8   :  { %v165_v6 = vld [vmem:[#allocation2 + $0x40] sm:$0xff]  ;;  %v6862_v8 = vcombine.high %v285_v2, %v289_v4  ;;  %v6861_v9 = vcombine.low %v285_v2, %v289_v4  ;;  %3329 = vmatprep.subr.bf16.mxu1 %v6734_v3 }
  0xa9   :  { %v169_v7 = vld [vmem:[#allocation2 + $0x60] sm:$0xff]  ;;  %3330 = vmatpush1.bf16.msra.mxu1 %v6733_v5  ;;  %v8690_v53 = vsub.s32 %v715_v44, %v8687_v43 }
  0xaa   :  { %v6742_v10 = vcombine.high %v165_v6, %v169_v7  ;;  %v293_v11 = vld [vmem:[#allocation2 + $0x440] sm:$0xff]  ;;  %3370 = vmatprep.subr.bf16.mxu0 %v6862_v8  ;;  %v6741_v18 = vcombine.low %v165_v6, %v169_v7 }
  0xab   :  { %v297_v12 = vld [vmem:[#allocation2 + $0x460] sm:$0xff]  ;;  %3371 = vmatpush1.bf16.msra.mxu0 %v6861_v9 }
  0xac   :  { %v173_v13 = vld [vmem:[#allocation2 + $0x80] sm:$0xff]  ;;  %v6870_v14 = vcombine.high %v293_v11, %v297_v12  ;;  %3331 = vmatprep.subr.bf16.mxu1 %v6742_v10  ;;  %v6869_v19 = vcombine.low %v293_v11, %v297_v12 }
  0xad   :  { %v177_v15 = vld [vmem:[#allocation2 + $0xa0] sm:$0xff]  ;;  %3332 = vmatpush1.bf16.msra.mxu1 %v6741_v18 }
  0xae   :  { %v301_v16 = vld [vmem:[#allocation2 + $0x480] sm:$0xff]  ;;  %v6750_v20 = vcombine.high %v173_v13, %v177_v15  ;;  %3372 = vmatprep.subr.bf16.mxu0 %v6870_v14  ;;  %v6749_v26 = vcombine.low %v173_v13, %v177_v15 }
  0xaf   :  { %v305_v17 = vld [vmem:[#allocation2 + $0x4a0] sm:$0xff]  ;;  %3373 = vmatpush1.bf16.msra.mxu0 %v6869_v19 }
  0xb0   :  { %v6878_v21 = vcombine.high %v301_v16, %v305_v17  ;;  %v181_v22 = vld [vmem:[#allocation2 + $0xc0] sm:$0xff]  ;;  %3333 = vmatprep.subr.bf16.mxu1 %v6750_v20  ;;  %v6877_v27 = vcombine.low %v301_v16, %v305_v17 }
  0xb1   :  { %v185_v23 = vld [vmem:[#allocation2 + $0xe0] sm:$0xff]  ;;  %3334 = vmatpush1.bf16.msra.mxu1 %v6749_v26 }
  0xb2   :  { %v309_v24 = vld [vmem:[#allocation2 + $0x4c0] sm:$0xff]  ;;  %v6758_v28 = vcombine.high %v181_v22, %v185_v23  ;;  %3374 = vmatprep.subr.bf16.mxu0 %v6878_v21  ;;  %v6757_v37 = vcombine.low %v181_v22, %v185_v23 }
  0xb3   :  { %v313_v25 = vld [vmem:[#allocation2 + $0x4e0] sm:$0xff]  ;;  %3375 = vmatpush1.bf16.msra.mxu0 %v6877_v27 }
  0xb4   :  { %v6886_v29 = vcombine.high %v309_v24, %v313_v25  ;;  %v189_v30 = vld [vmem:[#allocation2 + $0x100] sm:$0xff]  ;;  %3335 = vmatprep.subr.bf16.mxu1 %v6758_v28  ;;  %v6885_v38 = vcombine.low %v309_v24, %v313_v25 }
  0xb5   :  { %v193_v31 = vld [vmem:[#allocation2 + $0x120] sm:$0xff]  ;;  %3336 = vmatpush1.bf16.msra.mxu1 %v6757_v37 }
  0xb6   :  { %v317_v35 = vld [vmem:[#allocation2 + $0x500] sm:$0xff]  ;;  %v6766_v39 = vcombine.high %v189_v30, %v193_v31  ;;  %3376 = vmatprep.subr.bf16.mxu0 %v6886_v29  ;;  %v6765_v47 = vcombine.low %v189_v30, %v193_v31 }
  0xb7   :  { %v321_v36 = vld [vmem:[#allocation2 + $0x520] sm:$0xff]  ;;  %3377 = vmatpush1.bf16.msra.mxu0 %v6885_v38 }
  0xb8   :  { %v6894_v40 = vcombine.high %v317_v35, %v321_v36  ;;  %v197_v41 = vld [vmem:[#allocation2 + $0x140] sm:$0xff]  ;;  %3337 = vmatprep.subr.bf16.mxu1 %v6766_v39  ;;  %v6893_v48 = vcombine.low %v317_v35, %v321_v36 }
  0xb9   :  { %v201_v42 = vld [vmem:[#allocation2 + $0x160] sm:$0xff]  ;;  %3338 = vmatpush1.bf16.msra.mxu1 %v6765_v47 }
  0xba   :  { %v325_v45 = vld [vmem:[#allocation2 + $0x540] sm:$0xff]  ;;  %v6774_v49 = vcombine.high %v197_v41, %v201_v42  ;;  %3378 = vmatprep.subr.bf16.mxu0 %v6894_v40  ;;  %v6773_v56 = vcombine.low %v197_v41, %v201_v42 }
  0xbb   :  { %v329_v46 = vld [vmem:[#allocation2 + $0x560] sm:$0xff]  ;;  %3379 = vmatpush1.bf16.msra.mxu0 %v6893_v48 }
  0xbc   :  { %v6902_v50 = vcombine.high %v325_v45, %v329_v46  ;;  %v205_v51 = vld [vmem:[#allocation2 + $0x180] sm:$0xff]  ;;  %3339 = vmatprep.subr.bf16.mxu1 %v6774_v49  ;;  %v6901_v57 = vcombine.low %v325_v45, %v329_v46 }
  0xbd   :  { %v209_v52 = vld [vmem:[#allocation2 + $0x1a0] sm:$0xff]  ;;  %3340 = vmatpush1.bf16.msra.mxu1 %v6773_v56 }
  0xbe   :  { %v333_v54 = vld [vmem:[#allocation2 + $0x580] sm:$0xff]  ;;  %v6782_v58 = vcombine.high %v205_v51, %v209_v52  ;;  %3380 = vmatprep.subr.bf16.mxu0 %v6902_v50  ;;  %v6781_v2 = vcombine.low %v205_v51, %v209_v52 }
  0xbf   :  { %v337_v55 = vld [vmem:[#allocation2 + $0x5a0] sm:$0xff]  ;;  %3381 = vmatpush1.bf16.msra.mxu0 %v6901_v57 }
  0xc0   :  { %v156_v59 = vld [vmem:[%s8932_s0] sm:$0xff]  ;;  %v6910_v60 = vcombine.high %v333_v54, %v337_v55  ;;  %3341 = vmatprep.subr.bf16.mxu1 %v6782_v58  ;;  %v6909_v4 = vcombine.low %v333_v54, %v337_v55 }
  0xc1   :  { %v213_v61 = vld [vmem:[#allocation2 + $0x1c0] sm:$0xff]  ;;  %v8696_v63 = vrot.slane %v156_v59, %v8690_v53  ;;  %3342 = vmatpush1.bf16.msra.mxu1 %v6781_v2  ;;  %v712_v19 = vcombine.high %v156_v59, %v156_v59 }
  0xc2   :  { %v217_v62 = vld [vmem:[#allocation2 + $0x1e0] sm:$0xff]  ;;  %3382 = vmatprep.subr.bf16.mxu0 %v6910_v60 }
  0xc3   :  { %v341_v0 = vld [vmem:[#allocation2 + $0x5c0] sm:$0xff]  ;;  %v727_v3 = vcombine.high %v8696_v63, %v8696_v63  ;;  %v6790_v5 = vcombine.high %v213_v61, %v217_v62  ;;  %v6789_v12 = vcombine.low %v213_v61, %v217_v62  ;;  %3383 = vmatpush1.bf16.msra.mxu0 %v6909_v4  ;;  %v8710_v28 = vrot.slane %v712_v19, %v8690_v53 }
  0xc4   :  { %v345_v1 = vld [vmem:[#allocation2 + $0x5e0] sm:$0xff] }
  0xc5   :  { %v6918_v6 = vcombine.high %v341_v0, %v345_v1  ;;  %v221_v7 = vld [vmem:[#allocation2 + $0x200] sm:$0xff]  ;;  %v8701_v9 = vrot.slane %v727_v3, %v8690_v53  ;;  %3343 = vmatprep.subr.bf16.mxu1 %v6790_v5  ;;  %v6917_v14 = vcombine.low %v341_v0, %v345_v1  ;;  %v8714_v32 = vrot.slane %v8710_v28, %v8690_v53 }
  0xc6   :  { %v225_v8 = vld [vmem:[#allocation2 + $0x220] sm:$0xff]  ;;  %3344 = vmatpush1.bf16.msra.mxu1 %v6789_v12 }
  0xc7   :  { %v349_v10 = vld [vmem:[#allocation2 + $0x600] sm:$0xff]  ;;  %3361 = vmatprep.mubr.bf16.mxu1 %v8701_v9  ;;  %v8706_v13 = vcombine.high %v8701_v9, %v8701_v9  ;;  %v6798_v15 = vcombine.high %v221_v7, %v225_v8  ;;  %3384 = vmatprep.subr.bf16.mxu0 %v6918_v6  ;;  %v6797_v22 = vcombine.low %v221_v7, %v225_v8 }
  0xc8   :  { %v353_v11 = vld [vmem:[#allocation2 + $0x620] sm:$0xff]  ;;  %3385 = vmatpush1.bf16.msra.mxu0 %v6917_v14 }
  0xc9   :  { %v6926_v16 = vcombine.high %v349_v10, %v353_v11  ;;  %v229_v17 = vld [vmem:[#allocation2 + $0x240] sm:$0xff]  ;;  %3402 = vmatprep.mubr.bf16.mxu0 %v8706_v13  ;;  %3345 = vmatprep.subr.bf16.mxu1 %v6798_v15  ;;  %v6925_v23 = vcombine.low %v349_v10, %v353_v11 }
  0xca   :  { %v233_v18 = vld [vmem:[#allocation2 + $0x260] sm:$0xff]  ;;  %3346 = vmatpush1.bf16.msra.mxu1 %v6797_v22  ;;  %v8718_v22 = vrot.slane %v8696_v63, %v8690_v53 }
  0xcb   :  { %v357_v20 = vld [vmem:[#allocation2 + $0x640] sm:$0xff]  ;;  %v6806_v24 = vcombine.high %v229_v17, %v233_v18  ;;  %3386 = vmatprep.subr.bf16.mxu0 %v6926_v16  ;;  %v6805_v31 = vcombine.low %v229_v17, %v233_v18  ;;  %v158_v17 = vld [vmem:[#allocation2 + $0x8] sm:$0xff] }
  0xcc   :  { %v361_v21 = vld [vmem:[#allocation2 + $0x660] sm:$0xff]  ;;  %3387 = vmatpush1.bf16.msra.mxu0 %v6925_v23  ;;  %v162_v18 = vld [vmem:[#allocation2 + $0x28] sm:$0xff] }
  0xcd   :  { %v6934_v25 = vcombine.high %v357_v20, %v361_v21  ;;  %v237_v26 = vld [vmem:[#allocation2 + $0x280] sm:$0xff]  ;;  %3347 = vmatprep.subr.bf16.mxu1 %v6806_v24  ;;  %v6933_v33 = vcombine.low %v357_v20, %v361_v21  ;;  %v6736_v24 = vcombine.high %v158_v17, %v162_v18 }
  0xce   :  { %v241_v27 = vld [vmem:[#allocation2 + $0x2a0] sm:$0xff]  ;;  %3348 = vmatpush1.bf16.msra.mxu1 %v6805_v31 }
  0xcf   :  { %v365_v29 = vld [vmem:[#allocation2 + $0x680] sm:$0xff]  ;;  %v6814_v34 = vcombine.high %v237_v26, %v241_v27  ;;  %3388 = vmatprep.subr.bf16.mxu0 %v6934_v25  ;;  %v6813_v40 = vcombine.low %v237_v26, %v241_v27  ;;  %v166_v26 = vld [vmem:[#allocation2 + $0x48] sm:$0xff] }
  0xd0   :  { %v369_v30 = vld [vmem:[#allocation2 + $0x6a0] sm:$0xff]  ;;  %3389 = vmatpush1.bf16.msra.mxu0 %v6933_v33  ;;  %v170_v27 = vld [vmem:[#allocation2 + $0x68] sm:$0xff]  ;;  %v6735_v33 = vcombine.low %v158_v17, %v162_v18 }
  0xd1   :  { %v6942_v35 = vcombine.high %v365_v29, %v369_v30  ;;  %v245_v36 = vld [vmem:[#allocation2 + $0x2c0] sm:$0xff]  ;;  %3349 = vmatprep.subr.bf16.mxu1 %v6814_v34  ;;  %v6941_v41 = vcombine.low %v365_v29, %v369_v30  ;;  %v728_v29 = vcombine.high %v8710_v28, %v8710_v28  ;;  %v8724_v34 = vcombine.high %v8718_v22, %v8718_v22  ;;  %v214_v18 = vld [vmem:[#allocation2 + $0x1c8] sm:$0xff] }
  0xd2   :  { %v249_v37 = vld [vmem:[#allocation2 + $0x2e0] sm:$0xff]  ;;  %3350 = vmatpush1.bf16.msra.mxu1 %v6813_v40  ;;  %v178_v40 = vld [vmem:[#allocation2 + $0xa8] sm:$0xff] }
  0xd3   :  { %v373_v38 = vld [vmem:[#allocation2 + $0x6c0] sm:$0xff]  ;;  %v6822_v42 = vcombine.high %v245_v36, %v249_v37  ;;  %3390 = vmatprep.subr.bf16.mxu0 %v6942_v35  ;;  %v6821_v49 = vcombine.low %v245_v36, %v249_v37  ;;  %v6744_v35 = vcombine.high %v166_v26, %v170_v27  ;;  %v8727_v28 = vrot.slane %v728_v29, %v8690_v53 }
  0xd4   :  { %v377_v39 = vld [vmem:[#allocation2 + $0x6e0] sm:$0xff]  ;;  %3391 = vmatpush1.bf16.msra.mxu0 %v6941_v41  ;;  %v6743_v41 = vcombine.low %v166_v26, %v170_v27  ;;  %v222_v27 = vld [vmem:[#allocation2 + $0x208] sm:$0xff] }
  0xd5   :  { %v6950_v44 = vcombine.high %v373_v38, %v377_v39  ;;  %v253_v45 = vld [vmem:[#allocation2 + $0x300] sm:$0xff]  ;;  %3351 = vmatprep.subr.bf16.mxu1 %v6822_v42  ;;  %v6949_v50 = vcombine.low %v373_v38, %v377_v39  ;;  %v174_v38 = vld [vmem:[#allocation2 + $0x88] sm:$0xff] }
  0xd6   :  { %v257_v46 = vld [vmem:[#allocation2 + $0x320] sm:$0xff]  ;;  %3352 = vmatpush1.bf16.msra.mxu1 %v6821_v49  ;;  %v186_v49 = vld [vmem:[#allocation2 + $0xe8] sm:$0xff]  ;;  %v6751_v53 = vcombine.low %v174_v38, %v178_v40 }
  0xd7   :  { %v381_v47 = vld [vmem:[#allocation2 + $0x700] sm:$0xff]  ;;  %v6830_v51 = vcombine.high %v253_v45, %v257_v46  ;;  %3392 = vmatprep.subr.bf16.mxu0 %v6950_v44  ;;  %v6829_v58 = vcombine.low %v253_v45, %v257_v46  ;;  %v6752_v44 = vcombine.high %v174_v38, %v178_v40 }
  0xd8   :  { %v385_v48 = vld [vmem:[#allocation2 + $0x720] sm:$0xff]  ;;  %3393 = vmatpush1.bf16.msra.mxu0 %v6949_v50 }
  0xd9   :  { %v6958_v52 = vcombine.high %v381_v47, %v385_v48  ;;  %v261_v54 = vld [vmem:[#allocation2 + $0x340] sm:$0xff]  ;;  %3353 = vmatprep.subr.bf16.mxu1 %v6830_v51  ;;  %v6957_v59 = vcombine.low %v381_v47, %v385_v48  ;;  %v182_v47 = vld [vmem:[#allocation2 + $0xc8] sm:$0xff] }
  0xda   :  { %v265_v55 = vld [vmem:[#allocation2 + $0x360] sm:$0xff]  ;;  %3354 = vmatpush1.bf16.msra.mxu1 %v6829_v58  ;;  %v6760_v51 = vcombine.high %v182_v47, %v186_v49  ;;  %v6759_v58 = vcombine.low %v182_v47, %v186_v49 }
  0xdb   :  { %v389_v56 = vld [vmem:[#allocation2 + $0x740] sm:$0xff]  ;;  %v6838_v60 = vcombine.high %v261_v54, %v265_v55  ;;  %3394 = vmatprep.subr.bf16.mxu0 %v6958_v52  ;;  %v6837_v3 = vcombine.low %v261_v54, %v265_v55  ;;  %v190_v55 = vld [vmem:[#allocation2 + $0x108] sm:$0xff] }
  0xdc   :  { %v393_v57 = vld [vmem:[#allocation2 + $0x760] sm:$0xff]  ;;  %3395 = vmatpush1.bf16.msra.mxu0 %v6957_v59 }
  0xdd   :  { %v6966_v61 = vcombine.high %v389_v56, %v393_v57  ;;  %v269_v62 = vld [vmem:[#allocation2 + $0x380] sm:$0xff]  ;;  %3355 = vmatprep.subr.bf16.mxu1 %v6838_v60  ;;  %v6965_v4 = vcombine.low %v389_v56, %v393_v57  ;;  %v194_v57 = vld [vmem:[#allocation2 + $0x128] sm:$0xff] }
  0xde   :  { %v273_v0 = vld [vmem:[#allocation2 + $0x3a0] sm:$0xff]  ;;  %3356 = vmatpush1.bf16.msra.mxu1 %v6837_v3  ;;  %v6768_v60 = vcombine.high %v190_v55, %v194_v57  ;;  %v6767_v3 = vcombine.low %v190_v55, %v194_v57 }
  0xdf   :  { %v397_v1 = vld [vmem:[#allocation2 + $0x780] sm:$0xff]  ;;  %v6846_v5 = vcombine.high %v269_v62, %v273_v0  ;;  %3396 = vmatprep.subr.bf16.mxu0 %v6966_v61  ;;  %v6845_v12 = vcombine.low %v269_v62, %v273_v0  ;;  %v198_v0 = vld [vmem:[#allocation2 + $0x148] sm:$0xff] }
  0xe0   :  { %v401_v2 = vld [vmem:[#allocation2 + $0x7a0] sm:$0xff]  ;;  %3397 = vmatpush1.bf16.msra.mxu0 %v6965_v4 }
  0xe1   :  { %v6974_v6 = vcombine.high %v397_v1, %v401_v2  ;;  %v277_v7 = vld [vmem:[#allocation2 + $0x3c0] sm:$0xff]  ;;  %3357 = vmatprep.subr.bf16.mxu1 %v6846_v5  ;;  %v6973_v14 = vcombine.low %v397_v1, %v401_v2  ;;  %v202_v2 = vld [vmem:[#allocation2 + $0x168] sm:$0xff] }
  0xe2   :  { %v281_v8 = vld [vmem:[#allocation2 + $0x3e0] sm:$0xff]  ;;  %3358 = vmatpush1.bf16.msra.mxu1 %v6845_v12  ;;  %v6776_v5 = vcombine.high %v198_v0, %v202_v2  ;;  %v6775_v12 = vcombine.low %v198_v0, %v202_v2 }
  0xe3   :  { %v405_v10 = vld [vmem:[#allocation2 + $0x7c0] sm:$0xff]  ;;  %v6854_v15 = vcombine.high %v277_v7, %v281_v8  ;;  %3398 = vmatprep.subr.bf16.mxu0 %v6974_v6  ;;  %v6853_v21 = vcombine.low %v277_v7, %v281_v8  ;;  %v206_v8 = vld [vmem:[#allocation2 + $0x188] sm:$0xff] }
  0xe4   :  { %v409_v11 = vld [vmem:[#allocation2 + $0x7e0] sm:$0xff]  ;;  %3399 = vmatpush1.bf16.msra.mxu0 %v6973_v14 }
  0xe5   :  { %v6982_v16 = vcombine.high %v405_v10, %v409_v11  ;;  %v413_v19 = vld [vmem:[#allocation2 + $0x800] sm:$0xff]  ;;  %3359 = vmatprep.subr.bf16.mxu1 %v6854_v15  ;;  %v6981_v23 = vcombine.low %v405_v10, %v409_v11  ;;  %v210_v11 = vld [vmem:[#allocation2 + $0x1a8] sm:$0xff] }
  0xe6   :  { %v417_v20 = vld [vmem:[#allocation2 + $0x820] sm:$0xff]  ;;  %3360 = vmatpush1.bf16.msra.mxu1 %v6853_v21  ;;  %v6784_v15 = vcombine.high %v206_v8, %v210_v11  ;;  %v6783_v21 = vcombine.low %v206_v8, %v210_v11 }
  0xe7   :  { %3400 = vmatprep.subr.bf16.mxu0 %v6982_v16  ;;  %v6990_v25 = vcombine.high %v413_v19, %v417_v20  ;;  %v421_v30 = vld [vmem:[#allocation2 + $0x840] sm:$0xff]  ;;  %v6989_v63 = vcombine.low %v413_v19, %v417_v20  ;;  %3493 = vmatprep.subr.bf16.mxu1 %v6736_v24  ;;  %v218_v20 = vld [vmem:[#allocation2 + $0x1e8] sm:$0xff] }
  0xe8   :  { %v425_v31 = vld [vmem:[#allocation2 + $0x860] sm:$0xff]  ;;  %3401 = vmatpush1.bf16.msra.mxu0 %v6981_v23  ;;  %v6792_v24 = vcombine.high %v214_v18, %v218_v20 }
  0xe9   :  { %v429_v36 = vld [vmem:[#allocation2 + $0x880] sm:$0xff]  ;;  %3411 = vmatprep.subr.bf16.mxu0 %v6990_v25  ;;  %v6998_v39 = vcombine.high %v421_v30, %v425_v31  ;;  %3362 = vmatmul.mubr.bf16.vlgmr.msra.gmra.mrb[0].mxu1 %v8718_v22  ;;  %v6997_v42 = vcombine.low %v421_v30, %v425_v31  ;;  %v226_v30 = vld [vmem:[#allocation2 + $0x228] sm:$0xff]  ;;  %v6791_v31 = vcombine.low %v214_v18, %v218_v20 }
  0xea   :  { %v433_v37 = vld [vmem:[#allocation2 + $0x8a0] sm:$0xff]  ;;  %3494 = vmatpush1.bf16.msra.mxu1 %v6735_v33  ;;  %3525 = vmatprep.mubr.bf16.mxu1 %v8701_v9  ;;  %v6799_v40 = vcombine.low %v222_v27, %v226_v30 }
  0xeb   :  { %3403 = vmatmul.mubr.bf16.vlgmr.msra.gmra.mrb[0].mxu0 %v8724_v34  ;;  %3495 = vmatprep.subr.bf16.mxu1 %v6744_v35  ;;  %v437_v45 = vld [vmem:[#allocation2 + $0x8c0] sm:$0xff]  ;;  %v7006_v48 = vcombine.high %v429_v36, %v433_v37  ;;  %v7005_v50 = vcombine.low %v429_v36, %v433_v37  ;;  %v230_v37 = vld [vmem:[#allocation2 + $0x248] sm:$0xff] }
  0xec   :  { %3412 = vmatpush1.bf16.msra.mxu0 %v6989_v63  ;;  %v441_v46 = vld [vmem:[#allocation2 + $0x8e0] sm:$0xff]  ;;  %3443 = vmatprep.mubr.bf16.mxu0 %v8727_v28  ;;  %v6800_v63 = vcombine.high %v222_v27, %v226_v30 }
  0xed   :  { %3413 = vmatprep.subr.bf16.mxu0 %v6998_v39  ;;  %v445_v52 = vld [vmem:[#allocation2 + $0x900] sm:$0xff]  ;;  %v7014_v56 = vcombine.high %v437_v45, %v441_v46  ;;  %v7013_v59 = vcombine.low %v437_v45, %v441_v46  ;;  %v234_v39 = vld [vmem:[#allocation2 + $0x268] sm:$0xff] }
  0xee   :  { %3496 = vmatpush1.bf16.msra.mxu1 %v6743_v41  ;;  %v449_v54 = vld [vmem:[#allocation2 + $0x920] sm:$0xff]  ;;  %v238_v46 = vld [vmem:[#allocation2 + $0x288] sm:$0xff]  ;;  %v6807_v49 = vcombine.low %v230_v37, %v234_v39 }
  0xef   :  { %3497 = vmatprep.subr.bf16.mxu1 %v6752_v44  ;;  %v453_v61 = vld [vmem:[#allocation2 + $0x940] sm:$0xff]  ;;  %v7022_v1 = vcombine.high %v445_v52, %v449_v54  ;;  %v7021_v4 = vcombine.low %v445_v52, %v449_v54  ;;  %v246_v54 = vld [vmem:[#allocation2 + $0x2c8] sm:$0xff] }
  0xf0   :  { %3414 = vmatpush1.bf16.msra.mxu0 %v6997_v42  ;;  %v457_v62 = vld [vmem:[#allocation2 + $0x960] sm:$0xff]  ;;  %v6808_v42 = vcombine.high %v230_v37, %v234_v39 }
  0xf1   :  { %3415 = vmatprep.subr.bf16.mxu0 %v7006_v48  ;;  %v461_v6 = vld [vmem:[#allocation2 + $0x980] sm:$0xff]  ;;  %v7030_v10 = vcombine.high %v453_v61, %v457_v62  ;;  %v7029_v14 = vcombine.low %v453_v61, %v457_v62  ;;  %v242_v48 = vld [vmem:[#allocation2 + $0x2a8] sm:$0xff] }
  0xf2   :  { %3498 = vmatpush1.bf16.msra.mxu1 %v6751_v53  ;;  %v465_v7 = vld [vmem:[#allocation2 + $0x9a0] sm:$0xff]  ;;  %v6815_v57 = vcombine.low %v238_v46, %v242_v48  ;;  %v254_v62 = vld [vmem:[#allocation2 + $0x308] sm:$0xff] }
  0xf3   :  { %3499 = vmatprep.subr.bf16.mxu1 %v6760_v51  ;;  %v469_v16 = vld [vmem:[#allocation2 + $0x9c0] sm:$0xff]  ;;  %v7038_v19 = vcombine.high %v461_v6, %v465_v7  ;;  %v7037_v23 = vcombine.low %v461_v6, %v465_v7  ;;  %v262_v7 = vld [vmem:[#allocation2 + $0x348] sm:$0xff] }
  0xf4   :  { %3416 = vmatpush1.bf16.msra.mxu0 %v7005_v50  ;;  %v473_v17 = vld [vmem:[#allocation2 + $0x9e0] sm:$0xff]  ;;  %v6816_v50 = vcombine.high %v238_v46, %v242_v48 }
  0xf5   :  { %3417 = vmatprep.subr.bf16.mxu0 %v7014_v56  ;;  %v477_v25 = vld [vmem:[#allocation2 + $0xa00] sm:$0xff]  ;;  %v7046_v29 = vcombine.high %v469_v16, %v473_v17  ;;  %v7045_v33 = vcombine.low %v469_v16, %v473_v17  ;;  %v250_v56 = vld [vmem:[#allocation2 + $0x2e8] sm:$0xff] }
  0xf6   :  { %3500 = vmatpush1.bf16.msra.mxu1 %v6759_v58  ;;  %v481_v26 = vld [vmem:[#allocation2 + $0xa20] sm:$0xff]  ;;  %v6823_v2 = vcombine.low %v246_v54, %v250_v56  ;;  %v270_v17 = vld [vmem:[#allocation2 + $0x388] sm:$0xff] }
  0xf7   :  { %3501 = vmatprep.subr.bf16.mxu1 %v6768_v60  ;;  %v485_v35 = vld [vmem:[#allocation2 + $0xa40] sm:$0xff]  ;;  %v7054_v38 = vcombine.high %v477_v25, %v481_v26  ;;  %v7053_v41 = vcombine.low %v477_v25, %v481_v26  ;;  %v278_v26 = vld [vmem:[#allocation2 + $0x3c8] sm:$0xff] }
  0xf8   :  { %3418 = vmatpush1.bf16.msra.mxu0 %v7013_v59  ;;  %v489_v36 = vld [vmem:[#allocation2 + $0xa60] sm:$0xff]  ;;  %v6824_v59 = vcombine.high %v246_v54, %v250_v56  ;;  %v8735_v56 = vcombine.high %v8727_v28, %v8727_v28 }
  0xf9   :  { %3419 = vmatprep.subr.bf16.mxu0 %v7022_v1  ;;  %v493_v44 = vld [vmem:[#allocation2 + $0xa80] sm:$0xff]  ;;  %v7062_v47 = vcombine.high %v485_v35, %v489_v36  ;;  %v7061_v53 = vcombine.low %v485_v35, %v489_v36  ;;  %v258_v1 = vld [vmem:[#allocation2 + $0x328] sm:$0xff] }
  0xfa   :  { %3502 = vmatpush1.bf16.msra.mxu1 %v6767_v3  ;;  %v497_v45 = vld [vmem:[#allocation2 + $0xaa0] sm:$0xff]  ;;  %v6831_v11 = vcombine.low %v254_v62, %v258_v1  ;;  %v286_v36 = vld [vmem:[#allocation2 + $0x408] sm:$0xff] }
  0xfb   :  { %3503 = vmatprep.subr.bf16.mxu1 %v6776_v5  ;;  %v501_v51 = vld [vmem:[#allocation2 + $0xac0] sm:$0xff]  ;;  %v7070_v55 = vcombine.high %v493_v44, %v497_v45  ;;  %v7069_v58 = vcombine.low %v493_v44, %v497_v45  ;;  %v294_v45 = vld [vmem:[#allocation2 + $0x448] sm:$0xff] }
  0xfc   :  { %3420 = vmatpush1.bf16.msra.mxu0 %v7021_v4  ;;  %v505_v52 = vld [vmem:[#allocation2 + $0xae0] sm:$0xff]  ;;  %v6832_v4 = vcombine.high %v254_v62, %v258_v1  ;;  %v310_v62 = vld [vmem:[#allocation2 + $0x4c8] sm:$0xff] }
  0xfd   :  { %3421 = vmatprep.subr.bf16.mxu0 %v7030_v10  ;;  %v509_v60 = vld [vmem:[#allocation2 + $0xb00] sm:$0xff]  ;;  %v7078_v0 = vcombine.high %v501_v51, %v505_v52  ;;  %v7077_v3 = vcombine.low %v501_v51, %v505_v52  ;;  %v266_v10 = vld [vmem:[#allocation2 + $0x368] sm:$0xff] }
  0xfe   :  { %3504 = vmatpush1.bf16.msra.mxu1 %v6775_v12  ;;  %v513_v61 = vld [vmem:[#allocation2 + $0xb20] sm:$0xff]  ;;  %v6839_v20 = vcombine.low %v262_v7, %v266_v10  ;;  %v302_v52 = vld [vmem:[#allocation2 + $0x488] sm:$0xff] }
  0xff   :  { %3505 = vmatprep.subr.bf16.mxu1 %v6784_v15  ;;  %v517_v5 = vld [vmem:[#allocation2 + $0xb40] sm:$0xff]  ;;  %v7086_v8 = vcombine.high %v509_v60, %v513_v61  ;;  %v7085_v12 = vcombine.low %v509_v60, %v513_v61  ;;  %v314_v1 = vld [vmem:[#allocation2 + $0x4e8] sm:$0xff] }
 0x100   :  { %3422 = vmatpush1.bf16.msra.mxu0 %v7029_v14  ;;  %v521_v6 = vld [vmem:[#allocation2 + $0xb60] sm:$0xff]  ;;  %v6840_v14 = vcombine.high %v262_v7, %v266_v10  ;;  %v318_v7 = vld [vmem:[#allocation2 + $0x508] sm:$0xff] }
 0x101   :  { %3423 = vmatprep.subr.bf16.mxu0 %v7038_v19  ;;  %v525_v15 = vld [vmem:[#allocation2 + $0xb80] sm:$0xff]  ;;  %v7094_v18 = vcombine.high %v517_v5, %v521_v6  ;;  %v274_v19 = vld [vmem:[#allocation2 + $0x3a8] sm:$0xff] }
 0x102   :  { %3506 = vmatpush1.bf16.msra.mxu1 %v6783_v21  ;;  %v529_v16 = vld [vmem:[#allocation2 + $0xba0] sm:$0xff]  ;;  %v7093_v21 = vcombine.low %v517_v5, %v521_v6  ;;  %v6847_v30 = vcombine.low %v270_v17, %v274_v19  ;;  %v322_v10 = vld [vmem:[#allocation2 + $0x528] sm:$0xff] }
 0x103   :  { %3507 = vmatprep.subr.bf16.mxu1 %v6792_v24  ;;  %v533_v24 = vld [vmem:[#allocation2 + $0xbc0] sm:$0xff]  ;;  %v7102_v27 = vcombine.high %v525_v15, %v529_v16 }
 0x104   :  { %3424 = vmatpush1.bf16.msra.mxu0 %v7037_v23  ;;  %v6848_v23 = vcombine.high %v270_v17, %v274_v19  ;;  %v537_v25 = vld [vmem:[#allocation2 + $0xbe0] sm:$0xff]  ;;  %v326_v17 = vld [vmem:[#allocation2 + $0x548] sm:$0xff] }
 0x105   :  { %3425 = vmatprep.subr.bf16.mxu0 %v7046_v29  ;;  %v282_v29 = vld [vmem:[#allocation2 + $0x3e8] sm:$0xff]  ;;  %v545_v35 = vld [vmem:[#allocation2 + $0xc20] sm:$0xff]  ;;  %v7110_v37 = vcombine.high %v533_v24, %v537_v25 }
 0x106   :  { %3508 = vmatpush1.bf16.msra.mxu1 %v6791_v31  ;;  %v7101_v31 = vcombine.low %v525_v15, %v529_v16  ;;  %v6855_v39 = vcombine.low %v278_v26, %v282_v29  ;;  %v553_v44 = vld [vmem:[#allocation2 + $0xc60] sm:$0xff]  ;;  %v330_v19 = vld [vmem:[#allocation2 + $0x568] sm:$0xff] }
 0x107   :  { %3509 = vmatprep.subr.bf16.mxu1 %v6800_v63  ;;  %v541_v63 = vld [vmem:[#allocation2 + $0xc00] sm:$0xff] }
 0x108   :  { %3426 = vmatpush1.bf16.msra.mxu0 %v7045_v33  ;;  %v6856_v33 = vcombine.high %v278_v26, %v282_v29  ;;  %v7118_v46 = vcombine.high %v541_v63, %v545_v35  ;;  %v561_v51 = vld [vmem:[#allocation2 + $0xca0] sm:$0xff]  ;;  %v334_v26 = vld [vmem:[#allocation2 + $0x588] sm:$0xff] }
 0x109   :  { %3427 = vmatprep.subr.bf16.mxu0 %v7054_v38  ;;  %v290_v38 = vld [vmem:[#allocation2 + $0x428] sm:$0xff]  ;;  %v565_v60 = vld [vmem:[#allocation2 + $0xcc0] sm:$0xff] }
 0x10a   :  { %3510 = vmatpush1.bf16.msra.mxu1 %v6799_v40  ;;  %v7109_v40 = vcombine.low %v533_v24, %v537_v25  ;;  %v6863_v48 = vcombine.low %v286_v36, %v290_v38  ;;  %v569_v61 = vld [vmem:[#allocation2 + $0xce0] sm:$0xff]  ;;  %v338_v29 = vld [vmem:[#allocation2 + $0x5a8] sm:$0xff] }
 0x10b   :  { %3511 = vmatprep.subr.bf16.mxu1 %v6808_v42  ;;  %v549_v42 = vld [vmem:[#allocation2 + $0xc40] sm:$0xff] }
 0x10c   :  { %3428 = vmatpush1.bf16.msra.mxu0 %v7053_v41  ;;  %v6864_v41 = vcombine.high %v286_v36, %v290_v38  ;;  %v7126_v54 = vcombine.high %v549_v42, %v553_v44  ;;  %v573_v5 = vld [vmem:[#allocation2 + $0xd00] sm:$0xff]  ;;  %v346_v38 = vld [vmem:[#allocation2 + $0x5e8] sm:$0xff] }
 0x10d   :  { %3429 = vmatprep.subr.bf16.mxu0 %v7062_v47  ;;  %v298_v47 = vld [vmem:[#allocation2 + $0x468] sm:$0xff]  ;;  %v577_v6 = vld [vmem:[#allocation2 + $0xd20] sm:$0xff] }
 0x10e   :  { %3512 = vmatpush1.bf16.msra.mxu1 %v6807_v49  ;;  %v7117_v49 = vcombine.low %v541_v63, %v545_v35  ;;  %v581_v15 = vld [vmem:[#allocation2 + $0xd40] sm:$0xff] }
 0x10f   :  { %3513 = vmatprep.subr.bf16.mxu1 %v6816_v50  ;;  %v557_v50 = vld [vmem:[#allocation2 + $0xc80] sm:$0xff] }
 0x110   :  { %3430 = vmatpush1.bf16.msra.mxu0 %v7061_v53  ;;  %v6872_v53 = vcombine.high %v294_v45, %v298_v47  ;;  %v585_v16 = vld [vmem:[#allocation2 + $0xd60] sm:$0xff] }
 0x111   :  { %3431 = vmatprep.subr.bf16.mxu0 %v7070_v55  ;;  %v306_v55 = vld [vmem:[#allocation2 + $0x4a8] sm:$0xff]  ;;  %v589_v24 = vld [vmem:[#allocation2 + $0xd80] sm:$0xff] }
 0x112   :  { %3514 = vmatpush1.bf16.msra.mxu1 %v6815_v57  ;;  %v6871_v57 = vcombine.low %v294_v45, %v298_v47  ;;  %v593_v25 = vld [vmem:[#allocation2 + $0xda0] sm:$0xff]  ;;  %v350_v45 = vld [vmem:[#allocation2 + $0x608] sm:$0xff] }
 0x113   :  { %3515 = vmatprep.subr.bf16.mxu1 %v6824_v59  ;;  %v6880_v59 = vcombine.high %v302_v52, %v306_v55  ;;  %v597_v63 = vld [vmem:[#allocation2 + $0xdc0] sm:$0xff]  ;;  %v7166_v36 = vcombine.high %v589_v24, %v593_v25  ;;  %v354_v47 = vld [vmem:[#allocation2 + $0x628] sm:$0xff] }
 0x114   :  { %3432 = vmatpush1.bf16.msra.mxu0 %v7069_v58  ;;  %v7125_v58 = vcombine.low %v549_v42, %v553_v44  ;;  %v601_v35 = vld [vmem:[#allocation2 + $0xde0] sm:$0xff] }
 0x115   :  { %3433 = vmatprep.subr.bf16.mxu0 %v7078_v0  ;;  %v7134_v0 = vcombine.high %v557_v50, %v561_v51  ;;  %v605_v42 = vld [vmem:[#allocation2 + $0xe00] sm:$0xff] }
 0x116   :  { %3516 = vmatpush1.bf16.msra.mxu1 %v6823_v2  ;;  %v6879_v2 = vcombine.low %v302_v52, %v306_v55  ;;  %v609_v44 = vld [vmem:[#allocation2 + $0xe20] sm:$0xff]  ;;  %v358_v52 = vld [vmem:[#allocation2 + $0x648] sm:$0xff] }
 0x117   :  { %3517 = vmatprep.subr.bf16.mxu1 %v6832_v4  ;;  %v6888_v4 = vcombine.high %v310_v62, %v314_v1  ;;  %v362_v55 = vld [vmem:[#allocation2 + $0x668] sm:$0xff] }
 0x118   :  { %3434 = vmatpush1.bf16.msra.mxu0 %v7077_v3  ;;  %v7133_v3 = vcombine.low %v557_v50, %v561_v51  ;;  %v613_v50 = vld [vmem:[#allocation2 + $0xe40] sm:$0xff] }
 0x119   :  { %3435 = vmatprep.subr.bf16.mxu0 %v7086_v8  ;;  %v7142_v8 = vcombine.high %v565_v60, %v569_v61  ;;  %v617_v51 = vld [vmem:[#allocation2 + $0xe60] sm:$0xff] }
 0x11a   :  { %3518 = vmatpush1.bf16.msra.mxu1 %v6831_v11  ;;  %v6887_v11 = vcombine.low %v310_v62, %v314_v1  ;;  %v366_v62 = vld [vmem:[#allocation2 + $0x688] sm:$0xff] }
 0x11b   :  { %3519 = vmatprep.subr.bf16.mxu1 %v6840_v14  ;;  %v6896_v14 = vcombine.high %v318_v7, %v322_v10  ;;  %v370_v1 = vld [vmem:[#allocation2 + $0x6a8] sm:$0xff] }
 0x11c   :  { %3436 = vmatpush1.bf16.msra.mxu0 %v7085_v12  ;;  %v7141_v12 = vcombine.low %v565_v60, %v569_v61  ;;  %v621_v60 = vld [vmem:[#allocation2 + $0xe80] sm:$0xff] }
 0x11d   :  { %3437 = vmatprep.subr.bf16.mxu0 %v7094_v18  ;;  %v7150_v18 = vcombine.high %v573_v5, %v577_v6  ;;  %v625_v61 = vld [vmem:[#allocation2 + $0xea0] sm:$0xff] }
 0x11e   :  { %3520 = vmatpush1.bf16.msra.mxu1 %v6839_v20  ;;  %v6895_v20 = vcombine.low %v318_v7, %v322_v10  ;;  %v374_v7 = vld [vmem:[#allocation2 + $0x6c8] sm:$0xff] }
 0x11f   :  { %3521 = vmatprep.subr.bf16.mxu1 %v6848_v23  ;;  %v6904_v23 = vcombine.high %v326_v17, %v330_v19  ;;  %v378_v10 = vld [vmem:[#allocation2 + $0x6e8] sm:$0xff] }
 0x120   :  { %3438 = vmatpush1.bf16.msra.mxu0 %v7093_v21  ;;  %v7149_v21 = vcombine.low %v573_v5, %v577_v6  ;;  %v629_v5 = vld [vmem:[#allocation2 + $0xec0] sm:$0xff] }
 0x121   :  { %3439 = vmatprep.subr.bf16.mxu0 %v7102_v27  ;;  %v7158_v27 = vcombine.high %v581_v15, %v585_v16  ;;  %v633_v6 = vld [vmem:[#allocation2 + $0xee0] sm:$0xff] }
 0x122   :  { %3522 = vmatpush1.bf16.msra.mxu1 %v6847_v30  ;;  %v6903_v30 = vcombine.low %v326_v17, %v330_v19  ;;  %v382_v17 = vld [vmem:[#allocation2 + $0x708] sm:$0xff] }
 0x123   :  { %3523 = vmatprep.subr.bf16.mxu1 %v6856_v33  ;;  %v6912_v33 = vcombine.high %v334_v26, %v338_v29  ;;  %v386_v19 = vld [vmem:[#allocation2 + $0x728] sm:$0xff] }
 0x124   :  { %3440 = vmatpush1.bf16.msra.mxu0 %v7101_v31  ;;  %v7157_v31 = vcombine.low %v581_v15, %v585_v16  ;;  %v637_v15 = vld [vmem:[#allocation2 + $0xf00] sm:$0xff] }
 0x125   :  { %3441 = vmatprep.subr.bf16.mxu0 %v7110_v37  ;;  %v342_v37 = vld [vmem:[#allocation2 + $0x5c8] sm:$0xff]  ;;  %v641_v16 = vld [vmem:[#allocation2 + $0xf20] sm:$0xff] }
 0x126   :  { %3524 = vmatpush1.bf16.msra.mxu1 %v6855_v39  ;;  %v6911_v39 = vcombine.low %v334_v26, %v338_v29  ;;  %v390_v26 = vld [vmem:[#allocation2 + $0x748] sm:$0xff] }
 0x127   :  { %3534 = vmatprep.subr.bf16.mxu1 %v6864_v41  ;;  %v6920_v41 = vcombine.high %v342_v37, %v346_v38  ;;  %v394_v29 = vld [vmem:[#allocation2 + $0x768] sm:$0xff] }
 0x128   :  { %3442 = vmatpush1.bf16.msra.mxu0 %v7109_v40  ;;  %v7165_v40 = vcombine.low %v589_v24, %v593_v25  ;;  %v645_v24 = vld [vmem:[#allocation2 + $0xf40] sm:$0xff] }
 0x129   :  { %3452 = vmatprep.subr.bf16.mxu0 %v7118_v46  ;;  %3526 = vmatmul.mubr.bf16.vlgmr.msra.gmra.mrb[4].mxu1 %v8718_v22  ;;  %v7174_v46 = vcombine.high %v597_v63, %v601_v35  ;;  %v649_v25 = vld [vmem:[#allocation2 + $0xf60] sm:$0xff] }
 0x12a   :  { %3535 = vmatpush1.bf16.msra.mxu1 %v6863_v48  ;;  %3566 = vmatprep.mubr.bf16.mxu1 %v8706_v13  ;;  %v6919_v48 = vcombine.low %v342_v37, %v346_v38  ;;  %v7222_v37 = vcombine.high %v645_v24, %v649_v25  ;;  %v402_v38 = vld [vmem:[#allocation2 + $0x7a8] sm:$0xff] }
 0x12b   :  { %3444 = vmatmul.mubr.bf16.vlgmr.msra.gmra.mrb[0].mxu0 %v8714_v32  ;;  %3536 = vmatprep.subr.bf16.mxu1 %v6872_v53  ;;  %v6928_v53 = vcombine.high %v350_v45, %v354_v47 }
 0x12c   :  { %3453 = vmatpush1.bf16.msra.mxu0 %v7117_v49  ;;  %3484 = vmatprep.mubr.bf16.mxu0 %v8735_v56  ;;  %v7173_v49 = vcombine.low %v597_v63, %v601_v35  ;;  %v653_v63 = vld [vmem:[#allocation2 + $0xf80] sm:$0xff] }
 0x12d   :  { %3454 = vmatprep.subr.bf16.mxu0 %v7126_v54  ;;  %v7182_v54 = vcombine.high %v605_v42, %v609_v44  ;;  %v657_v35 = vld [vmem:[#allocation2 + $0xfa0] sm:$0xff] }
 0x12e   :  { %3537 = vmatpush1.bf16.msra.mxu1 %v6871_v57  ;;  %v6927_v57 = vcombine.low %v350_v45, %v354_v47  ;;  %v406_v45 = vld [vmem:[#allocation2 + $0x7c8] sm:$0xff] }
 0x12f   :  { %3538 = vmatprep.subr.bf16.mxu1 %v6880_v59  ;;  %v6936_v59 = vcombine.high %v358_v52, %v362_v55  ;;  %v410_v47 = vld [vmem:[#allocation2 + $0x7e8] sm:$0xff] }
 0x130   :  { %3455 = vmatpush1.bf16.msra.mxu0 %v7125_v58  ;;  %v7181_v58 = vcombine.low %v605_v42, %v609_v44  ;;  %v661_v42 = vld [vmem:[#allocation2 + $0xfc0] sm:$0xff] }
 0x131   :  { %3456 = vmatprep.subr.bf16.mxu0 %v7134_v0  ;;  %v7190_v0 = vcombine.high %v613_v50, %v617_v51  ;;  %v665_v44 = vld [vmem:[#allocation2 + $0xfe0] sm:$0xff] }
 0x132   :  { %3539 = vmatpush1.bf16.msra.mxu1 %v6879_v2  ;;  %v6935_v2 = vcombine.low %v358_v52, %v362_v55  ;;  %v159_v52 = vld [vmem:[#allocation2 + $0x10] sm:$0xff] }
 0x133   :  { %3540 = vmatprep.subr.bf16.mxu1 %v6888_v4  ;;  %v6944_v4 = vcombine.high %v366_v62, %v370_v1  ;;  %v163_v55 = vld [vmem:[#allocation2 + $0x30] sm:$0xff] }
 0x134   :  { %3457 = vmatpush1.bf16.msra.mxu0 %v7133_v3  ;;  %v7189_v3 = vcombine.low %v613_v50, %v617_v51  ;;  %v414_v50 = vld [vmem:[#allocation2 + $0x808] sm:$0xff] }
 0x135   :  { %3458 = vmatprep.subr.bf16.mxu0 %v7142_v8  ;;  %v7198_v8 = vcombine.high %v621_v60, %v625_v61  ;;  %v418_v51 = vld [vmem:[#allocation2 + $0x828] sm:$0xff] }
 0x136   :  { %3541 = vmatpush1.bf16.msra.mxu1 %v6887_v11  ;;  %v6943_v11 = vcombine.low %v366_v62, %v370_v1  ;;  %v167_v62 = vld [vmem:[#allocation2 + $0x50] sm:$0xff] }
 0x137   :  { %3542 = vmatprep.subr.bf16.mxu1 %v6896_v14  ;;  %v6952_v14 = vcombine.high %v374_v7, %v378_v10  ;;  %v171_v1 = vld [vmem:[#allocation2 + $0x70] sm:$0xff] }
 0x138   :  { %3459 = vmatpush1.bf16.msra.mxu0 %v7141_v12  ;;  %v7197_v12 = vcombine.low %v621_v60, %v625_v61  ;;  %v422_v60 = vld [vmem:[#allocation2 + $0x848] sm:$0xff] }
 0x139   :  { %3460 = vmatprep.subr.bf16.mxu0 %v7150_v18  ;;  %v7206_v18 = vcombine.high %v629_v5, %v633_v6  ;;  %v426_v61 = vld [vmem:[#allocation2 + $0x868] sm:$0xff] }
 0x13a   :  { %3543 = vmatpush1.bf16.msra.mxu1 %v6895_v20  ;;  %v6951_v20 = vcombine.low %v374_v7, %v378_v10  ;;  %v434_v7 = vld [vmem:[#allocation2 + $0x8a8] sm:$0xff]  ;;  %v6746_v10 = vcombine.high %v167_v62, %v171_v1 }
 0x13b   :  { %3544 = vmatprep.subr.bf16.mxu1 %v6904_v23  ;;  %v6960_v23 = vcombine.high %v382_v17, %v386_v19 }
 0x13c   :  { %3461 = vmatpush1.bf16.msra.mxu0 %v7149_v21  ;;  %v7205_v21 = vcombine.low %v629_v5, %v633_v6  ;;  %v7000_v5 = vcombine.high %v422_v60, %v426_v61  ;;  %v430_v6 = vld [vmem:[#allocation2 + $0x888] sm:$0xff] }
 0x13d   :  { %3462 = vmatprep.subr.bf16.mxu0 %v7158_v27  ;;  %v7214_v27 = vcombine.high %v637_v15, %v641_v16 }
 0x13e   :  { %3545 = vmatpush1.bf16.msra.mxu1 %v6903_v30  ;;  %v6959_v30 = vcombine.low %v382_v17, %v386_v19  ;;  %v442_v17 = vld [vmem:[#allocation2 + $0x8e8] sm:$0xff] }
 0x13f   :  { %3546 = vmatprep.subr.bf16.mxu1 %v6912_v33  ;;  %v6968_v33 = vcombine.high %v390_v26, %v394_v29 }
 0x140   :  { %3463 = vmatpush1.bf16.msra.mxu0 %v7157_v31  ;;  %v7213_v31 = vcombine.low %v637_v15, %v641_v16  ;;  %v7008_v15 = vcombine.high %v430_v6, %v434_v7  ;;  %v438_v16 = vld [vmem:[#allocation2 + $0x8c8] sm:$0xff] }
 0x141   :  { %3464 = vmatprep.subr.bf16.mxu0 %v7166_v36  ;;  %v398_v36 = vld [vmem:[#allocation2 + $0x788] sm:$0xff] }
 0x142   :  { %3547 = vmatpush1.bf16.msra.mxu1 %v6911_v39  ;;  %v6967_v39 = vcombine.low %v390_v26, %v394_v29  ;;  %v450_v26 = vld [vmem:[#allocation2 + $0x928] sm:$0xff] }
 0x143   :  { %3548 = vmatprep.subr.bf16.mxu1 %v6920_v41  ;;  %v6976_v41 = vcombine.high %v398_v36, %v402_v38 }
 0x144   :  { %3465 = vmatpush1.bf16.msra.mxu0 %v7165_v40  ;;  %v7221_v40 = vcombine.low %v645_v24, %v649_v25  ;;  %v7016_v24 = vcombine.high %v438_v16, %v442_v17  ;;  %v446_v25 = vld [vmem:[#allocation2 + $0x908] sm:$0xff] }
 0x145   :  { %3466 = vmatprep.subr.bf16.mxu0 %v7174_v46  ;;  %v7230_v46 = vcombine.high %v653_v63, %v657_v35 }
 0x146   :  { %3549 = vmatpush1.bf16.msra.mxu1 %v6919_v48  ;;  %v6975_v48 = vcombine.low %v398_v36, %v402_v38  ;;  %v458_v36 = vld [vmem:[#allocation2 + $0x968] sm:$0xff] }
 0x147   :  { %3550 = vmatprep.subr.bf16.mxu1 %v6928_v53  ;;  %v6984_v53 = vcombine.high %v406_v45, %v410_v47 }
 0x148   :  { %3467 = vmatpush1.bf16.msra.mxu0 %v7173_v49  ;;  %v7229_v49 = vcombine.low %v653_v63, %v657_v35  ;;  %v7024_v63 = vcombine.high %v446_v25, %v450_v26  ;;  %v454_v35 = vld [vmem:[#allocation2 + $0x948] sm:$0xff] }
 0x149   :  { %3468 = vmatprep.subr.bf16.mxu0 %v7182_v54  ;;  %v7238_v54 = vcombine.high %v661_v42, %v665_v44 }
 0x14a   :  { %3551 = vmatpush1.bf16.msra.mxu1 %v6927_v57  ;;  %v6983_v57 = vcombine.low %v406_v45, %v410_v47  ;;  %v466_v45 = vld [vmem:[#allocation2 + $0x9a8] sm:$0xff] }
 0x14b   :  { %3552 = vmatprep.subr.bf16.mxu1 %v6936_v59  ;;  %v6992_v59 = vcombine.high %v414_v50, %v418_v51 }
 0x14c   :  { %3469 = vmatpush1.bf16.msra.mxu0 %v7181_v58  ;;  %v7237_v58 = vcombine.low %v661_v42, %v665_v44  ;;  %v7032_v42 = vcombine.high %v454_v35, %v458_v36  ;;  %v462_v44 = vld [vmem:[#allocation2 + $0x988] sm:$0xff] }
 0x14d   :  { %3470 = vmatprep.subr.bf16.mxu0 %v7190_v0  ;;  %v6738_v0 = vcombine.high %v159_v52, %v163_v55 }
 0x14e   :  { %3553 = vmatpush1.bf16.msra.mxu1 %v6935_v2  ;;  %v8743_v2 = vcombine.high %v8714_v32, %v8714_v32 }
 0x14f   :  { %3554 = vmatprep.subr.bf16.mxu1 %v6944_v4  ;;  %v6737_v4 = vcombine.low %v159_v52, %v163_v55  ;;  %v474_v52 = vld [vmem:[#allocation2 + $0x9e8] sm:$0xff] }
 0x150   :  { %3471 = vmatpush1.bf16.msra.mxu0 %v7189_v3  ;;  %v6991_v3 = vcombine.low %v414_v50, %v418_v51  ;;  %v7040_v50 = vcombine.high %v462_v44, %v466_v45  ;;  %v470_v51 = vld [vmem:[#allocation2 + $0x9c8] sm:$0xff] }
 0x151   :  { %3472 = vmatprep.subr.bf16.mxu0 %v7198_v8  ;;  %v175_v8 = vld [vmem:[#allocation2 + $0x90] sm:$0xff] }
 0x152   :  { %3555 = vmatpush1.bf16.msra.mxu1 %v6943_v11  ;;  %v179_v11 = vld [vmem:[#allocation2 + $0xb0] sm:$0xff] }
 0x153   :  { %3556 = vmatprep.subr.bf16.mxu1 %v6952_v14  ;;  %v6745_v14 = vcombine.low %v167_v62, %v171_v1  ;;  %v6754_v19 = vcombine.high %v175_v8, %v179_v11  ;;  %v482_v62 = vld [vmem:[#allocation2 + $0xa28] sm:$0xff] }
 0x154   :  { %3473 = vmatpush1.bf16.msra.mxu0 %v7197_v12  ;;  %v6999_v12 = vcombine.low %v422_v60, %v426_v61  ;;  %v7048_v60 = vcombine.high %v470_v51, %v474_v52  ;;  %v478_v61 = vld [vmem:[#allocation2 + $0xa08] sm:$0xff] }
 0x155   :  { %3474 = vmatprep.subr.bf16.mxu0 %v7206_v18  ;;  %v183_v18 = vld [vmem:[#allocation2 + $0xd0] sm:$0xff] }
 0x156   :  { %3557 = vmatpush1.bf16.msra.mxu1 %v6951_v20  ;;  %v187_v20 = vld [vmem:[#allocation2 + $0xf0] sm:$0xff] }
 0x157   :  { %3558 = vmatprep.subr.bf16.mxu1 %v6960_v23  ;;  %v6753_v23 = vcombine.low %v175_v8, %v179_v11  ;;  %v6762_v29 = vcombine.high %v183_v18, %v187_v20  ;;  %v490_v8 = vld [vmem:[#allocation2 + $0xa68] sm:$0xff] }
 0x158   :  { %3475 = vmatpush1.bf16.msra.mxu0 %v7205_v21  ;;  %v7007_v21 = vcombine.low %v430_v6, %v434_v7  ;;  %v7056_v6 = vcombine.high %v478_v61, %v482_v62  ;;  %v486_v7 = vld [vmem:[#allocation2 + $0xa48] sm:$0xff] }
 0x159   :  { %3476 = vmatprep.subr.bf16.mxu0 %v7214_v27  ;;  %v191_v27 = vld [vmem:[#allocation2 + $0x110] sm:$0xff] }
 0x15a   :  { %3559 = vmatpush1.bf16.msra.mxu1 %v6959_v30  ;;  %v195_v30 = vld [vmem:[#allocation2 + $0x130] sm:$0xff] }
 0x15b   :  { %3560 = vmatprep.subr.bf16.mxu1 %v6968_v33  ;;  %v6761_v33 = vcombine.low %v183_v18, %v187_v20  ;;  %v6770_v38 = vcombine.high %v191_v27, %v195_v30  ;;  %v498_v18 = vld [vmem:[#allocation2 + $0xaa8] sm:$0xff] }
 0x15c   :  { %3477 = vmatpush1.bf16.msra.mxu0 %v7213_v31  ;;  %v7015_v31 = vcombine.low %v438_v16, %v442_v17  ;;  %v7064_v16 = vcombine.high %v486_v7, %v490_v8  ;;  %v494_v17 = vld [vmem:[#allocation2 + $0xa88] sm:$0xff] }
 0x15d   :  { %3478 = vmatprep.subr.bf16.mxu0 %v7222_v37  ;;  %v199_v37 = vld [vmem:[#allocation2 + $0x150] sm:$0xff] }
 0x15e   :  { %3561 = vmatpush1.bf16.msra.mxu1 %v6967_v39  ;;  %v203_v39 = vld [vmem:[#allocation2 + $0x170] sm:$0xff] }
 0x15f   :  { %3562 = vmatprep.subr.bf16.mxu1 %v6976_v41  ;;  %v6769_v41 = vcombine.low %v191_v27, %v195_v30  ;;  %v6778_v47 = vcombine.high %v199_v37, %v203_v39  ;;  %v506_v27 = vld [vmem:[#allocation2 + $0xae8] sm:$0xff] }
 0x160   :  { %3479 = vmatpush1.bf16.msra.mxu0 %v7221_v40  ;;  %v7023_v40 = vcombine.low %v446_v25, %v450_v26  ;;  %v7072_v25 = vcombine.high %v494_v17, %v498_v18  ;;  %v502_v26 = vld [vmem:[#allocation2 + $0xac8] sm:$0xff] }
 0x161   :  { %3480 = vmatprep.subr.bf16.mxu0 %v7230_v46  ;;  %v207_v46 = vld [vmem:[#allocation2 + $0x190] sm:$0xff] }
 0x162   :  { %3563 = vmatpush1.bf16.msra.mxu1 %v6975_v48  ;;  %v211_v48 = vld [vmem:[#allocation2 + $0x1b0] sm:$0xff] }
 0x163   :  { %3564 = vmatprep.subr.bf16.mxu1 %v6984_v53  ;;  %v6777_v53 = vcombine.low %v199_v37, %v203_v39  ;;  %v6786_v55 = vcombine.high %v207_v46, %v211_v48  ;;  %v514_v37 = vld [vmem:[#allocation2 + $0xb28] sm:$0xff] }
 0x164   :  { %3481 = vmatpush1.bf16.msra.mxu0 %v7229_v49  ;;  %v7031_v49 = vcombine.low %v454_v35, %v458_v36  ;;  %v7080_v35 = vcombine.high %v502_v26, %v506_v27  ;;  %v510_v36 = vld [vmem:[#allocation2 + $0xb08] sm:$0xff] }
 0x165   :  { %3482 = vmatprep.subr.bf16.mxu0 %v7238_v54  ;;  %v215_v54 = vld [vmem:[#allocation2 + $0x1d0] sm:$0xff] }
 0x166   :  { %3565 = vmatpush1.bf16.msra.mxu1 %v6983_v57  ;;  %v219_v57 = vld [vmem:[#allocation2 + $0x1f0] sm:$0xff] }
 0x167   :  { %3575 = vmatprep.subr.bf16.mxu1 %v6992_v59  ;;  %v6785_v59 = vcombine.low %v207_v46, %v211_v48  ;;  %v6794_v1 = vcombine.high %v215_v54, %v219_v57  ;;  %v522_v46 = vld [vmem:[#allocation2 + $0xb68] sm:$0xff] }
 0x168   :  { %3483 = vmatpush1.bf16.msra.mxu0 %v7237_v58  ;;  %v7039_v58 = vcombine.low %v462_v44, %v466_v45  ;;  %v7088_v44 = vcombine.high %v510_v36, %v514_v37  ;;  %v518_v45 = vld [vmem:[#allocation2 + $0xb48] sm:$0xff] }
 0x169   :  { %3657 = vmatprep.subr.bf16.mxu0 %v6738_v0  ;;  %3567 = vmatmul.mubr.bf16.vlgmr.msra.gmra.mrb[4].mxu1 %v8724_v34  ;;  %v223_v0 = vld [vmem:[#allocation2 + $0x210] sm:$0xff] }
 0x16a   :  { %3576 = vmatpush1.bf16.msra.mxu1 %v6991_v3  ;;  %3607 = vmatprep.mubr.bf16.mxu1 %v8727_v28  ;;  %v227_v3 = vld [vmem:[#allocation2 + $0x230] sm:$0xff] }
 0x16b   :  { %3485 = vmatmul.mubr.bf16.vlgmr.msra.gmra.mrb[0].mxu0 %v8743_v2  ;;  %3577 = vmatprep.subr.bf16.mxu1 %v7000_v5  ;;  %v6793_v5 = vcombine.low %v215_v54, %v219_v57  ;;  %v6802_v11 = vcombine.high %v223_v0, %v227_v3  ;;  %v530_v54 = vld [vmem:[#allocation2 + $0xba8] sm:$0xff] }
 0x16c   :  { %3658 = vmatpush1.bf16.msra.mxu0 %v6737_v4  ;;  %3689 = vmatprep.mubr.bf16.mxu0 %v8701_v9  ;;  %v7047_v4 = vcombine.low %v470_v51, %v474_v52  ;;  %v7096_v51 = vcombine.high %v518_v45, %v522_v46  ;;  %v526_v52 = vld [vmem:[#allocation2 + $0xb88] sm:$0xff] }
 0x16d   :  { %3659 = vmatprep.subr.bf16.mxu0 %v6746_v10  ;;  %v231_v10 = vld [vmem:[#allocation2 + $0x250] sm:$0xff] }
 0x16e   :  { %3578 = vmatpush1.bf16.msra.mxu1 %v6999_v12  ;;  %v235_v12 = vld [vmem:[#allocation2 + $0x270] sm:$0xff] }
 0x16f   :  { %3579 = vmatprep.subr.bf16.mxu1 %v7008_v15  ;;  %v6801_v15 = vcombine.low %v223_v0, %v227_v3  ;;  %v6810_v20 = vcombine.high %v231_v10, %v235_v12  ;;  %v279_v3 = vld [vmem:[#allocation2 + $0x3d0] sm:$0xff] }
 0x170   :  { %3660 = vmatpush1.bf16.msra.mxu0 %v6745_v14  ;;  %v7055_v14 = vcombine.low %v478_v61, %v482_v62  ;;  %v7104_v61 = vcombine.high %v526_v52, %v530_v54  ;;  %v534_v62 = vld [vmem:[#allocation2 + $0xbc8] sm:$0xff] }
 0x171   :  { %3661 = vmatprep.subr.bf16.mxu0 %v6754_v19  ;;  %v239_v19 = vld [vmem:[#allocation2 + $0x290] sm:$0xff] }
 0x172   :  { %3580 = vmatpush1.bf16.msra.mxu1 %v7007_v21  ;;  %v243_v21 = vld [vmem:[#allocation2 + $0x2b0] sm:$0xff] }
 0x173   :  { %3581 = vmatprep.subr.bf16.mxu1 %v7016_v24  ;;  %v6809_v24 = vcombine.low %v231_v10, %v235_v12  ;;  %v6818_v30 = vcombine.high %v239_v19, %v243_v21  ;;  %v542_v10 = vld [vmem:[#allocation2 + $0xc08] sm:$0xff]  ;;  %v287_v12 = vld [vmem:[#allocation2 + $0x410] sm:$0xff] }
 0x174   :  { %3662 = vmatpush1.bf16.msra.mxu0 %v6753_v23  ;;  %v7063_v23 = vcombine.low %v486_v7, %v490_v8 }
 0x175   :  { %3663 = vmatprep.subr.bf16.mxu0 %v6762_v29  ;;  %v247_v29 = vld [vmem:[#allocation2 + $0x2d0] sm:$0xff] }
 0x176   :  { %3582 = vmatpush1.bf16.msra.mxu1 %v7015_v31  ;;  %v251_v31 = vld [vmem:[#allocation2 + $0x2f0] sm:$0xff] }
 0x177   :  { %3583 = vmatprep.subr.bf16.mxu1 %v7024_v63  ;;  %v6817_v63 = vcombine.low %v239_v19, %v243_v21  ;;  %v6826_v39 = vcombine.high %v247_v29, %v251_v31  ;;  %v550_v19 = vld [vmem:[#allocation2 + $0xc48] sm:$0xff]  ;;  %v295_v21 = vld [vmem:[#allocation2 + $0x450] sm:$0xff] }
 0x178   :  { %3664 = vmatpush1.bf16.msra.mxu0 %v6761_v33  ;;  %v7071_v33 = vcombine.low %v494_v17, %v498_v18 }
 0x179   :  { %3665 = vmatprep.subr.bf16.mxu0 %v6770_v38  ;;  %v255_v38 = vld [vmem:[#allocation2 + $0x310] sm:$0xff] }
 0x17a   :  { %3584 = vmatpush1.bf16.msra.mxu1 %v7023_v40  ;;  %v259_v40 = vld [vmem:[#allocation2 + $0x330] sm:$0xff] }
 0x17b   :  { %3585 = vmatprep.subr.bf16.mxu1 %v7032_v42  ;;  %v6825_v42 = vcombine.low %v247_v29, %v251_v31  ;;  %v6834_v48 = vcombine.high %v255_v38, %v259_v40  ;;  %v558_v29 = vld [vmem:[#allocation2 + $0xc88] sm:$0xff]  ;;  %v303_v31 = vld [vmem:[#allocation2 + $0x490] sm:$0xff] }
 0x17c   :  { %3666 = vmatpush1.bf16.msra.mxu0 %v6769_v41  ;;  %v7079_v41 = vcombine.low %v502_v26, %v506_v27 }
 0x17d   :  { %3667 = vmatprep.subr.bf16.mxu0 %v6778_v47  ;;  %v263_v47 = vld [vmem:[#allocation2 + $0x350] sm:$0xff] }
 0x17e   :  { %3586 = vmatpush1.bf16.msra.mxu1 %v7031_v49  ;;  %v267_v49 = vld [vmem:[#allocation2 + $0x370] sm:$0xff] }
 0x17f   :  { %3587 = vmatprep.subr.bf16.mxu1 %v7040_v50  ;;  %v6833_v50 = vcombine.low %v255_v38, %v259_v40  ;;  %v6842_v57 = vcombine.high %v263_v47, %v267_v49  ;;  %v566_v38 = vld [vmem:[#allocation2 + $0xcc8] sm:$0xff]  ;;  %v311_v40 = vld [vmem:[#allocation2 + $0x4d0] sm:$0xff] }
 0x180   :  { %3668 = vmatpush1.bf16.msra.mxu0 %v6777_v53  ;;  %v7087_v53 = vcombine.low %v510_v36, %v514_v37 }
 0x181   :  { %3669 = vmatprep.subr.bf16.mxu0 %v6786_v55  ;;  %v271_v55 = vld [vmem:[#allocation2 + $0x390] sm:$0xff] }
 0x182   :  { %3588 = vmatpush1.bf16.msra.mxu1 %v7039_v58  ;;  %v275_v58 = vld [vmem:[#allocation2 + $0x3b0] sm:$0xff] }
 0x183   :  { %3589 = vmatprep.subr.bf16.mxu1 %v7048_v60  ;;  %v6841_v60 = vcombine.low %v263_v47, %v267_v49  ;;  %v6850_v0 = vcombine.high %v271_v55, %v275_v58  ;;  %v574_v47 = vld [vmem:[#allocation2 + $0xd08] sm:$0xff]  ;;  %v319_v49 = vld [vmem:[#allocation2 + $0x510] sm:$0xff] }
 0x184   :  { %3670 = vmatpush1.bf16.msra.mxu0 %v6785_v59  ;;  %v7095_v59 = vcombine.low %v518_v45, %v522_v46 }
 0x185   :  { %3671 = vmatprep.subr.bf16.mxu0 %v6794_v1  ;;  %v538_v1 = vld [vmem:[#allocation2 + $0xbe8] sm:$0xff] }
 0x186   :  { %3590 = vmatpush1.bf16.msra.mxu1 %v7047_v4  ;;  %v283_v4 = vld [vmem:[#allocation2 + $0x3f0] sm:$0xff]  ;;  %v7112_v7 = vcombine.high %v534_v62, %v538_v1 }
 0x187   :  { %3591 = vmatprep.subr.bf16.mxu1 %v7056_v6  ;;  %v6849_v6 = vcombine.low %v271_v55, %v275_v58  ;;  %v6858_v8 = vcombine.high %v279_v3, %v283_v4  ;;  %v582_v55 = vld [vmem:[#allocation2 + $0xd48] sm:$0xff]  ;;  %v327_v58 = vld [vmem:[#allocation2 + $0x550] sm:$0xff] }
 0x188   :  { %3672 = vmatpush1.bf16.msra.mxu0 %v6793_v5  ;;  %v7103_v5 = vcombine.low %v526_v52, %v530_v54 }
 0x189   :  { %3673 = vmatprep.subr.bf16.mxu0 %v6802_v11  ;;  %v546_v11 = vld [vmem:[#allocation2 + $0xc28] sm:$0xff] }
 0x18a   :  { %3592 = vmatpush1.bf16.msra.mxu1 %v7055_v14  ;;  %v291_v14 = vld [vmem:[#allocation2 + $0x430] sm:$0xff]  ;;  %v7120_v17 = vcombine.high %v542_v10, %v546_v11 }
 0x18b   :  { %3593 = vmatprep.subr.bf16.mxu1 %v7064_v16  ;;  %v6857_v16 = vcombine.low %v279_v3, %v283_v4  ;;  %v6866_v18 = vcombine.high %v287_v12, %v291_v14  ;;  %v594_v3 = vld [vmem:[#allocation2 + $0xda8] sm:$0xff]  ;;  %v335_v4 = vld [vmem:[#allocation2 + $0x590] sm:$0xff] }
 0x18c   :  { %3674 = vmatpush1.bf16.msra.mxu0 %v6801_v15  ;;  %v7111_v15 = vcombine.low %v534_v62, %v538_v1  ;;  %v590_v1 = vld [vmem:[#allocation2 + $0xd88] sm:$0xff] }
 0x18d   :  { %3675 = vmatprep.subr.bf16.mxu0 %v6810_v20  ;;  %v554_v20 = vld [vmem:[#allocation2 + $0xc68] sm:$0xff] }
 0x18e   :  { %3594 = vmatpush1.bf16.msra.mxu1 %v7063_v23  ;;  %v299_v23 = vld [vmem:[#allocation2 + $0x470] sm:$0xff]  ;;  %v7128_v26 = vcombine.high %v550_v19, %v554_v20 }
 0x18f   :  { %3595 = vmatprep.subr.bf16.mxu1 %v7072_v25  ;;  %v6865_v25 = vcombine.low %v287_v12, %v291_v14  ;;  %v6874_v27 = vcombine.high %v295_v21, %v299_v23  ;;  %v598_v12 = vld [vmem:[#allocation2 + $0xdc8] sm:$0xff] }
 0x190   :  { %3676 = vmatpush1.bf16.msra.mxu0 %v6809_v24  ;;  %v7119_v24 = vcombine.low %v542_v10, %v546_v11  ;;  %v602_v14 = vld [vmem:[#allocation2 + $0xde8] sm:$0xff] }
 0x191   :  { %3677 = vmatprep.subr.bf16.mxu0 %v6818_v30  ;;  %v562_v30 = vld [vmem:[#allocation2 + $0xca8] sm:$0xff] }
 0x192   :  { %3596 = vmatpush1.bf16.msra.mxu1 %v7071_v33  ;;  %v307_v33 = vld [vmem:[#allocation2 + $0x4b0] sm:$0xff]  ;;  %v7136_v36 = vcombine.high %v558_v29, %v562_v30 }
 0x193   :  { %3597 = vmatprep.subr.bf16.mxu1 %v7080_v35  ;;  %v6873_v35 = vcombine.low %v295_v21, %v299_v23  ;;  %v6882_v37 = vcombine.high %v303_v31, %v307_v33  ;;  %v7176_v23 = vcombine.high %v598_v12, %v602_v14 }
 0x194   :  { %3678 = vmatpush1.bf16.msra.mxu0 %v6817_v63  ;;  %v7127_v63 = vcombine.low %v550_v19, %v554_v20  ;;  %v7167_v19 = vcombine.low %v590_v1, %v594_v3 }
 0x195   :  { %3679 = vmatprep.subr.bf16.mxu0 %v6826_v39  ;;  %v570_v39 = vld [vmem:[#allocation2 + $0xce8] sm:$0xff] }
 0x196   :  { %3598 = vmatpush1.bf16.msra.mxu1 %v7079_v41  ;;  %v315_v41 = vld [vmem:[#allocation2 + $0x4f0] sm:$0xff]  ;;  %v7144_v45 = vcombine.high %v566_v38, %v570_v39 }
 0x197   :  { %3599 = vmatprep.subr.bf16.mxu1 %v7088_v44  ;;  %v6881_v44 = vcombine.low %v303_v31, %v307_v33  ;;  %v6890_v46 = vcombine.high %v311_v40, %v315_v41 }
 0x198   :  { %3680 = vmatpush1.bf16.msra.mxu0 %v6825_v42  ;;  %v7135_v42 = vcombine.low %v558_v29, %v562_v30  ;;  %v355_v29 = vld [vmem:[#allocation2 + $0x630] sm:$0xff]  ;;  %v7175_v30 = vcombine.low %v598_v12, %v602_v14 }
 0x199   :  { %3681 = vmatprep.subr.bf16.mxu0 %v6834_v48  ;;  %v578_v48 = vld [vmem:[#allocation2 + $0xd28] sm:$0xff]  ;;  %v395_v12 = vld [vmem:[#allocation2 + $0x770] sm:$0xff] }
 0x19a   :  { %3600 = vmatpush1.bf16.msra.mxu1 %v7087_v53  ;;  %v323_v53 = vld [vmem:[#allocation2 + $0x530] sm:$0xff]  ;;  %v7152_v52 = vcombine.high %v574_v47, %v578_v48 }
 0x19b   :  { %3601 = vmatprep.subr.bf16.mxu1 %v7096_v51  ;;  %v6889_v51 = vcombine.low %v311_v40, %v315_v41  ;;  %v6898_v54 = vcombine.high %v319_v49, %v323_v53 }
 0x19c   :  { %3682 = vmatpush1.bf16.msra.mxu0 %v6833_v50  ;;  %v7143_v50 = vcombine.low %v566_v38, %v570_v39  ;;  %v363_v38 = vld [vmem:[#allocation2 + $0x670] sm:$0xff] }
 0x19d   :  { %3683 = vmatprep.subr.bf16.mxu0 %v6842_v57  ;;  %v586_v57 = vld [vmem:[#allocation2 + $0xd68] sm:$0xff] }
 0x19e   :  { %3602 = vmatpush1.bf16.msra.mxu1 %v7095_v59  ;;  %v331_v59 = vld [vmem:[#allocation2 + $0x570] sm:$0xff]  ;;  %v7160_v62 = vcombine.high %v582_v55, %v586_v57 }
 0x19f   :  { %3603 = vmatprep.subr.bf16.mxu1 %v7104_v61  ;;  %v6897_v61 = vcombine.low %v319_v49, %v323_v53 }
 0x1a0   :  { %3684 = vmatpush1.bf16.msra.mxu0 %v6841_v60  ;;  %v7151_v60 = vcombine.low %v574_v47, %v578_v48  ;;  %v371_v47 = vld [vmem:[#allocation2 + $0x6b0] sm:$0xff] }
 0x1a1   :  { %3685 = vmatprep.subr.bf16.mxu0 %v6850_v0  ;;  %v6906_v0 = vcombine.high %v327_v58, %v331_v59 }
 0x1a2   :  { %3604 = vmatpush1.bf16.msra.mxu1 %v7103_v5  ;;  %v339_v5 = vld [vmem:[#allocation2 + $0x5b0] sm:$0xff] }
 0x1a3   :  { %3605 = vmatprep.subr.bf16.mxu1 %v7112_v7  ;;  %v6905_v7 = vcombine.low %v327_v58, %v331_v59  ;;  %v6914_v11 = vcombine.high %v335_v4, %v339_v5  ;;  %v6913_v21 = vcombine.low %v335_v4, %v339_v5 }
 0x1a4   :  { %3686 = vmatpush1.bf16.msra.mxu0 %v6849_v6  ;;  %v7159_v6 = vcombine.low %v582_v55, %v586_v57  ;;  %v379_v55 = vld [vmem:[#allocation2 + $0x6f0] sm:$0xff] }
 0x1a5   :  { %3687 = vmatprep.subr.bf16.mxu0 %v6858_v8  ;;  %v7168_v8 = vcombine.high %v590_v1, %v594_v3  ;;  %v387_v1 = vld [vmem:[#allocation2 + $0x730] sm:$0xff] }
 0x1a6   :  { %3606 = vmatpush1.bf16.msra.mxu1 %v7111_v15 }
 0x1a7   :  { %3616 = vmatprep.subr.bf16.mxu1 %v7120_v17  ;;  %v347_v17 = vld [vmem:[#allocation2 + $0x5f0] sm:$0xff] }
 0x1a8   :  { %3688 = vmatpush1.bf16.msra.mxu0 %v6857_v16  ;;  %v343_v16 = vld [vmem:[#allocation2 + $0x5d0] sm:$0xff] }
 0x1a9   :  { %3698 = vmatprep.subr.bf16.mxu0 %v6866_v18  ;;  %3608 = vmatmul.mubr.bf16.vlgmr.msra.gmra.mrb[4].mxu1 %v8714_v32  ;;  %v6921_v31 = vcombine.low %v343_v16, %v347_v17 }
 0x1aa   :  { %3617 = vmatpush1.bf16.msra.mxu1 %v7119_v24  ;;  %3648 = vmatprep.mubr.bf16.mxu1 %v8735_v56  ;;  %v6922_v24 = vcombine.high %v343_v16, %v347_v17 }
 0x1ab   :  { %3690 = vmatmul.mubr.bf16.vlgmr.msra.gmra.mrb[4].mxu0 %v8718_v22  ;;  %3618 = vmatprep.subr.bf16.mxu1 %v7128_v26  ;;  %v610_v26 = vld [vmem:[#allocation2 + $0xe28] sm:$0xff] }
 0x1ac   :  { %3699 = vmatpush1.bf16.msra.mxu0 %v6865_v25  ;;  %3730 = vmatprep.mubr.bf16.mxu0 %v8706_v13  ;;  %v606_v25 = vld [vmem:[#allocation2 + $0xe08] sm:$0xff] }
 0x1ad   :  { %3700 = vmatprep.subr.bf16.mxu0 %v6874_v27  ;;  %v351_v27 = vld [vmem:[#allocation2 + $0x610] sm:$0xff]  ;;  %v7184_v33 = vcombine.high %v606_v25, %v610_v26  ;;  %v7183_v39 = vcombine.low %v606_v25, %v610_v26 }
 0x1ae   :  { %3619 = vmatpush1.bf16.msra.mxu1 %v7127_v63  ;;  %v6930_v63 = vcombine.high %v351_v27, %v355_v29  ;;  %v6929_v40 = vcombine.low %v351_v27, %v355_v29  ;;  %v662_v29 = vld [vmem:[#allocation2 + $0xfc8] sm:$0xff] }
 0x1af   :  { %3620 = vmatprep.subr.bf16.mxu1 %v7136_v36  ;;  %v618_v36 = vld [vmem:[#allocation2 + $0xe68] sm:$0xff] }
 0x1b0   :  { %3701 = vmatpush1.bf16.msra.mxu0 %v6873_v35  ;;  %v614_v35 = vld [vmem:[#allocation2 + $0xe48] sm:$0xff] }
 0x1b1   :  { %3702 = vmatprep.subr.bf16.mxu0 %v6882_v37  ;;  %v359_v37 = vld [vmem:[#allocation2 + $0x650] sm:$0xff]  ;;  %v7192_v41 = vcombine.high %v614_v35, %v618_v36  ;;  %v7191_v48 = vcombine.low %v614_v35, %v618_v36 }
 0x1b2   :  { %3621 = vmatpush1.bf16.msra.mxu1 %v7135_v42  ;;  %v6938_v42 = vcombine.high %v359_v37, %v363_v38  ;;  %v6937_v49 = vcombine.low %v359_v37, %v363_v38  ;;  %v160_v38 = vld [vmem:[#allocation2 + $0x18] sm:$0xff] }
 0x1b3   :  { %3622 = vmatprep.subr.bf16.mxu1 %v7144_v45  ;;  %v626_v45 = vld [vmem:[#allocation2 + $0xea8] sm:$0xff] }
 0x1b4   :  { %3703 = vmatpush1.bf16.msra.mxu0 %v6881_v44  ;;  %v622_v44 = vld [vmem:[#allocation2 + $0xe88] sm:$0xff] }
 0x1b5   :  { %3704 = vmatprep.subr.bf16.mxu0 %v6890_v46  ;;  %v367_v46 = vld [vmem:[#allocation2 + $0x690] sm:$0xff]  ;;  %v7200_v53 = vcombine.high %v622_v44, %v626_v45  ;;  %v7199_v57 = vcombine.low %v622_v44, %v626_v45 }
 0x1b6   :  { %3623 = vmatpush1.bf16.msra.mxu1 %v7143_v50  ;;  %v6946_v50 = vcombine.high %v367_v46, %v371_v47  ;;  %v6945_v58 = vcombine.low %v367_v46, %v371_v47  ;;  %v168_v47 = vld [vmem:[#allocation2 + $0x58] sm:$0xff] }
 0x1b7   :  { %3624 = vmatprep.subr.bf16.mxu1 %v7152_v52  ;;  %v634_v52 = vld [vmem:[#allocation2 + $0xee8] sm:$0xff] }
 0x1b8   :  { %3705 = vmatpush1.bf16.msra.mxu0 %v6889_v51  ;;  %v630_v51 = vld [vmem:[#allocation2 + $0xec8] sm:$0xff] }
 0x1b9   :  { %3706 = vmatprep.subr.bf16.mxu0 %v6898_v54  ;;  %v375_v54 = vld [vmem:[#allocation2 + $0x6d0] sm:$0xff]  ;;  %v7208_v59 = vcombine.high %v630_v51, %v634_v52  ;;  %v7207_v3 = vcombine.low %v630_v51, %v634_v52 }
 0x1ba   :  { %3625 = vmatpush1.bf16.msra.mxu1 %v7151_v60  ;;  %v6954_v60 = vcombine.high %v375_v54, %v379_v55  ;;  %v6953_v4 = vcombine.low %v375_v54, %v379_v55  ;;  %v176_v55 = vld [vmem:[#allocation2 + $0x98] sm:$0xff] }
 0x1bb   :  { %3626 = vmatprep.subr.bf16.mxu1 %v7160_v62  ;;  %v642_v62 = vld [vmem:[#allocation2 + $0xf28] sm:$0xff] }
 0x1bc   :  { %3707 = vmatpush1.bf16.msra.mxu0 %v6897_v61  ;;  %v8753_v10 = vpop.f32.mrb[0].mxu1  ;;  %v638_v61 = vld [vmem:[#allocation2 + $0xf08] sm:$0xff] }
 0x1bd   :  { %3708 = vmatprep.subr.bf16.mxu0 %v6906_v0  ;;  %v8755_v15 = vpop.f32.mrb[1].mxu1  ;;  %v383_v0 = vld [vmem:[#allocation2 + $0x710] sm:$0xff]  ;;  %v7216_v5 = vcombine.high %v638_v61, %v642_v62  ;;  %v7215_v14 = vcombine.low %v638_v61, %v642_v62 }
 0x1be   :  { %v3367_v18 = vpop.f32.mrb[2].mxu1  ;;  %3627 = vmatpush1.bf16.msra.mxu1 %v7159_v6  ;;  %v6962_v6 = vcombine.high %v383_v0, %v387_v1  ;;  %v6961_v16 = vcombine.low %v383_v0, %v387_v1  ;;  %v184_v1 = vld [vmem:[#allocation2 + $0xd8] sm:$0xff] }
 0x1bf   :  { %v3368_v20 = vpop.f32.mrb[3].mxu1  ;;  %3628 = vmatprep.subr.bf16.mxu1 %v7168_v8  ;;  %v650_v8 = vld [vmem:[#allocation2 + $0xf68] sm:$0xff] }
 0x1c0   :  { %3709 = vmatpush1.bf16.msra.mxu0 %v6905_v7  ;;  %v646_v7 = vld [vmem:[#allocation2 + $0xf48] sm:$0xff] }
 0x1c1   :  { %3710 = vmatprep.subr.bf16.mxu0 %v6914_v11  ;;  %v391_v11 = vld [vmem:[#allocation2 + $0x750] sm:$0xff]  ;;  %v7224_v17 = vcombine.high %v646_v7, %v650_v8  ;;  %v658_v20 = vld [vmem:[#allocation2 + $0xfa8] sm:$0xff] }
 0x1c2   :  { %3629 = vmatpush1.bf16.msra.mxu1 %v7167_v19  ;;  %v6970_v18 = vcombine.high %v391_v11, %v395_v12  ;;  %v654_v19 = vld [vmem:[#allocation2 + $0xf88] sm:$0xff]  ;;  %v6969_v25 = vcombine.low %v391_v11, %v395_v12  ;;  %v192_v12 = vld [vmem:[#allocation2 + $0x118] sm:$0xff] }
 0x1c3   :  { %3630 = vmatprep.subr.bf16.mxu1 %v7176_v23  ;;  %v403_v23 = vld [vmem:[#allocation2 + $0x7b0] sm:$0xff]  ;;  %v7232_v26 = vcombine.high %v654_v19, %v658_v20 }
 0x1c4   :  { %3711 = vmatpush1.bf16.msra.mxu0 %v6913_v21  ;;  %v399_v21 = vld [vmem:[#allocation2 + $0x790] sm:$0xff] }
 0x1c5   :  { %3712 = vmatprep.subr.bf16.mxu0 %v6922_v24  ;;  %v7223_v24 = vcombine.low %v646_v7, %v650_v8  ;;  %v6978_v27 = vcombine.high %v399_v21, %v403_v23  ;;  %v6977_v35 = vcombine.low %v399_v21, %v403_v23  ;;  %v200_v21 = vld [vmem:[#allocation2 + $0x158] sm:$0xff] }
 0x1c6   :  { %3631 = vmatpush1.bf16.msra.mxu1 %v7175_v30  ;;  %v666_v30 = vld [vmem:[#allocation2 + $0xfe8] sm:$0xff]  ;;  %v204_v23 = vld [vmem:[#allocation2 + $0x178] sm:$0xff] }
 0x1c7   :  { %3632 = vmatprep.subr.bf16.mxu1 %v7184_v33  ;;  %v411_v33 = vld [vmem:[#allocation2 + $0x7f0] sm:$0xff]  ;;  %v7240_v36 = vcombine.high %v662_v29, %v666_v30 }
 0x1c8   :  { %3713 = vmatpush1.bf16.msra.mxu0 %v6921_v31  ;;  %v407_v31 = vld [vmem:[#allocation2 + $0x7d0] sm:$0xff] }
 0x1c9   :  { %3714 = vmatprep.subr.bf16.mxu0 %v6930_v63  ;;  %v7231_v63 = vcombine.low %v654_v19, %v658_v20  ;;  %v6986_v37 = vcombine.high %v407_v31, %v411_v33  ;;  %v6985_v44 = vcombine.low %v407_v31, %v411_v33  ;;  %v208_v31 = vld [vmem:[#allocation2 + $0x198] sm:$0xff] }
 0x1ca   :  { %3633 = vmatpush1.bf16.msra.mxu1 %v7183_v39  ;;  %v164_v39 = vld [vmem:[#allocation2 + $0x38] sm:$0xff] }
 0x1cb   :  { %3634 = vmatprep.subr.bf16.mxu1 %v7192_v41  ;;  %v419_v41 = vld [vmem:[#allocation2 + $0x830] sm:$0xff]  ;;  %v6740_v45 = vcombine.high %v160_v38, %v164_v39  ;;  %v212_v33 = vld [vmem:[#allocation2 + $0x1b8] sm:$0xff] }
 0x1cc   :  { %3715 = vmatpush1.bf16.msra.mxu0 %v6929_v40  ;;  %v415_v40 = vld [vmem:[#allocation2 + $0x810] sm:$0xff] }
 0x1cd   :  { %3716 = vmatprep.subr.bf16.mxu0 %v6938_v42  ;;  %v7239_v42 = vcombine.low %v662_v29, %v666_v30  ;;  %v6994_v46 = vcombine.high %v415_v40, %v419_v41  ;;  %v6993_v51 = vcombine.low %v415_v40, %v419_v41  ;;  %v6780_v29 = vcombine.high %v200_v21, %v204_v23  ;;  %v216_v40 = vld [vmem:[#allocation2 + $0x1d8] sm:$0xff] }
 0x1ce   :  { %3635 = vmatpush1.bf16.msra.mxu1 %v7191_v48  ;;  %v172_v48 = vld [vmem:[#allocation2 + $0x78] sm:$0xff] }
 0x1cf   :  { %3636 = vmatprep.subr.bf16.mxu1 %v7200_v53  ;;  %v427_v53 = vld [vmem:[#allocation2 + $0x870] sm:$0xff]  ;;  %v6748_v52 = vcombine.high %v168_v47, %v172_v48  ;;  %v220_v41 = vld [vmem:[#allocation2 + $0x1f8] sm:$0xff] }
 0x1d0   :  { %3717 = vmatpush1.bf16.msra.mxu0 %v6937_v49  ;;  %v423_v49 = vld [vmem:[#allocation2 + $0x850] sm:$0xff] }
 0x1d1   :  { %3718 = vmatprep.subr.bf16.mxu0 %v6946_v50  ;;  %v6739_v50 = vcombine.low %v160_v38, %v164_v39  ;;  %v7002_v54 = vcombine.high %v423_v49, %v427_v53  ;;  %v7001_v61 = vcombine.low %v423_v49, %v427_v53  ;;  %v6788_v38 = vcombine.high %v208_v31, %v212_v33  ;;  %v224_v49 = vld [vmem:[#allocation2 + $0x218] sm:$0xff] }
 0x1d2   :  { %3637 = vmatpush1.bf16.msra.mxu1 %v7199_v57  ;;  %v180_v57 = vld [vmem:[#allocation2 + $0xb8] sm:$0xff] }
 0x1d3   :  { %3638 = vmatprep.subr.bf16.mxu1 %v7208_v59  ;;  %v435_v59 = vld [vmem:[#allocation2 + $0x8b0] sm:$0xff]  ;;  %v6756_v62 = vcombine.high %v176_v55, %v180_v57  ;;  %v228_v53 = vld [vmem:[#allocation2 + $0x238] sm:$0xff] }
 0x1d4   :  { %3719 = vmatpush1.bf16.msra.mxu0 %v6945_v58  ;;  %v431_v58 = vld [vmem:[#allocation2 + $0x890] sm:$0xff] }
 0x1d5   :  { %3720 = vmatprep.subr.bf16.mxu0 %v6954_v60  ;;  %v6747_v60 = vcombine.low %v168_v47, %v172_v48  ;;  %v7010_v0 = vcombine.high %v431_v58, %v435_v59  ;;  %v7009_v7 = vcombine.low %v431_v58, %v435_v59  ;;  %v6796_v47 = vcombine.high %v216_v40, %v220_v41  ;;  %v232_v58 = vld [vmem:[#allocation2 + $0x258] sm:$0xff] }
 0x1d6   :  { %3639 = vmatpush1.bf16.msra.mxu1 %v7207_v3  ;;  %v188_v3 = vld [vmem:[#allocation2 + $0xf8] sm:$0xff] }
 0x1d7   :  { %3640 = vmatprep.subr.bf16.mxu1 %v7216_v5  ;;  %v443_v5 = vld [vmem:[#allocation2 + $0x8f0] sm:$0xff]  ;;  %v6764_v8 = vcombine.high %v184_v1, %v188_v3  ;;  %v236_v59 = vld [vmem:[#allocation2 + $0x278] sm:$0xff] }
 0x1d8   :  { %3721 = vmatpush1.bf16.msra.mxu0 %v6953_v4  ;;  %v439_v4 = vld [vmem:[#allocation2 + $0x8d0] sm:$0xff] }
 0x1d9   :  { %3722 = vmatprep.subr.bf16.mxu0 %v6962_v6  ;;  %v6755_v6 = vcombine.low %v176_v55, %v180_v57  ;;  %v7018_v11 = vcombine.high %v439_v4, %v443_v5  ;;  %v7017_v19 = vcombine.low %v439_v4, %v443_v5  ;;  %v6804_v55 = vcombine.high %v224_v49, %v228_v53  ;;  %v240_v4 = vld [vmem:[#allocation2 + $0x298] sm:$0xff] }
 0x1da   :  { %3641 = vmatpush1.bf16.msra.mxu1 %v7215_v14  ;;  %v196_v14 = vld [vmem:[#allocation2 + $0x138] sm:$0xff] }
 0x1db   :  { %3642 = vmatprep.subr.bf16.mxu1 %v7224_v17  ;;  %v451_v17 = vld [vmem:[#allocation2 + $0x930] sm:$0xff]  ;;  %v6772_v20 = vcombine.high %v192_v12, %v196_v14  ;;  %v244_v5 = vld [vmem:[#allocation2 + $0x2b8] sm:$0xff] }
 0x1dc   :  { %3723 = vmatpush1.bf16.msra.mxu0 %v6961_v16  ;;  %v447_v16 = vld [vmem:[#allocation2 + $0x910] sm:$0xff] }
 0x1dd   :  { %3724 = vmatprep.subr.bf16.mxu0 %v6970_v18  ;;  %v6763_v18 = vcombine.low %v184_v1, %v188_v3  ;;  %v6812_v1 = vcombine.high %v232_v58, %v236_v59 }
 0x1de   :  { %3643 = vmatpush1.bf16.msra.mxu1 %v7223_v24  ;;  %v455_v24 = vld [vmem:[#allocation2 + $0x950] sm:$0xff] }
 0x1df   :  { %3644 = vmatprep.subr.bf16.mxu1 %v7232_v26  ;;  %v6771_v26 = vcombine.low %v192_v12, %v196_v14  ;;  %v6820_v12 = vcombine.high %v240_v4, %v244_v5 }
 0x1e0   :  { %3725 = vmatpush1.bf16.msra.mxu0 %v6969_v25  ;;  %v459_v25 = vld [vmem:[#allocation2 + $0x970] sm:$0xff] }
 0x1e1   :  { %3726 = vmatprep.subr.bf16.mxu0 %v6978_v27  ;;  %v7025_v27 = vcombine.low %v447_v16, %v451_v17  ;;  %v7034_v30 = vcombine.high %v455_v24, %v459_v25 }
 0x1e2   :  { %3645 = vmatpush1.bf16.msra.mxu1 %v7231_v63  ;;  %v463_v63 = vld [vmem:[#allocation2 + $0x990] sm:$0xff] }
 0x1e3   :  { %3646 = vmatprep.subr.bf16.mxu1 %v7240_v36  ;;  %v6779_v36 = vcombine.low %v200_v21, %v204_v23 }
 0x1e4   :  { %3727 = vmatpush1.bf16.msra.mxu0 %v6977_v35  ;;  %v467_v35 = vld [vmem:[#allocation2 + $0x9b0] sm:$0xff] }
 0x1e5   :  { %3728 = vmatprep.subr.bf16.mxu0 %v6986_v37  ;;  %v7033_v37 = vcombine.low %v455_v24, %v459_v25  ;;  %v7042_v39 = vcombine.high %v463_v63, %v467_v35  ;;  %v256_v24 = vld [vmem:[#allocation2 + $0x318] sm:$0xff] }
 0x1e6   :  { %3647 = vmatpush1.bf16.msra.mxu1 %v7239_v42  ;;  %v471_v42 = vld [vmem:[#allocation2 + $0x9d0] sm:$0xff]  ;;  %v260_v25 = vld [vmem:[#allocation2 + $0x338] sm:$0xff] }
 0x1e7   :  { %3821 = vmatprep.subr.bf16.mxu1 %v6740_v45  ;;  %v6787_v45 = vcombine.low %v208_v31, %v212_v33  ;;  %v6836_v31 = vcombine.high %v256_v24, %v260_v25 }
 0x1e8   :  { %3729 = vmatpush1.bf16.msra.mxu0 %v6985_v44  ;;  %v475_v44 = vld [vmem:[#allocation2 + $0x9f0] sm:$0xff] }
 0x1e9   :  { %3739 = vmatprep.subr.bf16.mxu0 %v6994_v46  ;;  %3649 = vmatmul.mubr.bf16.vlgmr.msra.gmra.mrb[4].mxu1 %v8743_v2  ;;  %v7041_v46 = vcombine.low %v463_v63, %v467_v35  ;;  %v7050_v48 = vcombine.high %v471_v42, %v475_v44  ;;  %v264_v63 = vld [vmem:[#allocation2 + $0x358] sm:$0xff] }
 0x1ea   :  { %3822 = vmatpush1.bf16.msra.mxu1 %v6739_v50  ;;  %3853 = vmatprep.mubr.bf16.mxu1 %v8701_v9  ;;  %v7026_v9 = vcombine.high %v447_v16, %v451_v17  ;;  %v479_v50 = vld [vmem:[#allocation2 + $0xa10] sm:$0xff]  ;;  %v248_v16 = vld [vmem:[#allocation2 + $0x2d8] sm:$0xff] }
 0x1eb   :  { %3731 = vmatmul.mubr.bf16.vlgmr.msra.gmra.mrb[4].mxu0 %v8724_v34  ;;  %3823 = vmatprep.subr.bf16.mxu1 %v6748_v52  ;;  %v6795_v52 = vcombine.low %v216_v40, %v220_v41  ;;  %v252_v17 = vld [vmem:[#allocation2 + $0x2f8] sm:$0xff] }
 0x1ec   :  { %3740 = vmatpush1.bf16.msra.mxu0 %v6993_v51  ;;  %3771 = vmatprep.mubr.bf16.mxu0 %v8727_v28  ;;  %v483_v51 = vld [vmem:[#allocation2 + $0xa30] sm:$0xff]  ;;  %v6828_v21 = vcombine.high %v248_v16, %v252_v17  ;;  %v268_v35 = vld [vmem:[#allocation2 + $0x378] sm:$0xff] }
 0x1ed   :  { %3741 = vmatprep.subr.bf16.mxu0 %v7002_v54  ;;  %v7049_v54 = vcombine.low %v471_v42, %v475_v44  ;;  %v7058_v57 = vcombine.high %v479_v50, %v483_v51  ;;  %v6844_v40 = vcombine.high %v264_v63, %v268_v35  ;;  %v272_v42 = vld [vmem:[#allocation2 + $0x398] sm:$0xff] }
 0x1ee   :  { %3824 = vmatpush1.bf16.msra.mxu1 %v6747_v60  ;;  %v487_v60 = vld [vmem:[#allocation2 + $0xa50] sm:$0xff]  ;;  %v276_v44 = vld [vmem:[#allocation2 + $0x3b8] sm:$0xff] }
 0x1ef   :  { %3825 = vmatprep.subr.bf16.mxu1 %v6756_v62  ;;  %v6803_v62 = vcombine.low %v224_v49, %v228_v53  ;;  %v6852_v49 = vcombine.high %v272_v42, %v276_v44 }
 0x1f0   :  { %3742 = vmatpush1.bf16.msra.mxu0 %v7001_v61  ;;  %v491_v61 = vld [vmem:[#allocation2 + $0xa70] sm:$0xff] }
 0x1f1   :  { %3743 = vmatprep.subr.bf16.mxu0 %v7010_v0  ;;  %v7057_v0 = vcombine.low %v479_v50, %v483_v51  ;;  %v7066_v3 = vcombine.high %v487_v60, %v491_v61  ;;  %v280_v50 = vld [vmem:[#allocation2 + $0x3d8] sm:$0xff] }
 0x1f2   :  { %3826 = vmatpush1.bf16.msra.mxu1 %v6755_v6  ;;  %v495_v6 = vld [vmem:[#allocation2 + $0xa90] sm:$0xff]  ;;  %v284_v51 = vld [vmem:[#allocation2 + $0x3f8] sm:$0xff] }
 0x1f3   :  { %3827 = vmatprep.subr.bf16.mxu1 %v6764_v8  ;;  %v6811_v8 = vcombine.low %v232_v58, %v236_v59  ;;  %v6860_v58 = vcombine.high %v280_v50, %v284_v51 }
 0x1f4   :  { %3744 = vmatpush1.bf16.msra.mxu0 %v7009_v7  ;;  %v499_v7 = vld [vmem:[#allocation2 + $0xab0] sm:$0xff] }
 0x1f5   :  { %3745 = vmatprep.subr.bf16.mxu0 %v7018_v11  ;;  %v7065_v11 = vcombine.low %v487_v60, %v491_v61  ;;  %v7074_v14 = vcombine.high %v495_v6, %v499_v7  ;;  %v288_v60 = vld [vmem:[#allocation2 + $0x418] sm:$0xff] }
 0x1f6   :  { %3828 = vmatpush1.bf16.msra.mxu1 %v6763_v18  ;;  %v503_v18 = vld [vmem:[#allocation2 + $0xad0] sm:$0xff]  ;;  %v292_v61 = vld [vmem:[#allocation2 + $0x438] sm:$0xff] }
 0x1f7   :  { %3829 = vmatprep.subr.bf16.mxu1 %v6772_v20  ;;  %v6819_v20 = vcombine.low %v240_v4, %v244_v5  ;;  %v6868_v4 = vcombine.high %v288_v60, %v292_v61 }
 0x1f8   :  { %3746 = vmatpush1.bf16.msra.mxu0 %v7017_v19  ;;  %v507_v19 = vld [vmem:[#allocation2 + $0xaf0] sm:$0xff] }
 0x1f9   :  { %3747 = vmatprep.subr.bf16.mxu0 %v7026_v9  ;;  %v7073_v9 = vcombine.low %v495_v6, %v499_v7  ;;  %v7082_v23 = vcombine.high %v503_v18, %v507_v19  ;;  %v296_v6 = vld [vmem:[#allocation2 + $0x458] sm:$0xff] }
 0x1fa   :  { %3830 = vmatpush1.bf16.msra.mxu1 %v6771_v26  ;;  %v511_v26 = vld [vmem:[#allocation2 + $0xb10] sm:$0xff]  ;;  %v300_v7 = vld [vmem:[#allocation2 + $0x478] sm:$0xff] }
 0x1fb   :  { %3831 = vmatprep.subr.bf16.mxu1 %v6780_v29  ;;  %v6827_v29 = vcombine.low %v248_v16, %v252_v17  ;;  %v6876_v16 = vcombine.high %v296_v6, %v300_v7 }
 0x1fc   :  { %3748 = vmatpush1.bf16.msra.mxu0 %v7025_v27  ;;  %v515_v27 = vld [vmem:[#allocation2 + $0xb30] sm:$0xff] }
 0x1fd   :  { %3749 = vmatprep.subr.bf16.mxu0 %v7034_v30  ;;  %v7081_v30 = vcombine.low %v503_v18, %v507_v19  ;;  %v7090_v33 = vcombine.high %v511_v26, %v515_v27  ;;  %v304_v18 = vld [vmem:[#allocation2 + $0x498] sm:$0xff] }
 0x1fe   :  { %3832 = vmatpush1.bf16.msra.mxu1 %v6779_v36  ;;  %v519_v36 = vld [vmem:[#allocation2 + $0xb50] sm:$0xff]  ;;  %v308_v19 = vld [vmem:[#allocation2 + $0x4b8] sm:$0xff] }
 0x1ff   :  { %3833 = vmatprep.subr.bf16.mxu1 %v6788_v38  ;;  %v6835_v38 = vcombine.low %v256_v24, %v260_v25  ;;  %v6884_v24 = vcombine.high %v304_v18, %v308_v19 }
 0x200   :  { %3750 = vmatpush1.bf16.msra.mxu0 %v7033_v37  ;;  %v523_v37 = vld [vmem:[#allocation2 + $0xb70] sm:$0xff] }
 0x201   :  { %3751 = vmatprep.subr.bf16.mxu0 %v7042_v39  ;;  %v7089_v39 = vcombine.low %v511_v26, %v515_v27  ;;  %v7098_v41 = vcombine.high %v519_v36, %v523_v37  ;;  %v312_v26 = vld [vmem:[#allocation2 + $0x4d8] sm:$0xff] }
 0x202   :  { %3834 = vmatpush1.bf16.msra.mxu1 %v6787_v45  ;;  %v527_v45 = vld [vmem:[#allocation2 + $0xb90] sm:$0xff]  ;;  %v316_v27 = vld [vmem:[#allocation2 + $0x4f8] sm:$0xff] }
 0x203   :  { %3835 = vmatprep.subr.bf16.mxu1 %v6796_v47  ;;  %v6843_v47 = vcombine.low %v264_v63, %v268_v35  ;;  %v320_v35 = vld [vmem:[#allocation2 + $0x518] sm:$0xff] }
 0x204   :  { %3752 = vmatpush1.bf16.msra.mxu0 %v7041_v46  ;;  %v531_v46 = vld [vmem:[#allocation2 + $0xbb0] sm:$0xff] }
 0x205   :  { %3753 = vmatprep.subr.bf16.mxu0 %v7050_v48  ;;  %v7097_v48 = vcombine.low %v519_v36, %v523_v37  ;;  %v7106_v53 = vcombine.high %v527_v45, %v531_v46  ;;  %v324_v36 = vld [vmem:[#allocation2 + $0x538] sm:$0xff]  ;;  %v575_v37 = vld [vmem:[#allocation2 + $0xd10] sm:$0xff] }
 0x206   :  { %3836 = vmatpush1.bf16.msra.mxu1 %v6795_v52  ;;  %v535_v52 = vld [vmem:[#allocation2 + $0xbd0] sm:$0xff] }
 0x207   :  { %3837 = vmatprep.subr.bf16.mxu1 %v6804_v55  ;;  %v6851_v55 = vcombine.low %v272_v42, %v276_v44  ;;  %v328_v44 = vld [vmem:[#allocation2 + $0x558] sm:$0xff] }
 0x208   :  { %3754 = vmatpush1.bf16.msra.mxu0 %v7049_v54  ;;  %v539_v54 = vld [vmem:[#allocation2 + $0xbf0] sm:$0xff] }
 0x209   :  { %3755 = vmatprep.subr.bf16.mxu0 %v7058_v57  ;;  %v7105_v57 = vcombine.low %v527_v45, %v531_v46  ;;  %v7114_v59 = vcombine.high %v535_v52, %v539_v54  ;;  %v332_v45 = vld [vmem:[#allocation2 + $0x578] sm:$0xff]  ;;  %v8768_v46 = vld [vmem:[#allocation5] sm:$0xff] }
 0x20a   :  { %3838 = vmatpush1.bf16.msra.mxu1 %v6803_v62  ;;  %v543_v62 = vld [vmem:[#allocation2 + $0xc10] sm:$0xff] }
 0x20b   :  { %3839 = vmatprep.subr.bf16.mxu1 %v6812_v1  ;;  %v6859_v1 = vcombine.low %v280_v50, %v284_v51  ;;  %v6908_v51 = vcombine.high %v328_v44, %v332_v45 }
 0x20c   :  { %3756 = vmatpush1.bf16.msra.mxu0 %v7057_v0  ;;  %v547_v0 = vld [vmem:[#allocation2 + $0xc30] sm:$0xff] }
 0x20d   :  { %3757 = vmatprep.subr.bf16.mxu0 %v7066_v3  ;;  %v7113_v3 = vcombine.low %v535_v52, %v539_v54  ;;  %v7122_v5 = vcombine.high %v543_v62, %v547_v0 }
 0x20e   :  { %3840 = vmatpush1.bf16.msra.mxu1 %v6811_v8  ;;  %v551_v8 = vld [vmem:[#allocation2 + $0xc50] sm:$0xff] }
 0x20f   :  { %3841 = vmatprep.subr.bf16.mxu1 %v6820_v12  ;;  %v6867_v12 = vcombine.low %v288_v60, %v292_v61  ;;  %v595_v60 = vld [vmem:[#allocation2 + $0xdb0] sm:$0xff]  ;;  %v6907_v61 = vcombine.low %v328_v44, %v332_v45 }
 0x210   :  { %3758 = vmatpush1.bf16.msra.mxu0 %v7065_v11  ;;  %v555_v11 = vld [vmem:[#allocation2 + $0xc70] sm:$0xff] }
 0x211   :  { %3759 = vmatprep.subr.bf16.mxu0 %v7074_v14  ;;  %v7121_v14 = vcombine.low %v543_v62, %v547_v0  ;;  %v7130_v17 = vcombine.high %v551_v8, %v555_v11 }
 0x212   :  { %3842 = vmatpush1.bf16.msra.mxu1 %v6819_v20  ;;  %v559_v20 = vld [vmem:[#allocation2 + $0xc90] sm:$0xff] }
 0x213   :  { %3843 = vmatprep.subr.bf16.mxu1 %v6828_v21  ;;  %v6875_v21 = vcombine.low %v296_v6, %v300_v7 }
 0x214   :  { %3760 = vmatpush1.bf16.msra.mxu0 %v7073_v9  ;;  %v563_v9 = vld [vmem:[#allocation2 + $0xcb0] sm:$0xff] }
 0x215   :  { %3761 = vmatprep.subr.bf16.mxu0 %v7082_v23  ;;  %v7129_v23 = vcombine.low %v551_v8, %v555_v11  ;;  %v7138_v25 = vcombine.high %v559_v20, %v563_v9  ;;  %v599_v8 = vld [vmem:[#allocation2 + $0xdd0] sm:$0xff] }
 0x216   :  { %3844 = vmatpush1.bf16.msra.mxu1 %v6827_v29  ;;  %v567_v29 = vld [vmem:[#allocation2 + $0xcd0] sm:$0xff] }
 0x217   :  { %3845 = vmatprep.subr.bf16.mxu1 %v6836_v31  ;;  %v7137_v31 = vcombine.low %v559_v20, %v563_v9  ;;  %v603_v11 = vld [vmem:[#allocation2 + $0xdf0] sm:$0xff] }
 0x218   :  { %3762 = vmatpush1.bf16.msra.mxu0 %v7081_v30  ;;  %v571_v30 = vld [vmem:[#allocation2 + $0xcf0] sm:$0xff]  ;;  %v7178_v9 = vcombine.high %v599_v8, %v603_v11 }
 0x219   :  { %3763 = vmatprep.subr.bf16.mxu0 %v7090_v33  ;;  %v6892_v33 = vcombine.high %v312_v26, %v316_v27  ;;  %v7146_v63 = vcombine.high %v567_v29, %v571_v30 }
 0x21a   :  { %3846 = vmatpush1.bf16.msra.mxu1 %v6835_v38  ;;  %v579_v38 = vld [vmem:[#allocation2 + $0xd30] sm:$0xff] }
 0x21b   :  { %3847 = vmatprep.subr.bf16.mxu1 %v6844_v40  ;;  %v7145_v40 = vcombine.low %v567_v29, %v571_v30  ;;  %v7154_v42 = vcombine.high %v575_v37, %v579_v38  ;;  %v7153_v50 = vcombine.low %v575_v37, %v579_v38  ;;  %v360_v30 = vld [vmem:[#allocation2 + $0x658] sm:$0xff] }
 0x21c   :  { %3764 = vmatpush1.bf16.msra.mxu0 %v7089_v39  ;;  %v6891_v39 = vcombine.low %v312_v26, %v316_v27  ;;  %v7177_v26 = vcombine.low %v599_v8, %v603_v11  ;;  %v368_v38 = vld [vmem:[#allocation2 + $0x698] sm:$0xff] }
 0x21d   :  { %3765 = vmatprep.subr.bf16.mxu0 %v7098_v41  ;;  %v6900_v41 = vcombine.high %v320_v35, %v324_v36 }
 0x21e   :  { %3848 = vmatpush1.bf16.msra.mxu1 %v6843_v47  ;;  %v8771_v47 = vsub.s32 1, %v8687_v43 }
 0x21f   :  { %3849 = vmatprep.subr.bf16.mxu1 %v6852_v49  ;;  %v587_v49 = vld [vmem:[#allocation2 + $0xd70] sm:$0xff] }
 0x220   :  { %3766 = vmatpush1.bf16.msra.mxu0 %v7097_v48  ;;  %v583_v48 = vld [vmem:[#allocation2 + $0xd50] sm:$0xff] }
 0x221   :  { %3767 = vmatprep.subr.bf16.mxu0 %v7106_v53  ;;  %v6899_v53 = vcombine.low %v320_v35, %v324_v36  ;;  %v7162_v54 = vcombine.high %v583_v48, %v587_v49  ;;  %v7161_v62 = vcombine.low %v583_v48, %v587_v49  ;;  %v376_v49 = vld [vmem:[#allocation2 + $0x6d8] sm:$0xff] }
 0x222   :  { %3850 = vmatpush1.bf16.msra.mxu1 %v6851_v55  ;;  %v336_v55 = vld [vmem:[#allocation2 + $0x598] sm:$0xff] }
 0x223   :  { %3851 = vmatprep.subr.bf16.mxu1 %v6860_v58  ;;  %v678_v58 = vrot.slane %v8768_v46, %v8771_v47 }
 0x224   :  { %3768 = vmatpush1.bf16.msra.mxu0 %v7105_v57  ;;  %v340_v57 = vld [vmem:[#allocation2 + $0x5b8] sm:$0xff] }
 0x225   :  { %3769 = vmatprep.subr.bf16.mxu0 %v7114_v59  ;;  %v591_v59 = vld [vmem:[#allocation2 + $0xd90] sm:$0xff]  ;;  %v6916_v0 = vcombine.high %v336_v55, %v340_v57  ;;  %v3366_v6 = vadd.f32 %v8755_v15, %v678_v58  ;;  %v356_v15 = vld [vmem:[#allocation2 + $0x638] sm:$0xff] }
 0x226   :  { %3852 = vmatpush1.bf16.msra.mxu1 %v6859_v1  ;;  %v384_v58 = vld [vmem:[#allocation2 + $0x718] sm:$0xff] }
 0x227   :  { %3862 = vmatprep.subr.bf16.mxu1 %v6868_v4  ;;  %v344_v4 = vld [vmem:[#allocation2 + $0x5d8] sm:$0xff] }
 0x228   :  { %3770 = vmatpush1.bf16.msra.mxu0 %v7113_v3  ;;  %v7170_v3 = vcombine.high %v591_v59, %v595_v60 }
 0x229   :  { %3780 = vmatprep.subr.bf16.mxu0 %v7122_v5  ;;  %3854 = vmatmul.mubr.bf16.vlgmr.msra.gmra.mrb[8].mxu1 %v8718_v22  ;;  %v6883_v22 = vcombine.low %v304_v18, %v308_v19  ;;  %v348_v5 = vld [vmem:[#allocation2 + $0x5f8] sm:$0xff]  ;;  %v7169_v19 = vcombine.low %v591_v59, %v595_v60  ;;  %v639_v60 = vld [vmem:[#allocation2 + $0xf10] sm:$0xff] }
 0x22a   :  { %3863 = vmatpush1.bf16.msra.mxu1 %v6867_v12  ;;  %3894 = vmatprep.mubr.bf16.mxu1 %v8706_v13  ;;  %v8766_v13 = vsub.s32 0, %v8687_v43  ;;  %v388_v59 = vld [vmem:[#allocation2 + $0x738] sm:$0xff] }
 0x22b   :  { %3772 = vmatmul.mubr.bf16.vlgmr.msra.gmra.mrb[4].mxu0 %v8714_v32  ;;  %3864 = vmatprep.subr.bf16.mxu1 %v6876_v16  ;;  %v6915_v16 = vcombine.low %v336_v55, %v340_v57  ;;  %v6963_v8 = vcombine.low %v384_v58, %v388_v59 }
 0x22c   :  { %3781 = vmatpush1.bf16.msra.mxu0 %v7121_v14  ;;  %3812 = vmatprep.mubr.bf16.mxu0 %v8735_v56  ;;  %v674_v52 = vrot.slane %v8768_v46, %v8766_v13 }
 0x22d   :  { %3782 = vmatprep.subr.bf16.mxu0 %v7130_v17 }
 0x22e   :  { %3865 = vmatpush1.bf16.msra.mxu1 %v6875_v21  ;;  %v3364_v1 = vadd.f32 %v8753_v10, %v674_v52  ;;  %v6924_v10 = vcombine.high %v344_v4, %v348_v5  ;;  %v352_v21 = vld [vmem:[#allocation2 + $0x618] sm:$0xff] }
 0x22f   :  { %3866 = vmatprep.subr.bf16.mxu1 %v6884_v24  ;;  %v611_v24 = vld [vmem:[#allocation2 + $0xe30] sm:$0xff]  ;;  %v6932_v27 = vcombine.high %v352_v21, %v356_v15 }
 0x230   :  { %3783 = vmatpush1.bf16.msra.mxu0 %v7129_v23  ;;  %v607_v23 = vld [vmem:[#allocation2 + $0xe10] sm:$0xff] }
 0x231   :  { %3784 = vmatprep.subr.bf16.mxu0 %v7138_v25  ;;  %v6923_v25 = vcombine.low %v344_v4, %v348_v5  ;;  %v7186_v29 = vcombine.high %v607_v23, %v611_v24  ;;  %v7185_v35 = vcombine.low %v607_v23, %v611_v24  ;;  %v392_v4 = vld [vmem:[#allocation2 + $0x758] sm:$0xff] }
 0x232   :  { %3867 = vmatpush1.bf16.msra.mxu1 %v6883_v22  ;;  %v364_v22 = vld [vmem:[#allocation2 + $0x678] sm:$0xff] }
 0x233   :  { %3868 = vmatprep.subr.bf16.mxu1 %v6892_v33  ;;  %v619_v33 = vld [vmem:[#allocation2 + $0xe70] sm:$0xff]  ;;  %v6940_v36 = vcombine.high %v360_v30, %v364_v22  ;;  %v396_v5 = vld [vmem:[#allocation2 + $0x778] sm:$0xff] }
 0x234   :  { %3785 = vmatpush1.bf16.msra.mxu0 %v7137_v31  ;;  %v615_v31 = vld [vmem:[#allocation2 + $0xe50] sm:$0xff]  ;;  %v408_v24 = vld [vmem:[#allocation2 + $0x7d8] sm:$0xff] }
 0x235   :  { %3786 = vmatprep.subr.bf16.mxu0 %v7146_v63  ;;  %v6931_v63 = vcombine.low %v352_v21, %v356_v15  ;;  %v7194_v37 = vcombine.high %v615_v31, %v619_v33  ;;  %v7193_v44 = vcombine.low %v615_v31, %v619_v33  ;;  %v416_v33 = vld [vmem:[#allocation2 + $0x818] sm:$0xff] }
 0x236   :  { %3869 = vmatpush1.bf16.msra.mxu1 %v6891_v39  ;;  %v372_v39 = vld [vmem:[#allocation2 + $0x6b8] sm:$0xff] }
 0x237   :  { %3870 = vmatprep.subr.bf16.mxu1 %v6900_v41  ;;  %v627_v41 = vld [vmem:[#allocation2 + $0xeb0] sm:$0xff]  ;;  %v6948_v45 = vcombine.high %v368_v38, %v372_v39  ;;  %v6947_v52 = vcombine.low %v368_v38, %v372_v39  ;;  %v7753_v38 = vld [vmem:[#allocation7 + $0x4] ss:$16 sps:$4 sm:$0xff]  }
 0x238   :  { %3787 = vmatpush1.bf16.msra.mxu0 %v7145_v40  ;;  %v623_v40 = vld [vmem:[#allocation2 + $0xe90] sm:$0xff] }
 0x239   :  { %3788 = vmatprep.subr.bf16.mxu0 %v7154_v42  ;;  %v6939_v42 = vcombine.low %v360_v30, %v364_v22  ;;  %v7202_v48 = vcombine.high %v623_v40, %v627_v41 }
 0x23a   :  { %3871 = vmatpush1.bf16.msra.mxu1 %v6899_v53  ;;  %v380_v53 = vld [vmem:[#allocation2 + $0x6f8] sm:$0xff] }
 0x23b   :  { %3872 = vmatprep.subr.bf16.mxu1 %v6908_v51  ;;  %v635_v51 = vld [vmem:[#allocation2 + $0xef0] sm:$0xff]  ;;  %v6956_v55 = vcombine.high %v376_v49, %v380_v53 }
 0x23c   :  { %3789 = vmatpush1.bf16.msra.mxu0 %v7153_v50  ;;  %v631_v50 = vld [vmem:[#allocation2 + $0xed0] sm:$0xff] }
 0x23d   :  { %3790 = vmatprep.subr.bf16.mxu0 %v7162_v54  ;;  %v7201_v54 = vcombine.low %v623_v40, %v627_v41  ;;  %v7210_v57 = vcombine.high %v631_v50, %v635_v51  ;;  %v424_v40 = vld [vmem:[#allocation2 + $0x858] sm:$0xff] }
 0x23e   :  { %v3486_v7 = vpop.f32.mrb[0].mxu0  ;;  %3873 = vmatpush1.bf16.msra.mxu1 %v6907_v61  ;;  %v643_v61 = vld [vmem:[#allocation2 + $0xf30] sm:$0xff]  ;;  %v428_v41 = vld [vmem:[#allocation2 + $0x878] sm:$0xff] }
 0x23f   :  { %v8779_v12 = vadd.f32 %v3486_v7, %v3364_v1  ;;  %v3488_v14 = vpop.f32.mrb[1].mxu0  ;;  %3874 = vmatprep.subr.bf16.mxu1 %v6916_v0  ;;  %v7209_v0 = vcombine.low %v631_v50, %v635_v51  ;;  %v6964_v1 = vcombine.high %v384_v58, %v388_v59  ;;  %v651_v7 = vld [vmem:[#allocation2 + $0xf70] sm:$0xff]  ;;  %v7217_v11 = vcombine.low %v639_v60, %v643_v61  ;;  %v7754_v51 = vld [vmem:[#allocation7 + $0x20] ss:$16 sps:$4 sm:$0xff]  }
 0x240   :  { %v8781_v17 = vadd.f32 %v3488_v14, %v3366_v6  ;;  %v3490_v18 = vpop.f32.mrb[2].mxu0  ;;  %3791 = vmatpush1.bf16.msra.mxu0 %v7161_v62  ;;  %v6955_v62 = vcombine.low %v376_v49, %v380_v53  ;;  %v647_v6 = vld [vmem:[#allocation2 + $0xf50] sm:$0xff]  ;;  %v6972_v14 = vcombine.high %v392_v4, %v396_v5  ;;  %v432_v49 = vld [vmem:[#allocation2 + $0x898] sm:$0xff] }
 0x241   :  { %v3491_v20 = vpop.f32.mrb[3].mxu0  ;;  %3792 = vmatprep.subr.bf16.mxu0 %v7170_v3  ;;  %v7218_v3 = vcombine.high %v639_v60, %v643_v61  ;;  %v400_v18 = vld [vmem:[#allocation2 + $0x798] sm:$0xff]  ;;  %v7225_v21 = vcombine.low %v647_v6, %v651_v7 }
 0x242   :  { %3875 = vmatpush1.bf16.msra.mxu1 %v6915_v16  ;;  %v7226_v16 = vcombine.high %v647_v6, %v651_v7  ;;  %v659_v20 = vld [vmem:[#allocation2 + $0xfb0] sm:$0xff]  ;;  %v3986_v39 = vmax.f32 %v8781_v17, 0.0  ;;  %v436_v53 = vld [vmem:[#allocation2 + $0x8b8] sm:$0xff]  ;;  %v7003_v17 = vcombine.low %v424_v40, %v428_v41 }
 0x243   :  { %3876 = vmatprep.subr.bf16.mxu1 %v6924_v10  ;;  %v655_v10 = vld [vmem:[#allocation2 + $0xf90] sm:$0xff]  ;;  %v7011_v58 = vcombine.low %v432_v49, %v436_v53  ;;  %v7762_v60 = vld [vmem:[#allocation7 + $0x64] ss:$16 sps:$4 sm:$0xff]   ;;  %v7763_v7 = vld [vmem:[#allocation7 + $0x80] ss:$16 sps:$4 sm:$0xff]  }
 0x244   :  { %3793 = vmatpush1.bf16.msra.mxu0 %v7169_v19  ;;  %v404_v19 = vld [vmem:[#allocation2 + $0x7b8] sm:$0xff]  ;;  %v7234_v23 = vcombine.high %v655_v10, %v659_v20  ;;  %v7233_v30 = vcombine.low %v655_v10, %v659_v20  ;;  %v8784_v50 = vpack.c.bf16 %v3986_v39, %v3986_v39 }
 0x245   :  { %3794 = vmatprep.subr.bf16.mxu0 %v7178_v9  ;;  %v6971_v9 = vcombine.low %v392_v4, %v396_v5  ;;  %v6980_v15 = vcombine.high %v400_v18, %v404_v19  ;;  %v448_v61 = vld [vmem:[#allocation2 + $0x918] sm:$0xff] }
 0x246   :  { %3877 = vmatpush1.bf16.msra.mxu1 %v6923_v25  ;;  %v412_v25 = vld [vmem:[#allocation2 + $0x7f8] sm:$0xff] }
 0x247   :  { %3878 = vmatprep.subr.bf16.mxu1 %v6932_v27  ;;  %v667_v27 = vld [vmem:[#allocation2 + $0xff0] sm:$0xff]  ;;  %v6988_v22 = vcombine.high %v408_v24, %v412_v25  ;;  %v7765_v4 = vld [vmem:[#allocation7 + $0x84] ss:$16 sps:$4 sm:$0xff]  }
 0x248   :  { %3795 = vmatpush1.bf16.msra.mxu0 %v7177_v26  ;;  %v663_v26 = vld [vmem:[#allocation2 + $0xfd0] sm:$0xff]  ;;  %v456_v5 = vld [vmem:[#allocation2 + $0x958] sm:$0xff] }
 0x249   :  { %3796 = vmatprep.subr.bf16.mxu0 %v7186_v29  ;;  %v6979_v29 = vcombine.low %v400_v18, %v404_v19  ;;  %v7242_v31 = vcombine.high %v663_v26, %v667_v27  ;;  %v7766_v19 = vld [vmem:[#allocation7 + $0xa0] ss:$16 sps:$4 sm:$0xff]   ;;  %v7771_v20 = vld [vmem:[#allocation7 + $0xc4] ss:$16 sps:$4 sm:$0xff]  }
 0x24a   :  { %3879 = vmatpush1.bf16.msra.mxu1 %v6931_v63  ;;  %v420_v63 = vld [vmem:[#allocation2 + $0x838] sm:$0xff] }
 0x24b   :  { %3880 = vmatprep.subr.bf16.mxu1 %v6940_v36  ;;  %v7241_v36 = vcombine.low %v663_v26, %v667_v27  ;;  %v480_v26 = vld [vmem:[#allocation2 + $0xa18] sm:$0xff] }
 0x24c   :  { %3797 = vmatpush1.bf16.msra.mxu0 %v7185_v35  ;;  %v6987_v35 = vcombine.low %v408_v24, %v412_v25  ;;  %v7774_v25 = vld [vmem:[#allocation7 + $0xe4] ss:$16 sps:$4 sm:$0xff]  }
 0x24d   :  { %3798 = vmatprep.subr.bf16.mxu0 %v7194_v37  ;;  %v6996_v37 = vcombine.high %v416_v33, %v420_v63  ;;  %v484_v27 = vld [vmem:[#allocation2 + $0xa38] sm:$0xff] }
 0x24e   :  { %3881 = vmatpush1.bf16.msra.mxu1 %v6939_v42  ;;  %v6995_v42 = vcombine.low %v416_v33, %v420_v63  ;;  %v488_v33 = vld [vmem:[#allocation2 + $0xa58] sm:$0xff] }
 0x24f   :  { %3882 = vmatprep.subr.bf16.mxu1 %v6948_v45  ;;  %v7004_v45 = vcombine.high %v424_v40, %v428_v41  ;;  %v492_v63 = vld [vmem:[#allocation2 + $0xa78] sm:$0xff] }
 0x250   :  { %3799 = vmatpush1.bf16.msra.mxu0 %v7193_v44  ;;  %v7751_v44 = vld [vmem:[#allocation7] ss:$16 sps:$4 sm:$0xff]   ;;  %v7067_v41 = vcombine.low %v488_v33, %v492_v63 }
 0x251   :  { %3800 = vmatprep.subr.bf16.mxu0 %v7202_v48  ;;  %v7756_v48 = vld [vmem:[#allocation7 + $0x24] ss:$16 sps:$4 sm:$0xff]  }
 0x252   :  { %3883 = vmatpush1.bf16.msra.mxu1 %v6947_v52  ;;  %v7012_v52 = vcombine.high %v432_v49, %v436_v53  ;;  %v496_v39 = vld [vmem:[#allocation2 + $0xa98] sm:$0xff] }
 0x253   :  { %3884 = vmatprep.subr.bf16.mxu1 %v6956_v55  ;;  %v440_v55 = vld [vmem:[#allocation2 + $0x8d8] sm:$0xff] }
 0x254   :  { %3801 = vmatpush1.bf16.msra.mxu0 %v7201_v54  ;;  %v7759_v54 = vld [vmem:[#allocation7 + $0x44] ss:$16 sps:$4 sm:$0xff]  }
 0x255   :  { %3802 = vmatprep.subr.bf16.mxu0 %v7210_v57  ;;  %v444_v57 = vld [vmem:[#allocation2 + $0x8f8] sm:$0xff] }
 0x256   :  { %3885 = vmatpush1.bf16.msra.mxu1 %v6955_v62  ;;  %v7020_v59 = vcombine.high %v440_v55, %v444_v57  ;;  %v452_v62 = vld [vmem:[#allocation2 + $0x938] sm:$0xff] }
 0x257   :  { %3886 = vmatprep.subr.bf16.mxu1 %v6964_v1  ;;  %v7760_v1 = vld [vmem:[#allocation7 + $0x60] ss:$16 sps:$4 sm:$0xff]   ;;  %v7027_v6 = vcombine.low %v448_v61, %v452_v62 }
 0x258   :  { %3803 = vmatpush1.bf16.msra.mxu0 %v7209_v0  ;;  %v7019_v0 = vcombine.low %v440_v55, %v444_v57  ;;  %v500_v40 = vld [vmem:[#allocation2 + $0xab8] sm:$0xff] }
 0x259   :  { %3804 = vmatprep.subr.bf16.mxu0 %v7218_v3  ;;  %v7028_v3 = vcombine.high %v448_v61, %v452_v62  ;;  %v508_v49 = vld [vmem:[#allocation2 + $0xaf8] sm:$0xff]  ;;  %v7075_v53 = vcombine.low %v496_v39, %v500_v40 }
 0x25a   :  { %3887 = vmatpush1.bf16.msra.mxu1 %v6963_v8  ;;  %v516_v55 = vld [vmem:[#allocation2 + $0xb38] sm:$0xff] }
 0x25b   :  { %3888 = vmatprep.subr.bf16.mxu1 %v6972_v14  ;;  %v464_v14 = vld [vmem:[#allocation2 + $0x998] sm:$0xff] }
 0x25c   :  { %3805 = vmatpush1.bf16.msra.mxu0 %v7217_v11  ;;  %v7768_v11 = vld [vmem:[#allocation7 + $0xa4] ss:$16 sps:$4 sm:$0xff]  }
 0x25d   :  { %3806 = vmatprep.subr.bf16.mxu0 %v7226_v16  ;;  %v468_v16 = vld [vmem:[#allocation2 + $0x9b8] sm:$0xff] }
 0x25e   :  { %3889 = vmatpush1.bf16.msra.mxu1 %v6971_v9  ;;  %v7044_v10 = vcombine.high %v464_v14, %v468_v16  ;;  %v472_v9 = vld [vmem:[#allocation2 + $0x9d8] sm:$0xff] }
 0x25f   :  { %3890 = vmatprep.subr.bf16.mxu1 %v6980_v15  ;;  %v7043_v15 = vcombine.low %v464_v14, %v468_v16  ;;  %v524_v61 = vld [vmem:[#allocation2 + $0xb78] sm:$0xff] }
 0x260   :  { %3807 = vmatpush1.bf16.msra.mxu0 %v7225_v21  ;;  %v476_v21 = vld [vmem:[#allocation2 + $0x9f8] sm:$0xff] }
 0x261   :  { %3808 = vmatprep.subr.bf16.mxu0 %v7234_v23  ;;  %v7769_v23 = vld [vmem:[#allocation7 + $0xc0] ss:$16 sps:$4 sm:$0xff]   ;;  %v7052_v24 = vcombine.high %v472_v9, %v476_v21 }
 0x262   :  { %3891 = vmatpush1.bf16.msra.mxu1 %v6979_v29  ;;  %v7051_v29 = vcombine.low %v472_v9, %v476_v21  ;;  %v540_v14 = vld [vmem:[#allocation2 + $0xbf8] sm:$0xff] }
 0x263   :  { %3892 = vmatprep.subr.bf16.mxu1 %v6988_v22  ;;  %v7060_v22 = vcombine.high %v480_v26, %v484_v27  ;;  %v548_v9 = vld [vmem:[#allocation2 + $0xc38] sm:$0xff] }
 0x264   :  { %3809 = vmatpush1.bf16.msra.mxu0 %v7233_v30  ;;  %v7772_v30 = vld [vmem:[#allocation7 + $0xe0] ss:$16 sps:$4 sm:$0xff]  }
 0x265   :  { %3810 = vmatprep.subr.bf16.mxu0 %v7242_v31  ;;  %v7777_v31 = vld [vmem:[#allocation7 + $0x104] ss:$16 sps:$4 sm:$0xff]  }
 0x266   :  { %3893 = vmatpush1.bf16.msra.mxu1 %v6987_v35  ;;  %v7059_v35 = vcombine.low %v480_v26, %v484_v27  ;;  %v552_v26 = vld [vmem:[#allocation2 + $0xc58] sm:$0xff] }
 0x267   :  { %3903 = vmatprep.subr.bf16.mxu1 %v6996_v37  ;;  %v7068_v37 = vcombine.high %v488_v33, %v492_v63  ;;  %v556_v27 = vld [vmem:[#allocation2 + $0xc78] sm:$0xff] }
 0x268   :  { %3811 = vmatpush1.bf16.msra.mxu0 %v7241_v36  ;;  %v7775_v36 = vld [vmem:[#allocation7 + $0x100] ss:$16 sps:$4 sm:$0xff]   ;;  %v7804_v33 = vld [vmem:[#allocation7 + $0x224] ss:$16 sps:$4 sm:$0xff]  }
 0x269   :  { %5559 = vmatprep.subr.bf16.mxu0 %v7753_v38  ;;  %3895 = vmatmul.mubr.bf16.vlgmr.msra.gmra.mrb[8].mxu1 %v8724_v34  ;;  %v7757_v34 = vld [vmem:[#allocation7 + $0x40] ss:$16 sps:$4 sm:$0xff]   ;;  %v7780_v38 = vld [vmem:[#allocation7 + $0x124] ss:$16 sps:$4 sm:$0xff]  }
 0x26a   :  { %3904 = vmatpush1.bf16.msra.mxu1 %v6995_v42  ;;  %3935 = vmatprep.mubr.bf16.mxu1 %v8727_v28  ;;  %v460_v28 = vld [vmem:[#allocation2 + $0x978] sm:$0xff] }
 0x26b   :  { %3813 = vmatmul.mubr.bf16.vlgmr.msra.gmra.mrb[4].mxu0 %v8743_v2  ;;  %3905 = vmatprep.subr.bf16.mxu1 %v7004_v45  ;;  %v7036_v8 = vcombine.high %v456_v5, %v460_v28  ;;  %v7035_v18 = vcombine.low %v456_v5, %v460_v28  ;;  %v7778_v42 = vld [vmem:[#allocation7 + $0x120] ss:$16 sps:$4 sm:$0xff]   ;;  %v7783_v45 = vld [vmem:[#allocation7 + $0x144] ss:$16 sps:$4 sm:$0xff]  }
 0x26c   :  { %5560 = vmatpush1.bf16.msra.mxu0 %v7751_v44  ;;  %5591 = vmatprep.mubr.bf16.mxu0 %v8784_v50  ;;  %v7076_v44 = vcombine.high %v496_v39, %v500_v40  ;;  %v532_v5 = vld [vmem:[#allocation2 + $0xbb8] sm:$0xff] }
 0x26d   :  { %5561 = vmatprep.subr.bf16.mxu0 %v7756_v48  ;;  %v504_v48 = vld [vmem:[#allocation2 + $0xad8] sm:$0xff] }
 0x26e   :  { %3906 = vmatpush1.bf16.msra.mxu1 %v7003_v17  ;;  %v7781_v17 = vld [vmem:[#allocation7 + $0x140] ss:$16 sps:$4 sm:$0xff]   ;;  %v7083_v57 = vcombine.low %v504_v48, %v508_v49 }
 0x26f   :  { %3907 = vmatprep.subr.bf16.mxu1 %v7012_v52  ;;  %v7786_v52 = vld [vmem:[#allocation7 + $0x164] ss:$16 sps:$4 sm:$0xff]  }
 0x270   :  { %5562 = vmatpush1.bf16.msra.mxu0 %v7754_v51  ;;  %v7084_v51 = vcombine.high %v504_v48, %v508_v49  ;;  %v560_v63 = vld [vmem:[#allocation2 + $0xc98] sm:$0xff] }
 0x271   :  { %5563 = vmatprep.subr.bf16.mxu0 %v7759_v54  ;;  %v512_v54 = vld [vmem:[#allocation2 + $0xb18] sm:$0xff] }
 0x272   :  { %3908 = vmatpush1.bf16.msra.mxu1 %v7011_v58  ;;  %v7784_v58 = vld [vmem:[#allocation7 + $0x160] ss:$16 sps:$4 sm:$0xff]   ;;  %v7091_v62 = vcombine.low %v512_v54, %v516_v55 }
 0x273   :  { %3909 = vmatprep.subr.bf16.mxu1 %v7020_v59  ;;  %v7789_v59 = vld [vmem:[#allocation7 + $0x184] ss:$16 sps:$4 sm:$0xff]  }
 0x274   :  { %5564 = vmatpush1.bf16.msra.mxu0 %v7757_v34  ;;  %v7092_v34 = vcombine.high %v512_v54, %v516_v55  ;;  %v568_v39 = vld [vmem:[#allocation2 + $0xcd8] sm:$0xff]  ;;  %v685_v55 = vsub.s32 3, %v8687_v43 }
 0x275   :  { %5565 = vmatprep.subr.bf16.mxu0 %v7762_v60  ;;  %v520_v60 = vld [vmem:[#allocation2 + $0xb58] sm:$0xff] }
 0x276   :  { %3910 = vmatpush1.bf16.msra.mxu1 %v7019_v0  ;;  %v7787_v0 = vld [vmem:[#allocation7 + $0x180] ss:$16 sps:$4 sm:$0xff]   ;;  %v7099_v28 = vcombine.low %v520_v60, %v524_v61 }
 0x277   :  { %3911 = vmatprep.subr.bf16.mxu1 %v7028_v3  ;;  %v7792_v3 = vld [vmem:[#allocation7 + $0x1a4] ss:$16 sps:$4 sm:$0xff]  }
 0x278   :  { %5566 = vmatpush1.bf16.msra.mxu0 %v7760_v1  ;;  %v7100_v1 = vcombine.high %v520_v60, %v524_v61  ;;  %v572_v40 = vld [vmem:[#allocation2 + $0xcf8] sm:$0xff]  ;;  %v686_v61 = vrot.slane %v8768_v46, %v685_v55 }
 0x279   :  { %5567 = vmatprep.subr.bf16.mxu0 %v7765_v4  ;;  %v528_v4 = vld [vmem:[#allocation2 + $0xb98] sm:$0xff]  ;;  %v7147_v49 = vcombine.low %v568_v39, %v572_v40 }
 0x27a   :  { %3912 = vmatpush1.bf16.msra.mxu1 %v7027_v6  ;;  %v7790_v6 = vld [vmem:[#allocation7 + $0x1a0] ss:$16 sps:$4 sm:$0xff]   ;;  %v7107_v16 = vcombine.low %v528_v4, %v532_v5 }
 0x27b   :  { %3913 = vmatprep.subr.bf16.mxu1 %v7036_v8  ;;  %v7795_v8 = vld [vmem:[#allocation7 + $0x1c4] ss:$16 sps:$4 sm:$0xff]  }
 0x27c   :  { %5568 = vmatpush1.bf16.msra.mxu0 %v7763_v7  ;;  %v7108_v7 = vcombine.high %v528_v4, %v532_v5  ;;  %v580_v48 = vld [vmem:[#allocation2 + $0xd38] sm:$0xff] }
 0x27d   :  { %5569 = vmatprep.subr.bf16.mxu0 %v7768_v11  ;;  %v536_v11 = vld [vmem:[#allocation2 + $0xbd8] sm:$0xff] }
 0x27e   :  { %3914 = vmatpush1.bf16.msra.mxu1 %v7035_v18  ;;  %v7793_v18 = vld [vmem:[#allocation7 + $0x1c0] ss:$16 sps:$4 sm:$0xff]   ;;  %v7115_v21 = vcombine.low %v536_v11, %v540_v14  ;;  %v7819_v4 = vld [vmem:[#allocation7 + $0x2c4] ss:$16 sps:$4 sm:$0xff]  }
 0x27f   :  { %3915 = vmatprep.subr.bf16.mxu1 %v7044_v10  ;;  %v7798_v10 = vld [vmem:[#allocation7 + $0x1e4] ss:$16 sps:$4 sm:$0xff]  }
 0x280   :  { %5570 = vmatpush1.bf16.msra.mxu0 %v7766_v19  ;;  %v7116_v19 = vcombine.high %v536_v11, %v540_v14  ;;  %v596_v60 = vld [vmem:[#allocation2 + $0xdb8] sm:$0xff] }
 0x281   :  { %5571 = vmatprep.subr.bf16.mxu0 %v7771_v20  ;;  %v544_v20 = vld [vmem:[#allocation2 + $0xc18] sm:$0xff] }
 0x282   :  { %3916 = vmatpush1.bf16.msra.mxu1 %v7043_v15  ;;  %v7796_v15 = vld [vmem:[#allocation7 + $0x1e0] ss:$16 sps:$4 sm:$0xff]  }
 0x283   :  { %3917 = vmatprep.subr.bf16.mxu1 %v7052_v24  ;;  %v3985_v24 = vmax.f32 %v8779_v12, 0.0  ;;  %v7131_v12 = vcombine.low %v552_v26, %v556_v27  ;;  %v600_v5 = vld [vmem:[#allocation2 + $0xdd8] sm:$0xff] }
 0x284   :  { %5572 = vmatpush1.bf16.msra.mxu0 %v7769_v23  ;;  %v7124_v23 = vcombine.high %v544_v20, %v548_v9 }
 0x285   :  { %5573 = vmatprep.subr.bf16.mxu0 %v7774_v25  ;;  %v7801_v25 = vld [vmem:[#allocation7 + $0x204] ss:$16 sps:$4 sm:$0xff]  }
 0x286   :  { %3918 = vmatpush1.bf16.msra.mxu1 %v7051_v29  ;;  %v7123_v29 = vcombine.low %v544_v20, %v548_v9  ;;  %v608_v20 = vld [vmem:[#allocation2 + $0xe18] sm:$0xff] }
 0x287   :  { %3919 = vmatprep.subr.bf16.mxu1 %v7060_v22  ;;  %v7132_v22 = vcombine.high %v552_v26, %v556_v27  ;;  %v612_v9 = vld [vmem:[#allocation2 + $0xe38] sm:$0xff] }
 0x288   :  { %5574 = vmatpush1.bf16.msra.mxu0 %v7772_v30  ;;  %v7799_v30 = vld [vmem:[#allocation7 + $0x200] ss:$16 sps:$4 sm:$0xff]  }
 0x289   :  { %5575 = vmatprep.subr.bf16.mxu0 %v7777_v31  ;;  %v8791_v31 = vpack.c.bf16 %v3985_v24, %v3985_v24  ;;  %v7188_v24 = vcombine.high %v608_v20, %v612_v9  ;;  %v616_v26 = vld [vmem:[#allocation2 + $0xe58] sm:$0xff] }
 0x28a   :  { %3920 = vmatpush1.bf16.msra.mxu1 %v7059_v35  ;;  %v564_v35 = vld [vmem:[#allocation2 + $0xcb8] sm:$0xff] }
 0x28b   :  { %3921 = vmatprep.subr.bf16.mxu1 %v7068_v37  ;;  %v7140_v37 = vcombine.high %v560_v63, %v564_v35  ;;  %v620_v27 = vld [vmem:[#allocation2 + $0xe78] sm:$0xff] }
 0x28c   :  { %5576 = vmatpush1.bf16.msra.mxu0 %v7775_v36  ;;  %v7802_v36 = vld [vmem:[#allocation7 + $0x220] ss:$16 sps:$4 sm:$0xff]  }
 0x28d   :  { %5577 = vmatprep.subr.bf16.mxu0 %v7780_v38  ;;  %v7807_v38 = vld [vmem:[#allocation7 + $0x244] ss:$16 sps:$4 sm:$0xff]  }
 0x28e   :  { %3922 = vmatpush1.bf16.msra.mxu1 %v7067_v41  ;;  %v7139_v41 = vcombine.low %v560_v63, %v564_v35  ;;  %v624_v63 = vld [vmem:[#allocation2 + $0xe98] sm:$0xff] }
 0x28f   :  { %3923 = vmatprep.subr.bf16.mxu1 %v7076_v44  ;;  %v7810_v44 = vld [vmem:[#allocation7 + $0x264] ss:$16 sps:$4 sm:$0xff]  }
 0x290   :  { %5578 = vmatpush1.bf16.msra.mxu0 %v7778_v42  ;;  %v7805_v42 = vld [vmem:[#allocation7 + $0x240] ss:$16 sps:$4 sm:$0xff]  }
 0x291   :  { %5579 = vmatprep.subr.bf16.mxu0 %v7783_v45  ;;  %v576_v45 = vld [vmem:[#allocation2 + $0xd18] sm:$0xff] }
 0x292   :  { %3924 = vmatpush1.bf16.msra.mxu1 %v7075_v53  ;;  %v7808_v53 = vld [vmem:[#allocation7 + $0x260] ss:$16 sps:$4 sm:$0xff]   ;;  %v7155_v54 = vcombine.low %v576_v45, %v580_v48 }
 0x293   :  { %3925 = vmatprep.subr.bf16.mxu1 %v7084_v51  ;;  %v7813_v51 = vld [vmem:[#allocation7 + $0x284] ss:$16 sps:$4 sm:$0xff]  }
 0x294   :  { %5580 = vmatpush1.bf16.msra.mxu0 %v7781_v17  ;;  %v7156_v17 = vcombine.high %v576_v45, %v580_v48  ;;  %v628_v35 = vld [vmem:[#allocation2 + $0xeb8] sm:$0xff] }
 0x295   :  { %5581 = vmatprep.subr.bf16.mxu0 %v7786_v52  ;;  %v584_v52 = vld [vmem:[#allocation2 + $0xd58] sm:$0xff] }
 0x296   :  { %3926 = vmatpush1.bf16.msra.mxu1 %v7083_v57  ;;  %v7811_v57 = vld [vmem:[#allocation7 + $0x280] ss:$16 sps:$4 sm:$0xff]  }
 0x297   :  { %3927 = vmatprep.subr.bf16.mxu1 %v7092_v34  ;;  %v7816_v34 = vld [vmem:[#allocation7 + $0x2a4] ss:$16 sps:$4 sm:$0xff]  }
 0x298   :  { %5582 = vmatpush1.bf16.msra.mxu0 %v7784_v58  ;;  %v640_v45 = vld [vmem:[#allocation2 + $0xf18] sm:$0xff] }
 0x299   :  { %5583 = vmatprep.subr.bf16.mxu0 %v7789_v59  ;;  %v592_v59 = vld [vmem:[#allocation2 + $0xd98] sm:$0xff] }
 0x29a   :  { %3928 = vmatpush1.bf16.msra.mxu1 %v7091_v62  ;;  %v7171_v11 = vcombine.low %v592_v59, %v596_v60  ;;  %v644_v48 = vld [vmem:[#allocation2 + $0xf38] sm:$0xff] }
 0x29b   :  { %3929 = vmatprep.subr.bf16.mxu1 %v7100_v1  ;;  %v7172_v1 = vcombine.high %v592_v59, %v596_v60  ;;  %v7840_v59 = vld [vmem:[#allocation7 + $0x3a4] ss:$16 sps:$4 sm:$0xff]  }
 0x29c   :  { %5584 = vmatpush1.bf16.msra.mxu0 %v7787_v0  ;;  %v7814_v0 = vld [vmem:[#allocation7 + $0x2a0] ss:$16 sps:$4 sm:$0xff]  }
 0x29d   :  { %5585 = vmatprep.subr.bf16.mxu0 %v7792_v3  ;;  %v656_v60 = vld [vmem:[#allocation2 + $0xf98] sm:$0xff] }
 0x29e   :  { %3930 = vmatpush1.bf16.msra.mxu1 %v7099_v28  ;;  %v604_v28 = vld [vmem:[#allocation2 + $0xdf8] sm:$0xff] }
 0x29f   :  { %3931 = vmatprep.subr.bf16.mxu1 %v7108_v7 }
 0x2a0   :  { %5586 = vmatpush1.bf16.msra.mxu0 %v7790_v6 }
 0x2a1   :  { %5587 = vmatprep.subr.bf16.mxu0 %v7795_v8 }
 0x2a2   :  { %3932 = vmatpush1.bf16.msra.mxu1 %v7107_v16  ;;  %v7817_v16 = vld [vmem:[#allocation7 + $0x2c0] ss:$16 sps:$4 sm:$0xff]  }
 0x2a3   :  { %3933 = vmatprep.subr.bf16.mxu1 %v7116_v19 }
 0x2a4   :  { %5588 = vmatpush1.bf16.msra.mxu0 %v7793_v18  ;;  %v7180_v18 = vcombine.high %v600_v5, %v604_v28 }
 0x2a5   :  { %5589 = vmatprep.subr.bf16.mxu0 %v7798_v10  ;;  %v7822_v10 = vld [vmem:[#allocation7 + $0x2e4] ss:$16 sps:$4 sm:$0xff]  }
 0x2a6   :  { %3934 = vmatpush1.bf16.msra.mxu1 %v7115_v21 }
 0x2a7   :  { %3944 = vmatprep.subr.bf16.mxu1 %v7124_v23  ;;  %v7820_v23 = vld [vmem:[#allocation7 + $0x2e0] ss:$16 sps:$4 sm:$0xff]  }
 0x2a8   :  { %5590 = vmatpush1.bf16.msra.mxu0 %v7796_v15  ;;  %v7179_v15 = vcombine.low %v600_v5, %v604_v28  ;;  %v7843_v5 = vld [vmem:[#allocation7 + $0x3c4] ss:$16 sps:$4 sm:$0xff]  }
 0x2a9   :  { %5600 = vmatprep.subr.bf16.mxu0 %v7801_v25  ;;  %3936 = vmatmul.mubr.bf16.vlgmr.msra.gmra.mrb[8].mxu1 %v8714_v32  ;;  %v7148_v32 = vcombine.high %v568_v39, %v572_v40  ;;  %v7825_v25 = vld [vmem:[#allocation7 + $0x304] ss:$16 sps:$4 sm:$0xff]  }
 0x2aa   :  { %3945 = vmatpush1.bf16.msra.mxu1 %v7123_v29  ;;  %3976 = vmatprep.mubr.bf16.mxu1 %v8735_v56  ;;  %v588_v56 = vld [vmem:[#allocation2 + $0xd78] sm:$0xff]  ;;  %v7187_v29 = vcombine.low %v608_v20, %v612_v9  ;;  %v7847_v9 = vld [vmem:[#allocation7 + $0x8] ss:$16 sps:$4 sm:$0xff]  }
 0x2ab   :  { %5592 = vmatmul.mubr.bf16.vlgmr.msra.gmra.mrb[8].mxu0 %v8791_v31  ;;  %3946 = vmatprep.subr.bf16.mxu1 %v7132_v22  ;;  %v7164_v58 = vcombine.high %v584_v52, %v588_v56  ;;  %v7163_v62 = vcombine.low %v584_v52, %v588_v56  ;;  %v7196_v22 = vcombine.high %v616_v26, %v620_v27  ;;  %v632_v39 = vld [vmem:[#allocation2 + $0xed8] sm:$0xff] }
 0x2ac   :  { %5601 = vmatpush1.bf16.msra.mxu0 %v7799_v30  ;;  %v7823_v30 = vld [vmem:[#allocation7 + $0x300] ss:$16 sps:$4 sm:$0xff]   ;;  %v7870_v20 = vld [vmem:[#allocation7 + $0x404] ss:$16 sps:$4 sm:$0xff]  }
 0x2ad   :  { %5602 = vmatprep.subr.bf16.mxu0 %v7804_v33  ;;  %v7828_v33 = vld [vmem:[#allocation7 + $0x324] ss:$16 sps:$4 sm:$0xff]  }
 0x2ae   :  { %3947 = vmatpush1.bf16.msra.mxu1 %v7131_v12  ;;  %v7195_v12 = vcombine.low %v616_v26, %v620_v27  ;;  %v636_v40 = vld [vmem:[#allocation2 + $0xef8] sm:$0xff]  ;;  %v7855_v26 = vld [vmem:[#allocation7 + $0x4c] ss:$16 sps:$4 sm:$0xff]  }
 0x2af   :  { %3948 = vmatprep.subr.bf16.mxu1 %v7140_v37  ;;  %v7204_v37 = vcombine.high %v624_v63, %v628_v35  ;;  %v648_v52 = vld [vmem:[#allocation2 + $0xf58] sm:$0xff] }
 0x2b0   :  { %5603 = vmatpush1.bf16.msra.mxu0 %v7802_v36  ;;  %v7826_v36 = vld [vmem:[#allocation7 + $0x320] ss:$16 sps:$4 sm:$0xff]  }
 0x2b1   :  { %5604 = vmatprep.subr.bf16.mxu0 %v7807_v38  ;;  %v7831_v38 = vld [vmem:[#allocation7 + $0x344] ss:$16 sps:$4 sm:$0xff]   ;;  %v7874_v27 = vld [vmem:[#allocation7 + $0x420] ss:$16 sps:$4 sm:$0xff]  }
 0x2b2   :  { %3949 = vmatpush1.bf16.msra.mxu1 %v7139_v41  ;;  %v7203_v41 = vcombine.low %v624_v63, %v628_v35  ;;  %v652_v56 = vld [vmem:[#allocation2 + $0xf78] sm:$0xff]  ;;  %v7856_v63 = vld [vmem:[#allocation7 + $0x68] ss:$16 sps:$4 sm:$0xff]   ;;  %v7861_v35 = vld [vmem:[#allocation7 + $0x8c] ss:$16 sps:$4 sm:$0xff]  }
 0x2b3   :  { %3950 = vmatprep.subr.bf16.mxu1 %v7148_v32  ;;  %v7212_v32 = vcombine.high %v632_v39, %v636_v40  ;;  %v664_v28 = vld [vmem:[#allocation2 + $0xfd8] sm:$0xff] }
 0x2b4   :  { %5605 = vmatpush1.bf16.msra.mxu0 %v7805_v42  ;;  %v7829_v42 = vld [vmem:[#allocation7 + $0x340] ss:$16 sps:$4 sm:$0xff]  }
 0x2b5   :  { %5606 = vmatprep.subr.bf16.mxu0 %v7810_v44  ;;  %v7834_v44 = vld [vmem:[#allocation7 + $0x364] ss:$16 sps:$4 sm:$0xff]  }
 0x2b6   :  { %3951 = vmatpush1.bf16.msra.mxu1 %v7147_v49  ;;  %v7211_v49 = vcombine.low %v632_v39, %v636_v40  ;;  %v7900_v39 = vld [vmem:[#allocation7 + $0x4a4] ss:$16 sps:$4 sm:$0xff]   ;;  %v7862_v40 = vld [vmem:[#allocation7 + $0xa8] ss:$16 sps:$4 sm:$0xff]  }
 0x2b7   :  { %3952 = vmatprep.subr.bf16.mxu1 %v7156_v17  ;;  %v7220_v17 = vcombine.high %v640_v45, %v644_v48 }
 0x2b8   :  { %5607 = vmatpush1.bf16.msra.mxu0 %v7808_v53  ;;  %v7832_v53 = vld [vmem:[#allocation7 + $0x360] ss:$16 sps:$4 sm:$0xff]  }
 0x2b9   :  { %5608 = vmatprep.subr.bf16.mxu0 %v7813_v51  ;;  %v7837_v51 = vld [vmem:[#allocation7 + $0x384] ss:$16 sps:$4 sm:$0xff]  }
 0x2ba   :  { %3953 = vmatpush1.bf16.msra.mxu1 %v7155_v54  ;;  %v7219_v54 = vcombine.low %v640_v45, %v644_v48  ;;  %v7873_v45 = vld [vmem:[#allocation7 + $0xec] ss:$16 sps:$4 sm:$0xff]   ;;  %v7904_v48 = vld [vmem:[#allocation7 + $0x4c0] ss:$16 sps:$4 sm:$0xff]  }
 0x2bb   :  { %3954 = vmatprep.subr.bf16.mxu1 %v7164_v58  ;;  %v7228_v58 = vcombine.high %v648_v52, %v652_v56 }
 0x2bc   :  { %5609 = vmatpush1.bf16.msra.mxu0 %v7811_v57  ;;  %v8800_v3 = vpop.f32.mrb[4].mxu1  ;;  %v7835_v57 = vld [vmem:[#allocation7 + $0x380] ss:$16 sps:$4 sm:$0xff]  }
 0x2bd   :  { %5610 = vmatprep.subr.bf16.mxu0 %v7816_v34  ;;  %v3652_v6 = vpop.f32.mrb[5].mxu1  ;;  %v681_v34 = vsub.s32 2, %v8687_v43 }
 0x2be   :  { %v7648_v7 = vadd.f32 %v3652_v6, %v686_v61  ;;  %v3654_v8 = vpop.f32.mrb[6].mxu1  ;;  %3955 = vmatpush1.bf16.msra.mxu1 %v7163_v62  ;;  %v660_v61 = vld [vmem:[#allocation2 + $0xfb8] sm:$0xff]  ;;  %v7227_v62 = vcombine.low %v648_v52, %v652_v56  ;;  %v7877_v56 = vld [vmem:[#allocation7 + $0x108] ss:$16 sps:$4 sm:$0xff]  }
 0x2bf   :  { %v3655_v14 = vpop.f32.mrb[7].mxu1  ;;  %3956 = vmatprep.subr.bf16.mxu1 %v7172_v1  ;;  %v7236_v1 = vcombine.high %v656_v60, %v660_v61  ;;  %v668_v6 = vld [vmem:[#allocation2 + $0xff8] sm:$0xff] }
 0x2c0   :  { %5611 = vmatpush1.bf16.msra.mxu0 %v7814_v0  ;;  %v3988_v19 = vmax.f32 %v7648_v7, 0.0  ;;  %v7838_v0 = vld [vmem:[#allocation7 + $0x3a0] ss:$16 sps:$4 sm:$0xff]   ;;  %v7235_v7 = vcombine.low %v656_v60, %v660_v61  ;;  %v7918_v52 = vld [vmem:[#allocation7 + $0x504] ss:$16 sps:$4 sm:$0xff]  }
 0x2c1   :  { %5612 = vmatprep.subr.bf16.mxu0 %v7819_v4  ;;  %v682_v4 = vrot.slane %v8768_v46, %v681_v34  ;;  %v7841_v8 = vld [vmem:[#allocation7 + $0x3c0] ss:$16 sps:$4 sm:$0xff]   ;;  %v7849_v46 = vld [vmem:[#allocation7 + $0xc] ss:$16 sps:$4 sm:$0xff]  }
 0x2c2   :  { %v8802_v21 = vpack.c.bf16 %v3988_v19, %v3988_v19  ;;  %3957 = vmatpush1.bf16.msra.mxu1 %v7171_v11  ;;  %v7244_v11 = vcombine.high %v664_v28, %v668_v6  ;;  %v7844_v19 = vld [vmem:[#allocation7 + $0x3e0] ss:$16 sps:$4 sm:$0xff]   ;;  %v7891_v60 = vld [vmem:[#allocation7 + $0x14c] ss:$16 sps:$4 sm:$0xff]  }
 0x2c3   :  { %3958 = vmatprep.subr.bf16.mxu1 %v7180_v18  ;;  %v7647_v14 = vadd.f32 %v8800_v3, %v682_v4  ;;  %v7243_v18 = vcombine.low %v664_v28, %v668_v6  ;;  %v7876_v3 = vld [vmem:[#allocation7 + $0x424] ss:$16 sps:$4 sm:$0xff]   ;;  %v7922_v61 = vld [vmem:[#allocation7 + $0x520] ss:$16 sps:$4 sm:$0xff]   ;;  %v7895_v28 = vld [vmem:[#allocation7 + $0x168] ss:$16 sps:$4 sm:$0xff]  }
 0x2c4   :  { %5613 = vmatpush1.bf16.msra.mxu0 %v7817_v16  ;;  %5632 = vmatprep.mubr.bf16.mxu0 %v8802_v21  ;;  %v7846_v16 = vld [vmem:[#allocation7 + $0x3e4] ss:$16 sps:$4 sm:$0xff]   ;;  %v7928_v4 = vld [vmem:[#allocation7 + $0x540] ss:$16 sps:$4 sm:$0xff]   ;;  %v7903_v6 = vld [vmem:[#allocation7 + $0x18c] ss:$16 sps:$4 sm:$0xff]  }
 0x2c5   :  { %5614 = vmatprep.subr.bf16.mxu0 %v7822_v10  ;;  %v3987_v10 = vmax.f32 %v7647_v14, 0.0  ;;  %v7909_v14 = vld [vmem:[#allocation7 + $0x1ac] ss:$16 sps:$4 sm:$0xff]  }
 0x2c6   :  { %3959 = vmatpush1.bf16.msra.mxu1 %v7179_v15  ;;  %v7852_v15 = vld [vmem:[#allocation7 + $0x2c] ss:$16 sps:$4 sm:$0xff]  }
 0x2c7   :  { %3960 = vmatprep.subr.bf16.mxu1 %v7188_v24  ;;  %v7868_v24 = vld [vmem:[#allocation7 + $0x400] ss:$16 sps:$4 sm:$0xff]  }
 0x2c8   :  { %5615 = vmatpush1.bf16.msra.mxu0 %v7820_v23  ;;  %v8810_v23 = vpack.c.bf16 %v3987_v10, %v3987_v10  ;;  %v7946_v10 = vld [vmem:[#allocation7 + $0x5a0] ss:$16 sps:$4 sm:$0xff]  }
 0x2c9   :  { %5616 = vmatprep.subr.bf16.mxu0 %v7825_v25  ;;  %v7850_v25 = vld [vmem:[#allocation7 + $0x28] ss:$16 sps:$4 sm:$0xff]  }
 0x2ca   :  { %3961 = vmatpush1.bf16.msra.mxu1 %v7187_v29  ;;  %v7882_v29 = vld [vmem:[#allocation7 + $0x444] ss:$16 sps:$4 sm:$0xff]  }
 0x2cb   :  { %3962 = vmatprep.subr.bf16.mxu1 %v7196_v22  ;;  %v7858_v22 = vld [vmem:[#allocation7 + $0x6c] ss:$16 sps:$4 sm:$0xff]  }
 0x2cc   :  { %5617 = vmatpush1.bf16.msra.mxu0 %v7823_v30  ;;  %v7853_v30 = vld [vmem:[#allocation7 + $0x48] ss:$16 sps:$4 sm:$0xff]  }
 0x2cd   :  { %5618 = vmatprep.subr.bf16.mxu0 %v7828_v33  ;;  %v7880_v33 = vld [vmem:[#allocation7 + $0x440] ss:$16 sps:$4 sm:$0xff]  }
 0x2ce   :  { %3963 = vmatpush1.bf16.msra.mxu1 %v7195_v12  ;;  %v7894_v12 = vld [vmem:[#allocation7 + $0x484] ss:$16 sps:$4 sm:$0xff]  }
 0x2cf   :  { %3964 = vmatprep.subr.bf16.mxu1 %v7204_v37  ;;  %v7864_v37 = vld [vmem:[#allocation7 + $0xac] ss:$16 sps:$4 sm:$0xff]  }
 0x2d0   :  { %5619 = vmatpush1.bf16.msra.mxu0 %v7826_v36  ;;  %v7859_v36 = vld [vmem:[#allocation7 + $0x88] ss:$16 sps:$4 sm:$0xff]  }
 0x2d1   :  { %5620 = vmatprep.subr.bf16.mxu0 %v7831_v38  ;;  %v7892_v38 = vld [vmem:[#allocation7 + $0x480] ss:$16 sps:$4 sm:$0xff]  }
 0x2d2   :  { %3965 = vmatpush1.bf16.msra.mxu1 %v7203_v41  ;;  %v7867_v41 = vld [vmem:[#allocation7 + $0xcc] ss:$16 sps:$4 sm:$0xff]  }
 0x2d3   :  { %3966 = vmatprep.subr.bf16.mxu1 %v7212_v32  ;;  %v7906_v32 = vld [vmem:[#allocation7 + $0x4c4] ss:$16 sps:$4 sm:$0xff]  }
 0x2d4   :  { %5621 = vmatpush1.bf16.msra.mxu0 %v7829_v42  ;;  %v7898_v42 = vld [vmem:[#allocation7 + $0x4a0] ss:$16 sps:$4 sm:$0xff]  }
 0x2d5   :  { %5622 = vmatprep.subr.bf16.mxu0 %v7834_v44  ;;  %v7865_v44 = vld [vmem:[#allocation7 + $0xc8] ss:$16 sps:$4 sm:$0xff]  }
 0x2d6   :  { %3967 = vmatpush1.bf16.msra.mxu1 %v7211_v49  ;;  %v7912_v49 = vld [vmem:[#allocation7 + $0x4e4] ss:$16 sps:$4 sm:$0xff]  }
 0x2d7   :  { %3968 = vmatprep.subr.bf16.mxu1 %v7220_v17  ;;  %v7879_v17 = vld [vmem:[#allocation7 + $0x10c] ss:$16 sps:$4 sm:$0xff]  }
 0x2d8   :  { %5623 = vmatpush1.bf16.msra.mxu0 %v7832_v53  ;;  %v7871_v53 = vld [vmem:[#allocation7 + $0xe8] ss:$16 sps:$4 sm:$0xff]  }
 0x2d9   :  { %5624 = vmatprep.subr.bf16.mxu0 %v7837_v51  ;;  %v7910_v51 = vld [vmem:[#allocation7 + $0x4e0] ss:$16 sps:$4 sm:$0xff]  }
 0x2da   :  { %3969 = vmatpush1.bf16.msra.mxu1 %v7219_v54  ;;  %v7885_v54 = vld [vmem:[#allocation7 + $0x12c] ss:$16 sps:$4 sm:$0xff]  }
 0x2db   :  { %3970 = vmatprep.subr.bf16.mxu1 %v7228_v58  ;;  %v7924_v58 = vld [vmem:[#allocation7 + $0x524] ss:$16 sps:$4 sm:$0xff]  }
 0x2dc   :  { %5625 = vmatpush1.bf16.msra.mxu0 %v7835_v57  ;;  %v7916_v57 = vld [vmem:[#allocation7 + $0x500] ss:$16 sps:$4 sm:$0xff]  }
 0x2dd   :  { %5626 = vmatprep.subr.bf16.mxu0 %v7840_v59  ;;  %v7883_v59 = vld [vmem:[#allocation7 + $0x128] ss:$16 sps:$4 sm:$0xff]  }
 0x2de   :  { %3971 = vmatpush1.bf16.msra.mxu1 %v7227_v62  ;;  %v7930_v62 = vld [vmem:[#allocation7 + $0x544] ss:$16 sps:$4 sm:$0xff]  }
 0x2df   :  { %3972 = vmatprep.subr.bf16.mxu1 %v7236_v1  ;;  %v7897_v1 = vld [vmem:[#allocation7 + $0x16c] ss:$16 sps:$4 sm:$0xff]  }
 0x2e0   :  { %5627 = vmatpush1.bf16.msra.mxu0 %v7838_v0  ;;  %v7889_v0 = vld [vmem:[#allocation7 + $0x148] ss:$16 sps:$4 sm:$0xff]  }
 0x2e1   :  { %5628 = vmatprep.subr.bf16.mxu0 %v7843_v5  ;;  %v7936_v5 = vld [vmem:[#allocation7 + $0x564] ss:$16 sps:$4 sm:$0xff]  }
 0x2e2   :  { %3973 = vmatpush1.bf16.msra.mxu1 %v7235_v7  ;;  %v7934_v7 = vld [vmem:[#allocation7 + $0x560] ss:$16 sps:$4 sm:$0xff]  }
 0x2e3   :  { %3974 = vmatprep.subr.bf16.mxu1 %v7244_v11  ;;  %v7901_v11 = vld [vmem:[#allocation7 + $0x188] ss:$16 sps:$4 sm:$0xff]  }
 0x2e4   :  { %5629 = vmatpush1.bf16.msra.mxu0 %v7841_v8  ;;  %v7942_v8 = vld [vmem:[#allocation7 + $0x584] ss:$16 sps:$4 sm:$0xff]  }
 0x2e5   :  { %5630 = vmatprep.subr.bf16.mxu0 %v7846_v16  ;;  %v7940_v16 = vld [vmem:[#allocation7 + $0x580] ss:$16 sps:$4 sm:$0xff]  }
 0x2e6   :  { %3975 = vmatpush1.bf16.msra.mxu1 %v7243_v18  ;;  %v7948_v18 = vld [vmem:[#allocation7 + $0x5a4] ss:$16 sps:$4 sm:$0xff]  }
 0x2e7   :  { %5723 = vmatprep.subr.bf16.mxu1 %v7849_v46  ;;  %v7915_v46 = vld [vmem:[#allocation7 + $0x1cc] ss:$16 sps:$4 sm:$0xff]  }
 0x2e8   :  { %5631 = vmatpush1.bf16.msra.mxu0 %v7844_v19  ;;  %v7907_v19 = vld [vmem:[#allocation7 + $0x1a8] ss:$16 sps:$4 sm:$0xff]  }
 0x2e9   :  { %5641 = vmatprep.subr.bf16.mxu0 %v7870_v20  ;;  %3977 = vmatmul.mubr.bf16.vlgmr.msra.gmra.mrb[8].mxu1 %v8743_v2  ;;  %v7888_v2 = vld [vmem:[#allocation7 + $0x464] ss:$16 sps:$4 sm:$0xff]  }
 0x2ea   :  { %5724 = vmatpush1.bf16.msra.mxu1 %v7847_v9  ;;  %5755 = vmatprep.mubr.bf16.mxu1 %v8784_v50  ;;  %v7886_v50 = vld [vmem:[#allocation7 + $0x460] ss:$16 sps:$4 sm:$0xff]   ;;  %v7954_v20 = vld [vmem:[#allocation7 + $0x5c4] ss:$16 sps:$4 sm:$0xff]   ;;  %v7913_v9 = vld [vmem:[#allocation7 + $0x1c8] ss:$16 sps:$4 sm:$0xff]  }
 0x2eb   :  { %5633 = vmatmul.mubr.bf16.vlgmr.msra.gmra.mrb[8].mxu0 %v8810_v23  ;;  %5725 = vmatprep.subr.bf16.mxu1 %v7852_v15  ;;  %v7921_v15 = vld [vmem:[#allocation7 + $0x1ec] ss:$16 sps:$4 sm:$0xff]  }
 0x2ec   :  { %5642 = vmatpush1.bf16.msra.mxu0 %v7868_v24  ;;  %v7952_v24 = vld [vmem:[#allocation7 + $0x5c0] ss:$16 sps:$4 sm:$0xff]  }
 0x2ed   :  { %5643 = vmatprep.subr.bf16.mxu0 %v7876_v3  ;;  %v7960_v3 = vld [vmem:[#allocation7 + $0x5e4] ss:$16 sps:$4 sm:$0xff]  }
 0x2ee   :  { %5726 = vmatpush1.bf16.msra.mxu1 %v7850_v25  ;;  %v7919_v25 = vld [vmem:[#allocation7 + $0x1e8] ss:$16 sps:$4 sm:$0xff]  }
 0x2ef   :  { %5727 = vmatprep.subr.bf16.mxu1 %v7855_v26  ;;  %v7927_v26 = vld [vmem:[#allocation7 + $0x20c] ss:$16 sps:$4 sm:$0xff]  }
 0x2f0   :  { %5644 = vmatpush1.bf16.msra.mxu0 %v7874_v27  ;;  %v7958_v27 = vld [vmem:[#allocation7 + $0x5e0] ss:$16 sps:$4 sm:$0xff]  }
 0x2f1   :  { %5645 = vmatprep.subr.bf16.mxu0 %v7882_v29  ;;  %v8014_v29 = vld [vmem:[#allocation7 + $0x604] ss:$16 sps:$4 sm:$0xff]  }
 0x2f2   :  { %5728 = vmatpush1.bf16.msra.mxu1 %v7853_v30  ;;  %v7925_v30 = vld [vmem:[#allocation7 + $0x208] ss:$16 sps:$4 sm:$0xff]  }
 0x2f3   :  { %5729 = vmatprep.subr.bf16.mxu1 %v7858_v22  ;;  %v7933_v22 = vld [vmem:[#allocation7 + $0x22c] ss:$16 sps:$4 sm:$0xff]  }
 0x2f4   :  { %5646 = vmatpush1.bf16.msra.mxu0 %v7880_v33  ;;  %v7931_v33 = vld [vmem:[#allocation7 + $0x228] ss:$16 sps:$4 sm:$0xff]  }
 0x2f5   :  { %5647 = vmatprep.subr.bf16.mxu0 %v7888_v2  ;;  %v7939_v2 = vld [vmem:[#allocation7 + $0x24c] ss:$16 sps:$4 sm:$0xff]  }
 0x2f6   :  { %5730 = vmatpush1.bf16.msra.mxu1 %v7856_v63  ;;  %v7937_v63 = vld [vmem:[#allocation7 + $0x248] ss:$16 sps:$4 sm:$0xff]  }
 0x2f7   :  { %5731 = vmatprep.subr.bf16.mxu1 %v7861_v35  ;;  %v7945_v35 = vld [vmem:[#allocation7 + $0x26c] ss:$16 sps:$4 sm:$0xff]  }
 0x2f8   :  { %5648 = vmatpush1.bf16.msra.mxu0 %v7886_v50  ;;  %v7943_v50 = vld [vmem:[#allocation7 + $0x268] ss:$16 sps:$4 sm:$0xff]  }
 0x2f9   :  { %5649 = vmatprep.subr.bf16.mxu0 %v7894_v12  ;;  %v7951_v12 = vld [vmem:[#allocation7 + $0x28c] ss:$16 sps:$4 sm:$0xff]  }
 0x2fa   :  { %5732 = vmatpush1.bf16.msra.mxu1 %v7859_v36  ;;  %v7949_v36 = vld [vmem:[#allocation7 + $0x288] ss:$16 sps:$4 sm:$0xff]  }
 0x2fb   :  { %5733 = vmatprep.subr.bf16.mxu1 %v7864_v37  ;;  %v689_v37 = vsub.s32 4, %v8687_v43 }
 0x2fc   :  { %5650 = vmatpush1.bf16.msra.mxu0 %v7892_v38  ;;  %v7957_v38 = vld [vmem:[#allocation7 + $0x2ac] ss:$16 sps:$4 sm:$0xff]  }
 0x2fd   :  { %5651 = vmatprep.subr.bf16.mxu0 %v7900_v39 }
 0x2fe   :  { %5734 = vmatpush1.bf16.msra.mxu1 %v7862_v40  ;;  %v7955_v40 = vld [vmem:[#allocation7 + $0x2a8] ss:$16 sps:$4 sm:$0xff]  }
 0x2ff   :  { %5735 = vmatprep.subr.bf16.mxu1 %v7867_v41 }
 0x300   :  { %5652 = vmatpush1.bf16.msra.mxu0 %v7898_v42  ;;  %v7963_v42 = vld [vmem:[#allocation7 + $0x2cc] ss:$16 sps:$4 sm:$0xff]  }
 0x301   :  { %5653 = vmatprep.subr.bf16.mxu0 %v7906_v32 }
 0x302   :  { %5736 = vmatpush1.bf16.msra.mxu1 %v7865_v44 }
 0x303   :  { %5737 = vmatprep.subr.bf16.mxu1 %v7873_v45 }
 0x304   :  { %5654 = vmatpush1.bf16.msra.mxu0 %v7904_v48  ;;  %v7961_v48 = vld [vmem:[#allocation7 + $0x2c8] ss:$16 sps:$4 sm:$0xff]  }
 0x305   :  { %5655 = vmatprep.subr.bf16.mxu0 %v7912_v49 }
 0x306   :  { %5738 = vmatpush1.bf16.msra.mxu1 %v7871_v53 }
 0x307   :  { %5739 = vmatprep.subr.bf16.mxu1 %v7879_v17  ;;  %v7966_v17 = vld [vmem:[#allocation7 + $0x2ec] ss:$16 sps:$4 sm:$0xff]  }
 0x308   :  { %5656 = vmatpush1.bf16.msra.mxu0 %v7910_v51 }
 0x309   :  { %5657 = vmatprep.subr.bf16.mxu0 %v7918_v52 }
 0x30a   :  { %5740 = vmatpush1.bf16.msra.mxu1 %v7877_v56 }
 0x30b   :  { %5741 = vmatprep.subr.bf16.mxu1 %v7885_v54  ;;  %v7964_v54 = vld [vmem:[#allocation7 + $0x2e8] ss:$16 sps:$4 sm:$0xff]  }
 0x30c   :  { %5658 = vmatpush1.bf16.msra.mxu0 %v7916_v57 }
 0x30d   :  { %5659 = vmatprep.subr.bf16.mxu0 %v7924_v58  ;;  %v7969_v58 = vld [vmem:[#allocation7 + $0x30c] ss:$16 sps:$4 sm:$0xff]  }
 0x30e   :  { %5742 = vmatpush1.bf16.msra.mxu1 %v7883_v59  ;;  %v8012_v59 = vld [vmem:[#allocation7 + $0x600] ss:$16 sps:$4 sm:$0xff]  }
 0x30f   :  { %5743 = vmatprep.subr.bf16.mxu1 %v7891_v60 }
 0x310   :  { %5660 = vmatpush1.bf16.msra.mxu0 %v7922_v61  ;;  %v8020_v61 = vld [vmem:[#allocation7 + $0x624] ss:$16 sps:$4 sm:$0xff]  }
 0x311   :  { %5661 = vmatprep.subr.bf16.mxu0 %v7930_v62  ;;  %v7967_v62 = vld [vmem:[#allocation7 + $0x308] ss:$16 sps:$4 sm:$0xff]  }
 0x312   :  { %5744 = vmatpush1.bf16.msra.mxu1 %v7889_v0  ;;  %v7972_v0 = vld [vmem:[#allocation7 + $0x32c] ss:$16 sps:$4 sm:$0xff]  }
 0x313   :  { %5745 = vmatprep.subr.bf16.mxu1 %v7897_v1  ;;  %v8018_v1 = vld [vmem:[#allocation7 + $0x620] ss:$16 sps:$4 sm:$0xff]  }
 0x314   :  { %5662 = vmatpush1.bf16.msra.mxu0 %v7928_v4  ;;  %v8026_v4 = vld [vmem:[#allocation7 + $0x644] ss:$16 sps:$4 sm:$0xff]  }
 0x315   :  { %5663 = vmatprep.subr.bf16.mxu0 %v7936_v5  ;;  %v7970_v5 = vld [vmem:[#allocation7 + $0x328] ss:$16 sps:$4 sm:$0xff]  }
 0x316   :  { %5746 = vmatpush1.bf16.msra.mxu1 %v7895_v28  ;;  %v7975_v28 = vld [vmem:[#allocation7 + $0x34c] ss:$16 sps:$4 sm:$0xff]  }
 0x317   :  { %5747 = vmatprep.subr.bf16.mxu1 %v7903_v6  ;;  %v8024_v6 = vld [vmem:[#allocation7 + $0x640] ss:$16 sps:$4 sm:$0xff]  }
 0x318   :  { %5664 = vmatpush1.bf16.msra.mxu0 %v7934_v7  ;;  %v8032_v7 = vld [vmem:[#allocation7 + $0x664] ss:$16 sps:$4 sm:$0xff]  }
 0x319   :  { %5665 = vmatprep.subr.bf16.mxu0 %v7942_v8  ;;  %v7973_v8 = vld [vmem:[#allocation7 + $0x348] ss:$16 sps:$4 sm:$0xff]  }
 0x31a   :  { %5748 = vmatpush1.bf16.msra.mxu1 %v7901_v11  ;;  %v7978_v11 = vld [vmem:[#allocation7 + $0x36c] ss:$16 sps:$4 sm:$0xff]  }
 0x31b   :  { %5749 = vmatprep.subr.bf16.mxu1 %v7909_v14  ;;  %v8030_v14 = vld [vmem:[#allocation7 + $0x660] ss:$16 sps:$4 sm:$0xff]  }
 0x31c   :  { %5666 = vmatpush1.bf16.msra.mxu0 %v7940_v16  ;;  %v8038_v16 = vld [vmem:[#allocation7 + $0x684] ss:$16 sps:$4 sm:$0xff]  }
 0x31d   :  { %5667 = vmatprep.subr.bf16.mxu0 %v7948_v18  ;;  %v7976_v18 = vld [vmem:[#allocation7 + $0x368] ss:$16 sps:$4 sm:$0xff]  }
 0x31e   :  { %5750 = vmatpush1.bf16.msra.mxu1 %v7907_v19  ;;  %v7981_v19 = vld [vmem:[#allocation7 + $0x38c] ss:$16 sps:$4 sm:$0xff]  }
 0x31f   :  { %5751 = vmatprep.subr.bf16.mxu1 %v7915_v46  ;;  %v8036_v46 = vld [vmem:[#allocation7 + $0x680] ss:$16 sps:$4 sm:$0xff]  }
 0x320   :  { %5668 = vmatpush1.bf16.msra.mxu0 %v7946_v10  ;;  %v8044_v10 = vld [vmem:[#allocation7 + $0x6a4] ss:$16 sps:$4 sm:$0xff]  }
 0x321   :  { %5669 = vmatprep.subr.bf16.mxu0 %v7954_v20  ;;  %v7979_v20 = vld [vmem:[#allocation7 + $0x388] ss:$16 sps:$4 sm:$0xff]  }
 0x322   :  { %5752 = vmatpush1.bf16.msra.mxu1 %v7913_v9  ;;  %v7984_v9 = vld [vmem:[#allocation7 + $0x3ac] ss:$16 sps:$4 sm:$0xff]  }
 0x323   :  { %5753 = vmatprep.subr.bf16.mxu1 %v7921_v15  ;;  %v8042_v15 = vld [vmem:[#allocation7 + $0x6a0] ss:$16 sps:$4 sm:$0xff]  }
 0x324   :  { %5670 = vmatpush1.bf16.msra.mxu0 %v7952_v24  ;;  %v8050_v24 = vld [vmem:[#allocation7 + $0x6c4] ss:$16 sps:$4 sm:$0xff]  }
 0x325   :  { %5671 = vmatprep.subr.bf16.mxu0 %v7960_v3  ;;  %v7982_v3 = vld [vmem:[#allocation7 + $0x3a8] ss:$16 sps:$4 sm:$0xff]  }
 0x326   :  { %5754 = vmatpush1.bf16.msra.mxu1 %v7919_v25  ;;  %v7987_v25 = vld [vmem:[#allocation7 + $0x3cc] ss:$16 sps:$4 sm:$0xff]  }
 0x327   :  { %5764 = vmatprep.subr.bf16.mxu1 %v7927_v26  ;;  %v8048_v26 = vld [vmem:[#allocation7 + $0x6c0] ss:$16 sps:$4 sm:$0xff]  }
 0x328   :  { %5672 = vmatpush1.bf16.msra.mxu0 %v7958_v27  ;;  %v8056_v27 = vld [vmem:[#allocation7 + $0x6e4] ss:$16 sps:$4 sm:$0xff]  }
 0x329   :  { %5756 = vmatmul.mubr.bf16.vlgmr.msra.gmra.mrb[12].mxu1 %v8791_v31  ;;  %5682 = vmatprep.subr.bf16.mxu0 %v8014_v29  ;;  %v693_v31 = vsub.s32 5, %v8687_v43  ;;  %v7985_v29 = vld [vmem:[#allocation7 + $0x3c8] ss:$16 sps:$4 sm:$0xff]  }
 0x32a   :  { %5765 = vmatpush1.bf16.msra.mxu1 %v7925_v30  ;;  %5796 = vmatprep.mubr.bf16.mxu1 %v8802_v21  ;;  %v8819_v21 = vld [vmem:[#allocation5] sm:$0xff] }
 0x32b   :  { %5766 = vmatprep.subr.bf16.mxu1 %v7933_v22  ;;  %v690_v39 = vrot.slane %v8819_v21, %v689_v37  ;;  %v694_v41 = vrot.slane %v8819_v21, %v693_v31  ;;  %v7990_v30 = vld [vmem:[#allocation7 + $0x3ec] ss:$16 sps:$4 sm:$0xff]   ;;  %v8054_v22 = vld [vmem:[#allocation7 + $0x6e0] ss:$16 sps:$4 sm:$0xff]   ;;  %v8074_v31 = vld [vmem:[#allocation7 + $0x744] ss:$16 sps:$4 sm:$0xff]  }
 0x32c   :  { %v8066_v37 = vld [vmem:[#allocation7 + $0x720] ss:$16 sps:$4 sm:$0xff]  }
 0x32e   :  { %5767 = vmatpush1.bf16.msra.mxu1 %v7931_v33  ;;  %v8062_v33 = vld [vmem:[#allocation7 + $0x704] ss:$16 sps:$4 sm:$0xff]  }
 0x32f   :  { %5768 = vmatprep.subr.bf16.mxu1 %v7939_v2  ;;  %v7988_v2 = vld [vmem:[#allocation7 + $0x3e8] ss:$16 sps:$4 sm:$0xff]  }
 0x332   :  { %5769 = vmatpush1.bf16.msra.mxu1 %v7937_v63  ;;  %v7993_v63 = vld [vmem:[#allocation7 + $0x40c] ss:$16 sps:$4 sm:$0xff]  }
 0x333   :  { %5770 = vmatprep.subr.bf16.mxu1 %v7945_v35  ;;  %v8060_v35 = vld [vmem:[#allocation7 + $0x700] ss:$16 sps:$4 sm:$0xff]  }
 0x336   :  { %5771 = vmatpush1.bf16.msra.mxu1 %v7943_v50  ;;  %v8068_v50 = vld [vmem:[#allocation7 + $0x724] ss:$16 sps:$4 sm:$0xff]  }
 0x337   :  { %5772 = vmatprep.subr.bf16.mxu1 %v7951_v12  ;;  %v7991_v12 = vld [vmem:[#allocation7 + $0x408] ss:$16 sps:$4 sm:$0xff]  }
 0x33a   :  { %5773 = vmatpush1.bf16.msra.mxu1 %v7949_v36  ;;  %v7996_v36 = vld [vmem:[#allocation7 + $0x42c] ss:$16 sps:$4 sm:$0xff]  }
 0x33b   :  { %5774 = vmatprep.subr.bf16.mxu1 %v7957_v38  ;;  %v7994_v38 = vld [vmem:[#allocation7 + $0x428] ss:$16 sps:$4 sm:$0xff]  }
 0x33e   :  { %v3814_v32 = vpop.f32.mrb[4].mxu0  ;;  %5775 = vmatpush1.bf16.msra.mxu1 %v7955_v40  ;;  %v8072_v40 = vld [vmem:[#allocation7 + $0x740] ss:$16 sps:$4 sm:$0xff]  }
 0x33f   :  { %v7649_v44 = vadd.f32 %v3814_v32, %v690_v39  ;;  %v3816_v45 = vpop.f32.mrb[5].mxu0  ;;  %5776 = vmatprep.subr.bf16.mxu1 %v7963_v42  ;;  %v7999_v39 = vld [vmem:[#allocation7 + $0x44c] ss:$16 sps:$4 sm:$0xff]   ;;  %v7997_v42 = vld [vmem:[#allocation7 + $0x448] ss:$16 sps:$4 sm:$0xff]  }
 0x340   :  { %v7650_v49 = vadd.f32 %v3816_v45, %v694_v41  ;;  %v3818_v53 = vpop.f32.mrb[6].mxu0  ;;  %v8080_v41 = vld [vmem:[#allocation7 + $0x764] ss:$16 sps:$4 sm:$0xff]   ;;  %v8002_v32 = vld [vmem:[#allocation7 + $0x46c] ss:$16 sps:$4 sm:$0xff]  }
 0x341   :  { %v3989_v51 = vmax.f32 %v7649_v44, 0.0  ;;  %v3819_v52 = vpop.f32.mrb[7].mxu0  ;;  %v8078_v44 = vld [vmem:[#allocation7 + $0x760] ss:$16 sps:$4 sm:$0xff]   ;;  %v8086_v45 = vld [vmem:[#allocation7 + $0x784] ss:$16 sps:$4 sm:$0xff]  }
 0x342   :  { %v3990_v56 = vmax.f32 %v7650_v49, 0.0  ;;  %5777 = vmatpush1.bf16.msra.mxu1 %v7961_v48  ;;  %v8005_v48 = vld [vmem:[#allocation7 + $0x48c] ss:$16 sps:$4 sm:$0xff]   ;;  %v8084_v49 = vld [vmem:[#allocation7 + $0x780] ss:$16 sps:$4 sm:$0xff]  }
 0x343   :  { %5778 = vmatprep.subr.bf16.mxu1 %v7966_v17  ;;  %v8825_v60 = vpack.c.bf16 %v3989_v51, %v3989_v51  ;;  %v8092_v53 = vld [vmem:[#allocation7 + $0x7a4] ss:$16 sps:$4 sm:$0xff]   ;;  %v8003_v17 = vld [vmem:[#allocation7 + $0x488] ss:$16 sps:$4 sm:$0xff]   ;;  %v8008_v51 = vld [vmem:[#allocation7 + $0x4ac] ss:$16 sps:$4 sm:$0xff]  }
 0x344   :  { %v8823_v57 = vpack.c.bf16 %v3990_v56, %v3990_v56  ;;  %v8090_v52 = vld [vmem:[#allocation7 + $0x7a0] ss:$16 sps:$4 sm:$0xff]   ;;  %v8098_v56 = vld [vmem:[#allocation7 + $0x7c4] ss:$16 sps:$4 sm:$0xff]  }
 0x346   :  { %5673 = vmatprep.mubr.bf16.mxu0 %v8823_v57  ;;  %5779 = vmatpush1.bf16.msra.mxu1 %v7964_v54  ;;  %v8006_v54 = vld [vmem:[#allocation7 + $0x4a8] ss:$16 sps:$4 sm:$0xff]  }
 0x347   :  { %5674 = vmatmul.mubr.bf16.vlgmr.msra.gmra.mrb[8].mxu0 %v8825_v60  ;;  %5780 = vmatprep.subr.bf16.mxu1 %v7969_v58  ;;  %v8096_v58 = vld [vmem:[#allocation7 + $0x7c0] ss:$16 sps:$4 sm:$0xff]  }
 0x348   :  { %5683 = vmatpush1.bf16.msra.mxu0 %v8012_v59  ;;  %v8104_v59 = vld [vmem:[#allocation7 + $0x7e4] ss:$16 sps:$4 sm:$0xff]  }
 0x349   :  { %5684 = vmatprep.subr.bf16.mxu0 %v8020_v61  ;;  %v8009_v61 = vld [vmem:[#allocation7 + $0x4c8] ss:$16 sps:$4 sm:$0xff]  }
 0x34a   :  { %5781 = vmatpush1.bf16.msra.mxu1 %v7967_v62  ;;  %v8017_v62 = vld [vmem:[#allocation7 + $0x4ec] ss:$16 sps:$4 sm:$0xff]  }
 0x34b   :  { %5782 = vmatprep.subr.bf16.mxu1 %v7972_v0  ;;  %v8102_v0 = vld [vmem:[#allocation7 + $0x7e0] ss:$16 sps:$4 sm:$0xff]  }
 0x34c   :  { %5685 = vmatpush1.bf16.msra.mxu0 %v8018_v1  ;;  %v8137_v1 = vld [vmem:[#allocation10 + $0x4] ss:$8 sps:$4 sm:$0xff]  }
 0x34d   :  { %5686 = vmatprep.subr.bf16.mxu0 %v8026_v4  ;;  %v8015_v4 = vld [vmem:[#allocation7 + $0x4e8] ss:$16 sps:$4 sm:$0xff]  }
 0x34e   :  { %5783 = vmatpush1.bf16.msra.mxu1 %v7970_v5  ;;  %v8023_v5 = vld [vmem:[#allocation7 + $0x50c] ss:$16 sps:$4 sm:$0xff]  }
 0x34f   :  { %5784 = vmatprep.subr.bf16.mxu1 %v7975_v28  ;;  %v8021_v28 = vld [vmem:[#allocation7 + $0x508] ss:$16 sps:$4 sm:$0xff]  }
 0x350   :  { %5687 = vmatpush1.bf16.msra.mxu0 %v8024_v6  ;;  %v8029_v6 = vld [vmem:[#allocation7 + $0x52c] ss:$16 sps:$4 sm:$0xff]  }
 0x351   :  { %5688 = vmatprep.subr.bf16.mxu0 %v8032_v7  ;;  %v8027_v7 = vld [vmem:[#allocation7 + $0x528] ss:$16 sps:$4 sm:$0xff]  }
 0x352   :  { %5785 = vmatpush1.bf16.msra.mxu1 %v7973_v8  ;;  %v8035_v8 = vld [vmem:[#allocation7 + $0x54c] ss:$16 sps:$4 sm:$0xff]  }
 0x353   :  { %5786 = vmatprep.subr.bf16.mxu1 %v7978_v11  ;;  %v8033_v11 = vld [vmem:[#allocation7 + $0x548] ss:$16 sps:$4 sm:$0xff]  }
 0x354   :  { %5689 = vmatpush1.bf16.msra.mxu0 %v8030_v14  ;;  %v8041_v14 = vld [vmem:[#allocation7 + $0x56c] ss:$16 sps:$4 sm:$0xff]  }
 0x355   :  { %5690 = vmatprep.subr.bf16.mxu0 %v8038_v16  ;;  %v8039_v16 = vld [vmem:[#allocation7 + $0x568] ss:$16 sps:$4 sm:$0xff]  }
 0x356   :  { %5787 = vmatpush1.bf16.msra.mxu1 %v7976_v18  ;;  %v8047_v18 = vld [vmem:[#allocation7 + $0x58c] ss:$16 sps:$4 sm:$0xff]  }
 0x357   :  { %5788 = vmatprep.subr.bf16.mxu1 %v7981_v19  ;;  %v8045_v19 = vld [vmem:[#allocation7 + $0x588] ss:$16 sps:$4 sm:$0xff]  }
 0x358   :  { %5691 = vmatpush1.bf16.msra.mxu0 %v8036_v46  ;;  %v8053_v46 = vld [vmem:[#allocation7 + $0x5ac] ss:$16 sps:$4 sm:$0xff]  }
 0x359   :  { %5692 = vmatprep.subr.bf16.mxu0 %v8044_v10  ;;  %v8051_v10 = vld [vmem:[#allocation7 + $0x5a8] ss:$16 sps:$4 sm:$0xff]  }
 0x35a   :  { %5789 = vmatpush1.bf16.msra.mxu1 %v7979_v20  ;;  %v8059_v20 = vld [vmem:[#allocation7 + $0x5cc] ss:$16 sps:$4 sm:$0xff]  }
 0x35b   :  { %5790 = vmatprep.subr.bf16.mxu1 %v7984_v9  ;;  %v8057_v9 = vld [vmem:[#allocation7 + $0x5c8] ss:$16 sps:$4 sm:$0xff]  }
 0x35c   :  { %5693 = vmatpush1.bf16.msra.mxu0 %v8042_v15  ;;  %v8065_v15 = vld [vmem:[#allocation7 + $0x5ec] ss:$16 sps:$4 sm:$0xff]  }
 0x35d   :  { %5694 = vmatprep.subr.bf16.mxu0 %v8050_v24  ;;  %v8063_v24 = vld [vmem:[#allocation7 + $0x5e8] ss:$16 sps:$4 sm:$0xff]  }
 0x35e   :  { %5791 = vmatpush1.bf16.msra.mxu1 %v7982_v3  ;;  %v8071_v3 = vld [vmem:[#allocation7 + $0x60c] ss:$16 sps:$4 sm:$0xff]  }
 0x35f   :  { %5792 = vmatprep.subr.bf16.mxu1 %v7987_v25  ;;  %v8069_v25 = vld [vmem:[#allocation7 + $0x608] ss:$16 sps:$4 sm:$0xff]  }
 0x360   :  { %5695 = vmatpush1.bf16.msra.mxu0 %v8048_v26  ;;  %v8077_v26 = vld [vmem:[#allocation7 + $0x62c] ss:$16 sps:$4 sm:$0xff]  }
 0x361   :  { %5696 = vmatprep.subr.bf16.mxu0 %v8056_v27  ;;  %v8075_v27 = vld [vmem:[#allocation7 + $0x628] ss:$16 sps:$4 sm:$0xff]  }
 0x362   :  { %5793 = vmatpush1.bf16.msra.mxu1 %v7985_v29  ;;  %v8083_v29 = vld [vmem:[#allocation7 + $0x64c] ss:$16 sps:$4 sm:$0xff]  }
 0x363   :  { %5794 = vmatprep.subr.bf16.mxu1 %v7990_v30  ;;  %v8081_v30 = vld [vmem:[#allocation7 + $0x648] ss:$16 sps:$4 sm:$0xff]  }
 0x364   :  { %5697 = vmatpush1.bf16.msra.mxu0 %v8054_v22  ;;  %v8089_v22 = vld [vmem:[#allocation7 + $0x66c] ss:$16 sps:$4 sm:$0xff]  }
 0x365   :  { %5698 = vmatprep.subr.bf16.mxu0 %v8062_v33  ;;  %v8087_v33 = vld [vmem:[#allocation7 + $0x668] ss:$16 sps:$4 sm:$0xff]  }
 0x366   :  { %5795 = vmatpush1.bf16.msra.mxu1 %v7988_v2  ;;  %v8095_v2 = vld [vmem:[#allocation7 + $0x68c] ss:$16 sps:$4 sm:$0xff]  }
 0x367   :  { %5805 = vmatprep.subr.bf16.mxu1 %v7993_v63  ;;  %v697_v63 = vsub.s32 6, %v8687_v43 }
 0x368   :  { %5699 = vmatpush1.bf16.msra.mxu0 %v8060_v35  ;;  %v8093_v35 = vld [vmem:[#allocation7 + $0x688] ss:$16 sps:$4 sm:$0xff]  }
 0x369   :  { %5700 = vmatprep.subr.bf16.mxu0 %v8068_v50  ;;  %5797 = vmatmul.mubr.bf16.vlgmr.msra.gmra.mrb[12].mxu1 %v8810_v23  ;;  %v8000_v23 = vld [vmem:[#allocation7 + $0x468] ss:$16 sps:$4 sm:$0xff]   ;;  %v701_v50 = vsub.s32 7, %v8687_v43 }
 0x36a   :  { %5806 = vmatpush1.bf16.msra.mxu1 %v7991_v12  ;;  %5837 = vmatprep.mubr.bf16.mxu1 %v8823_v57  ;;  %v8011_v57 = vld [vmem:[#allocation7 + $0x4cc] ss:$16 sps:$4 sm:$0xff]   ;;  %v698_v12 = vrot.slane %v8819_v21, %v697_v63 }
 0x36b   :  { %5807 = vmatprep.subr.bf16.mxu1 %v7996_v36  ;;  %v702_v36 = vrot.slane %v8819_v21, %v701_v50  ;;  %v8168_v63 = vld [vmem:[#allocation10 + $0xb0] ss:$8 sps:$4 sm:$0xff]   ;;  %v8171_v50 = vld [vmem:[#allocation10 + $0xc0] ss:$8 sps:$4 sm:$0xff]  }
 0x36c   :  { %5701 = vmatpush1.bf16.msra.mxu0 %v8066_v37  ;;  %v8099_v37 = vld [vmem:[#allocation7 + $0x6a8] ss:$16 sps:$4 sm:$0xff]  }
 0x36d   :  { %5702 = vmatprep.subr.bf16.mxu0 %v8074_v31  ;;  %v8107_v31 = vld [vmem:[#allocation7 + $0x6cc] ss:$16 sps:$4 sm:$0xff]  }
 0x36e   :  { %5808 = vmatpush1.bf16.msra.mxu1 %v7994_v38  ;;  %v8232_v43 = vld [vmem:[%s8939_s7] sm:$0xff]  }
 0x36f   :  { %5809 = vmatprep.subr.bf16.mxu1 %v7999_v39 }
 0x370   :  { %5703 = vmatpush1.bf16.msra.mxu0 %v8072_v40 }
 0x371   :  { %5704 = vmatprep.subr.bf16.mxu0 %v8080_v41 }
 0x372   :  { %5810 = vmatpush1.bf16.msra.mxu1 %v7997_v42 }
 0x373   :  { %5811 = vmatprep.subr.bf16.mxu1 %v8002_v32  ;;  %v8105_v32 = vld [vmem:[#allocation7 + $0x6c8] ss:$16 sps:$4 sm:$0xff]  }
 0x374   :  { %5705 = vmatpush1.bf16.msra.mxu0 %v8078_v44 }
 0x375   :  { %5706 = vmatprep.subr.bf16.mxu0 %v8086_v45 }
 0x376   :  { %5812 = vmatpush1.bf16.msra.mxu1 %v8000_v23  ;;  %v8110_v23 = vld [vmem:[#allocation7 + $0x6ec] ss:$16 sps:$4 sm:$0xff]  }
 0x377   :  { %5813 = vmatprep.subr.bf16.mxu1 %v8005_v48 }
 0x378   :  { %5707 = vmatpush1.bf16.msra.mxu0 %v8084_v49 }
 0x379   :  { %5708 = vmatprep.subr.bf16.mxu0 %v8092_v53  ;;  %v8108_v53 = vld [vmem:[#allocation7 + $0x6e8] ss:$16 sps:$4 sm:$0xff]  }
 0x37a   :  { %5814 = vmatpush1.bf16.msra.mxu1 %v8003_v17  ;;  %v8135_v17 = vld [vmem:[#allocation10] ss:$8 sps:$4 sm:$0xff]  }
 0x37b   :  { %5815 = vmatprep.subr.bf16.mxu1 %v8008_v51  ;;  %v8113_v51 = vld [vmem:[#allocation7 + $0x70c] ss:$16 sps:$4 sm:$0xff]  }
 0x37c   :  { %5709 = vmatpush1.bf16.msra.mxu0 %v8090_v52  ;;  %v8140_v52 = vld [vmem:[#allocation10 + $0x14] ss:$8 sps:$4 sm:$0xff]  }
 0x37d   :  { %5710 = vmatprep.subr.bf16.mxu0 %v8098_v56  ;;  %v8111_v56 = vld [vmem:[#allocation7 + $0x708] ss:$16 sps:$4 sm:$0xff]  }
 0x37e   :  { %5816 = vmatpush1.bf16.msra.mxu1 %v8006_v54  ;;  %v8138_v54 = vld [vmem:[#allocation10 + $0x10] ss:$8 sps:$4 sm:$0xff]  }
 0x37f   :  { %5817 = vmatprep.subr.bf16.mxu1 %v8011_v57  ;;  %v8116_v57 = vld [vmem:[#allocation7 + $0x72c] ss:$16 sps:$4 sm:$0xff]  }
 0x380   :  { %5711 = vmatpush1.bf16.msra.mxu0 %v8096_v58  ;;  %v8143_v58 = vld [vmem:[#allocation10 + $0x24] ss:$8 sps:$4 sm:$0xff]  }
 0x381   :  { %5712 = vmatprep.subr.bf16.mxu0 %v8104_v59  ;;  %v8114_v59 = vld [vmem:[#allocation7 + $0x728] ss:$16 sps:$4 sm:$0xff]  }
 0x382   :  { %5818 = vmatpush1.bf16.msra.mxu1 %v8009_v61  ;;  %v8141_v61 = vld [vmem:[#allocation10 + $0x20] ss:$8 sps:$4 sm:$0xff]  }
 0x383   :  { %5819 = vmatprep.subr.bf16.mxu1 %v8017_v62  ;;  %v8119_v62 = vld [vmem:[#allocation7 + $0x74c] ss:$16 sps:$4 sm:$0xff]  }
 0x384   :  { %5713 = vmatpush1.bf16.msra.mxu0 %v8102_v0  ;;  %v8146_v0 = vld [vmem:[#allocation10 + $0x34] ss:$8 sps:$4 sm:$0xff]  }
 0x385   :  { %6291 = vmatprep.subr.bf16.mxu0 %v8137_v1  ;;  %v8117_v1 = vld [vmem:[#allocation7 + $0x748] ss:$16 sps:$4 sm:$0xff]  }
 0x386   :  { %5820 = vmatpush1.bf16.msra.mxu1 %v8015_v4  ;;  %v8144_v4 = vld [vmem:[#allocation10 + $0x30] ss:$8 sps:$4 sm:$0xff]  }
 0x387   :  { %5821 = vmatprep.subr.bf16.mxu1 %v8023_v5  ;;  %v8122_v5 = vld [vmem:[#allocation7 + $0x76c] ss:$16 sps:$4 sm:$0xff]  }
 0x38a   :  { %5822 = vmatpush1.bf16.msra.mxu1 %v8021_v28  ;;  %v8149_v28 = vld [vmem:[#allocation10 + $0x44] ss:$8 sps:$4 sm:$0xff]  }
 0x38b   :  { %5823 = vmatprep.subr.bf16.mxu1 %v8029_v6  ;;  %v8120_v6 = vld [vmem:[#allocation7 + $0x768] ss:$16 sps:$4 sm:$0xff]  }
 0x38e   :  { %5824 = vmatpush1.bf16.msra.mxu1 %v8027_v7  ;;  %v8147_v7 = vld [vmem:[#allocation10 + $0x40] ss:$8 sps:$4 sm:$0xff]  }
 0x38f   :  { %5825 = vmatprep.subr.bf16.mxu1 %v8035_v8  ;;  %v8125_v8 = vld [vmem:[#allocation7 + $0x78c] ss:$16 sps:$4 sm:$0xff]  }
 0x392   :  { %5826 = vmatpush1.bf16.msra.mxu1 %v8033_v11  ;;  %v8152_v11 = vld [vmem:[#allocation10 + $0x54] ss:$8 sps:$4 sm:$0xff]  }
 0x393   :  { %5827 = vmatprep.subr.bf16.mxu1 %v8041_v14  ;;  %v8123_v14 = vld [vmem:[#allocation7 + $0x788] ss:$16 sps:$4 sm:$0xff]  }
 0x396   :  { %5828 = vmatpush1.bf16.msra.mxu1 %v8039_v16  ;;  %v8150_v16 = vld [vmem:[#allocation10 + $0x50] ss:$8 sps:$4 sm:$0xff]  }
 0x397   :  { %5829 = vmatprep.subr.bf16.mxu1 %v8047_v18  ;;  %v8128_v18 = vld [vmem:[#allocation7 + $0x7ac] ss:$16 sps:$4 sm:$0xff]  }
 0x39a   :  { %5830 = vmatpush1.bf16.msra.mxu1 %v8045_v19  ;;  %v8155_v19 = vld [vmem:[#allocation10 + $0x64] ss:$8 sps:$4 sm:$0xff]  }
 0x39b   :  { %5831 = vmatprep.subr.bf16.mxu1 %v8053_v46  ;;  %v8126_v46 = vld [vmem:[#allocation7 + $0x7a8] ss:$16 sps:$4 sm:$0xff]  }
 0x39e   :  { %5832 = vmatpush1.bf16.msra.mxu1 %v8051_v10  ;;  %v8153_v10 = vld [vmem:[#allocation10 + $0x60] ss:$8 sps:$4 sm:$0xff]  }
 0x39f   :  { %5833 = vmatprep.subr.bf16.mxu1 %v8059_v20  ;;  %v8131_v20 = vld [vmem:[#allocation7 + $0x7cc] ss:$16 sps:$4 sm:$0xff]  }
 0x3a2   :  { %5834 = vmatpush1.bf16.msra.mxu1 %v8057_v9  ;;  %v8158_v9 = vld [vmem:[#allocation10 + $0x74] ss:$8 sps:$4 sm:$0xff]  }
 0x3a3   :  { %5835 = vmatprep.subr.bf16.mxu1 %v8065_v15  ;;  %v8129_v15 = vld [vmem:[#allocation7 + $0x7c8] ss:$16 sps:$4 sm:$0xff]  }
 0x3a6   :  { %5836 = vmatpush1.bf16.msra.mxu1 %v8063_v24  ;;  %v8156_v24 = vld [vmem:[#allocation10 + $0x70] ss:$8 sps:$4 sm:$0xff]  }
 0x3a7   :  { %5846 = vmatprep.subr.bf16.mxu1 %v8071_v3  ;;  %v8134_v3 = vld [vmem:[#allocation7 + $0x7ec] ss:$16 sps:$4 sm:$0xff]  }
 0x3a9   :  { %5838 = vmatmul.mubr.bf16.vlgmr.msra.gmra.mrb[12].mxu1 %v8825_v60  ;;  %v8101_v60 = vld [vmem:[#allocation7 + $0x6ac] ss:$16 sps:$4 sm:$0xff]  }
 0x3aa   :  { %5847 = vmatpush1.bf16.msra.mxu1 %v8069_v25  ;;  %v8161_v25 = vld [vmem:[#allocation10 + $0x84] ss:$8 sps:$4 sm:$0xff]  }
 0x3ab   :  { %5848 = vmatprep.subr.bf16.mxu1 %v8077_v26  ;;  %v8132_v26 = vld [vmem:[#allocation7 + $0x7e8] ss:$16 sps:$4 sm:$0xff]  }
 0x3ae   :  { %5849 = vmatpush1.bf16.msra.mxu1 %v8075_v27  ;;  %v8159_v27 = vld [vmem:[#allocation10 + $0x80] ss:$8 sps:$4 sm:$0xff]  }
 0x3af   :  { %5850 = vmatprep.subr.bf16.mxu1 %v8083_v29  ;;  %v8164_v29 = vld [vmem:[#allocation10 + $0x94] ss:$8 sps:$4 sm:$0xff]  }
 0x3b2   :  { %5851 = vmatpush1.bf16.msra.mxu1 %v8081_v30  ;;  %v8162_v30 = vld [vmem:[#allocation10 + $0x90] ss:$8 sps:$4 sm:$0xff]  }
 0x3b3   :  { %5852 = vmatprep.subr.bf16.mxu1 %v8089_v22  ;;  %v8167_v22 = vld [vmem:[#allocation10 + $0xa4] ss:$8 sps:$4 sm:$0xff]  }
 0x3b6   :  { %5853 = vmatpush1.bf16.msra.mxu1 %v8087_v33  ;;  %v8165_v33 = vld [vmem:[#allocation10 + $0xa0] ss:$8 sps:$4 sm:$0xff]  }
 0x3b7   :  { %5854 = vmatprep.subr.bf16.mxu1 %v8095_v2  ;;  %v8170_v2 = vld [vmem:[#allocation10 + $0xb4] ss:$8 sps:$4 sm:$0xff]  }
 0x3ba   :  { %5855 = vmatpush1.bf16.msra.mxu1 %v8093_v35  ;;  %v8173_v35 = vld [vmem:[#allocation10 + $0xc4] ss:$8 sps:$4 sm:$0xff]  }
 0x3bb   :  { %5856 = vmatprep.subr.bf16.mxu1 %v8101_v60  ;;  %v8176_v60 = vld [vmem:[#allocation10 + $0xd4] ss:$8 sps:$4 sm:$0xff]  }
 0x3bc   :  { %v3978_v38 = vpop.f32.mrb[8].mxu1 }
 0x3bd   :  { %v7651_v39 = vadd.f32 %v3978_v38, %v698_v12  ;;  %v3980_v40 = vpop.f32.mrb[9].mxu1  ;;  %v8174_v12 = vld [vmem:[#allocation10 + $0xd0] ss:$8 sps:$4 sm:$0xff]  }
 0x3be   :  { %v7652_v41 = vadd.f32 %v3980_v40, %v702_v36  ;;  %v3982_v42 = vpop.f32.mrb[10].mxu1  ;;  %5857 = vmatpush1.bf16.msra.mxu1 %v8099_v37  ;;  %v8179_v36 = vld [vmem:[#allocation10 + $0xe4] ss:$8 sps:$4 sm:$0xff]   ;;  %v8177_v37 = vld [vmem:[#allocation10 + $0xe0] ss:$8 sps:$4 sm:$0xff]  }
 0x3bf   :  { %v3991_v44 = vmax.f32 %v7651_v39, 0.0  ;;  %v3983_v45 = vpop.f32.mrb[11].mxu1  ;;  %5858 = vmatprep.subr.bf16.mxu1 %v8107_v31  ;;  %v8182_v31 = vld [vmem:[#allocation10 + $0xf4] ss:$8 sps:$4 sm:$0xff]   ;;  %v8180_v38 = vld [vmem:[#allocation10 + $0xf0] ss:$8 sps:$4 sm:$0xff]  }
 0x3c0   :  { %v3992_v48 = vmax.f32 %v7652_v41, 0.0  ;;  %v8185_v39 = vld [vmem:[#allocation10 + $0x104] ss:$8 sps:$4 sm:$0xff]   ;;  %v8840_v40 = vld [vmem:[#allocation8] sm:$0xf] }
 0x3c1   :  { %v8836_v21 = vpack.c.bf16 %v3991_v44, %v3991_v44  ;;  %v4262_v41 = vrot.slane %v8840_v40, %v8766_v13  ;;  %v4266_v42 = vrot.slane %v8840_v40, %v8771_v47 }
 0x3c2   :  { %v4000_v49 = vpack.c.bf16 %v3992_v48, %v3992_v48  ;;  %5859 = vmatpush1.bf16.msra.mxu1 %v8105_v32 }
 0x3c3   :  { %5860 = vmatprep.subr.bf16.mxu1 %v8110_v23 }
 0x3c4   :  { %5714 = vmatprep.mubr.bf16.mxu0 %v4000_v49  ;;  %5878 = vmatprep.mubr.bf16.mxu1 %v4000_v49 }
 0x3c5   :  { %5715 = vmatmul.mubr.bf16.vlgmr.msra.gmra.mrb[8].mxu0 %v8836_v21 }
 0x3c6   :  { %5861 = vmatpush1.bf16.msra.mxu1 %v8108_v53  ;;  %6292 = vmatpush1.bf16.msra.mxu0 %v8135_v17 }
 0x3c7   :  { %5862 = vmatprep.subr.bf16.mxu1 %v8113_v51  ;;  %6293 = vmatprep.subr.bf16.mxu0 %v8140_v52  ;;  %v8183_v51 = vld [vmem:[#allocation10 + $0x100] ss:$8 sps:$4 sm:$0xff]  }
 0x3ca   :  { %5863 = vmatpush1.bf16.msra.mxu1 %v8111_v56  ;;  %6294 = vmatpush1.bf16.msra.mxu0 %v8138_v54  ;;  %v8188_v56 = vld [vmem:[#allocation10 + $0x114] ss:$8 sps:$4 sm:$0xff]   ;;  %v8186_v54 = vld [vmem:[#allocation10 + $0x110] ss:$8 sps:$4 sm:$0xff]  }
 0x3cb   :  { %5864 = vmatprep.subr.bf16.mxu1 %v8116_v57  ;;  %6295 = vmatprep.subr.bf16.mxu0 %v8143_v58  ;;  %v8191_v57 = vld [vmem:[#allocation10 + $0x124] ss:$8 sps:$4 sm:$0xff]   ;;  %v8189_v58 = vld [vmem:[#allocation10 + $0x120] ss:$8 sps:$4 sm:$0xff]  }
 0x3ce   :  { %5865 = vmatpush1.bf16.msra.mxu1 %v8114_v59  ;;  %6296 = vmatpush1.bf16.msra.mxu0 %v8141_v61  ;;  %v8194_v59 = vld [vmem:[#allocation10 + $0x134] ss:$8 sps:$4 sm:$0xff]   ;;  %v8192_v61 = vld [vmem:[#allocation10 + $0x130] ss:$8 sps:$4 sm:$0xff]  }
 0x3cf   :  { %5866 = vmatprep.subr.bf16.mxu1 %v8119_v62  ;;  %6297 = vmatprep.subr.bf16.mxu0 %v8146_v0  ;;  %v8197_v62 = vld [vmem:[#allocation10 + $0x144] ss:$8 sps:$4 sm:$0xff]   ;;  %v8195_v0 = vld [vmem:[#allocation10 + $0x140] ss:$8 sps:$4 sm:$0xff]  }
 0x3d2   :  { %5867 = vmatpush1.bf16.msra.mxu1 %v8117_v1  ;;  %6298 = vmatpush1.bf16.msra.mxu0 %v8144_v4  ;;  %v8200_v1 = vld [vmem:[#allocation10 + $0x154] ss:$8 sps:$4 sm:$0xff]   ;;  %v8198_v4 = vld [vmem:[#allocation10 + $0x150] ss:$8 sps:$4 sm:$0xff]  }
 0x3d3   :  { %5868 = vmatprep.subr.bf16.mxu1 %v8122_v5  ;;  %6299 = vmatprep.subr.bf16.mxu0 %v8149_v28  ;;  %v8203_v5 = vld [vmem:[#allocation10 + $0x164] ss:$8 sps:$4 sm:$0xff]   ;;  %v8201_v28 = vld [vmem:[#allocation10 + $0x160] ss:$8 sps:$4 sm:$0xff]  }
 0x3d6   :  { %5869 = vmatpush1.bf16.msra.mxu1 %v8120_v6  ;;  %6300 = vmatpush1.bf16.msra.mxu0 %v8147_v7  ;;  %v8206_v6 = vld [vmem:[#allocation10 + $0x174] ss:$8 sps:$4 sm:$0xff]   ;;  %v8204_v7 = vld [vmem:[#allocation10 + $0x170] ss:$8 sps:$4 sm:$0xff]  }
 0x3d7   :  { %5870 = vmatprep.subr.bf16.mxu1 %v8125_v8  ;;  %6301 = vmatprep.subr.bf16.mxu0 %v8152_v11  ;;  %v4274_v8 = vrot.slane %v8840_v40, %v685_v55  ;;  %v8209_v11 = vld [vmem:[#allocation10 + $0x184] ss:$8 sps:$4 sm:$0xff]   ;;  %v8213_v55 = vld [vmem:[#allocation10 + $0x1a0] ss:$8 sps:$4 sm:$0xff]  }
 0x3da   :  { %5871 = vmatpush1.bf16.msra.mxu1 %v8123_v14  ;;  %6302 = vmatpush1.bf16.msra.mxu0 %v8150_v16 }
 0x3db   :  { %5872 = vmatprep.subr.bf16.mxu1 %v8128_v18  ;;  %6303 = vmatprep.subr.bf16.mxu0 %v8155_v19 }
 0x3de   :  { %5873 = vmatpush1.bf16.msra.mxu1 %v8126_v46  ;;  %6304 = vmatpush1.bf16.msra.mxu0 %v8153_v10  ;;  %v8207_v46 = vld [vmem:[#allocation10 + $0x180] ss:$8 sps:$4 sm:$0xff]  }
 0x3df   :  { %5874 = vmatprep.subr.bf16.mxu1 %v8131_v20  ;;  %6305 = vmatprep.subr.bf16.mxu0 %v8158_v9  ;;  %v8212_v20 = vld [vmem:[#allocation10 + $0x194] ss:$8 sps:$4 sm:$0xff]  }
 0x3e2   :  { %5875 = vmatpush1.bf16.msra.mxu1 %v8129_v15  ;;  %6306 = vmatpush1.bf16.msra.mxu0 %v8156_v24  ;;  %v8210_v24 = vld [vmem:[#allocation10 + $0x190] ss:$8 sps:$4 sm:$0xff]  }
 0x3e3   :  { %5876 = vmatprep.subr.bf16.mxu1 %v8134_v3  ;;  %6307 = vmatprep.subr.bf16.mxu0 %v8161_v25  ;;  %v8215_v3 = vld [vmem:[#allocation10 + $0x1a4] ss:$8 sps:$4 sm:$0xff]   ;;  %v8218_v25 = vld [vmem:[#allocation10 + $0x1b4] ss:$8 sps:$4 sm:$0xff]  }
 0x3e6   :  { %5877 = vmatpush1.bf16.msra.mxu1 %v8132_v26  ;;  %6308 = vmatpush1.bf16.msra.mxu0 %v8159_v27  ;;  %v8216_v26 = vld [vmem:[#allocation10 + $0x1b0] ss:$8 sps:$4 sm:$0xff]   ;;  %v8221_v27 = vld [vmem:[#allocation10 + $0x1c4] ss:$8 sps:$4 sm:$0xff]  }
 0x3e7   :  { %6309 = vmatprep.subr.bf16.mxu0 %v8164_v29  ;;  %v8219_v29 = vld [vmem:[#allocation10 + $0x1c0] ss:$8 sps:$4 sm:$0xff]  }
 0x3e9   :  { %5879 = vmatmul.mubr.bf16.vlgmr.msra.gmra.mrb[12].mxu1 %v8836_v21 }
 0x3ea   :  { %6310 = vmatpush1.bf16.msra.mxu0 %v8162_v30  ;;  %v8224_v30 = vld [vmem:[#allocation10 + $0x1d4] ss:$8 sps:$4 sm:$0xff]  }
 0x3eb   :  { %6311 = vmatprep.subr.bf16.mxu0 %v8167_v22  ;;  %v8222_v22 = vld [vmem:[#allocation10 + $0x1d0] ss:$8 sps:$4 sm:$0xff]  }
 0x3ee   :  { %6312 = vmatpush1.bf16.msra.mxu0 %v8165_v33  ;;  %v4270_v33 = vrot.slane %v8840_v40, %v681_v34  ;;  %v8237_v40 = vld [vmem:[%s8939_s7 + $0x58] sm:$0xff]  }
 0x3ef   :  { %6313 = vmatprep.subr.bf16.mxu0 %v8170_v2  ;;  %v8227_v2 = vld [vmem:[#allocation10 + $0x1e4] ss:$8 sps:$4 sm:$0xff]  }
 0x3f2   :  { %6314 = vmatpush1.bf16.msra.mxu0 %v8168_v63  ;;  %v8225_v63 = vld [vmem:[#allocation10 + $0x1e0] ss:$8 sps:$4 sm:$0xff]  }
 0x3f3   :  { %6315 = vmatprep.subr.bf16.mxu0 %v8173_v35 }
 0x3f6   :  { %6316 = vmatpush1.bf16.msra.mxu0 %v8171_v50  ;;  %v8230_v50 = vld [vmem:[#allocation10 + $0x1f4] ss:$8 sps:$4 sm:$0xff]  }
 0x3f7   :  { %6317 = vmatprep.subr.bf16.mxu0 %v8176_v60  ;;  %v8228_v60 = vld [vmem:[#allocation10 + $0x1f0] ss:$8 sps:$4 sm:$0xff]  }
 0x3fa   :  { %6318 = vmatpush1.bf16.msra.mxu0 %v8174_v12 }
 0x3fb   :  { %6319 = vmatprep.subr.bf16.mxu0 %v8179_v36  ;;  %v8231_v36 = vld [vmem:[%s8939_s7 + $0x40] sm:$0xff]  }
 0x3fe   :  { %6320 = vmatpush1.bf16.msra.mxu0 %v8177_v37  ;;  %v8233_v37 = vld [vmem:[%s8939_s7 + $0x48] sm:$0xff]  }
 0x3ff   :  { %6321 = vmatprep.subr.bf16.mxu0 %v8182_v31  ;;  %v8234_v31 = vld [vmem:[%s8939_s7 + $0x8] sm:$0xff]  }
 0x402   :  { %6322 = vmatpush1.bf16.msra.mxu0 %v8180_v38  ;;  %v8235_v38 = vld [vmem:[%s8939_s7 + $0x50] sm:$0xff]  }
 0x403   :  { %6332 = vmatprep.subr.bf16.mxu0 %v8185_v39  ;;  %v8236_v39 = vld [vmem:[%s8939_s7 + $0x10] sm:$0xff]  }
 0x498   :  { %v5716_v32 = vpop.f32.mrb[8].mxu0 }
 0x499   :  { %v7653_v44 = vadd.f32 %v5716_v32, %v4262_v41  ;;  %v5718_v45 = vpop.f32.mrb[9].mxu0  ;;  %v8238_v41 = vld [vmem:[%s8939_s7 + $0x18] sm:$0xff]   ;;  %v8240_v32 = vld [vmem:[%s8939_s7 + $0x20] sm:$0xff]  }
 0x49a   :  { %v7654_v23 = vadd.f32 %v5718_v45, %v4266_v42  ;;  %v5720_v48 = vpop.f32.mrb[10].mxu0  ;;  %v8239_v42 = vld [vmem:[%s8939_s7 + $0x60] sm:$0xff]   ;;  %v8242_v45 = vld [vmem:[%s8939_s7 + $0x28] sm:$0xff]  }
 0x49b   :  { %v5887_v49 = vmax.f32 %v7653_v44, 0.0  ;;  %v5721_v53 = vpop.f32.mrb[11].mxu0  ;;  %v8241_v44 = vld [vmem:[%s8939_s7 + $0x68] sm:$0xff]   ;;  %v8244_v48 = vld [vmem:[%s8939_s7 + $0x30] sm:$0xff]  }
 0x49c   :  { %v5888_v17 = vmax.f32 %v7654_v23, 0.0  ;;  %v8243_v23 = vld [vmem:[%s8939_s7 + $0x70] sm:$0xff]   ;;  %v8246_v53 = vld [vmem:[%s8939_s7 + $0x38] sm:$0xff]  }
 0x49d   :  { %v5891_v52 = vpack.c.bf16 %v5887_v49, %v5887_v49  ;;  %v8245_v49 = vld [vmem:[%s8939_s7 + $0x78] sm:$0xff]  }
 0x49e   :  { %v5892_v21 = vpack.c.bf16 %v5888_v17, %v5888_v17  ;;  %v8247_v17 = vld [vmem:[%s8941_s9] sm:$0xff]  }
 0x4a0   :  { %6323 = vmatprep.mubr.bf16.mxu0 %v5892_v21  ;;  %v8506_v21 = vmov 0.0  }
 0x4a1   :  { %6324 = vmatmul.mubr.bf16.vlgmr.msra.gmra.mrb[12].mxu0 %v5891_v52  ;;  %7623 = vmatprep.subr.bf16.mxu1 %v8506_v21  ;;  %v5959_v52 = vld [vmem:[#allocation11] sm:$0x3] }
 0x4a2   :  { %6333 = vmatpush1.bf16.msra.mxu0 %v8183_v51  ;;  %7624 = vmatpush3.bf16.msra.mxu1 %v8247_v17  ;;  %v8248_v51 = vld [vmem:[%s8941_s9 + $0x8] sm:$0xff]  }
 0x4a3   :  { %6334 = vmatprep.subr.bf16.mxu0 %v8188_v56  ;;  %7625 = vmatprep.subr.bf16.mxu1 %v8506_v21  ;;  %v5964_v56 = vrot.slane %v5959_v52, %v8766_v13  ;;  %v8250_v13 = vld [vmem:[%s8941_s9 + $0x18] sm:$0xff]  }
 0x4a4   :  { %7631 = vmatprep.mubr.msk.bf16.mxu1 %vm8507_vm0, %v8506_v21 }
 0x4a6   :  { %6335 = vmatpush1.bf16.msra.mxu0 %v8186_v54  ;;  %7626 = vmatpush3.bf16.msra.mxu1 %v8248_v51  ;;  %v5968_v54 = vrot.slane %v5959_v52, %v8771_v47 }
 0x4a7   :  { %6336 = vmatprep.subr.bf16.mxu0 %v8191_v57  ;;  %7627 = vmatprep.subr.bf16.mxu1 %v8506_v21 }
 0x4aa   :  { %6337 = vmatpush1.bf16.msra.mxu0 %v8189_v58 }
 0x4ab   :  { %6338 = vmatprep.subr.bf16.mxu0 %v8194_v59 }
 0x4ae   :  { %6339 = vmatpush1.bf16.msra.mxu0 %v8192_v61 }
 0x4af   :  { %6340 = vmatprep.subr.bf16.mxu0 %v8197_v62 }
 0x4b2   :  { %6341 = vmatpush1.bf16.msra.mxu0 %v8195_v0 }
 0x4b3   :  { %6342 = vmatprep.subr.bf16.mxu0 %v8200_v1 }
 0x4b6   :  { %6343 = vmatpush1.bf16.msra.mxu0 %v8198_v4 }
 0x4b7   :  { %6344 = vmatprep.subr.bf16.mxu0 %v8203_v5 }
 0x4ba   :  { %6345 = vmatpush1.bf16.msra.mxu0 %v8201_v28 }
 0x4bb   :  { %6346 = vmatprep.subr.bf16.mxu0 %v8206_v6  ;;  %v8249_v6 = vld [vmem:[%s8941_s9 + $0x10] sm:$0xff]  }
 0x4bc   :  { %v5880_v14 = vpop.f32.mrb[12].mxu1  ;;  %7628 = vmatpush3.bf16.msra.mxu1 %v8249_v6 }
 0x4bd   :  { %v5882_v16 = vpop.f32.mrb[13].mxu1  ;;  %v7655_v35 = vadd.f32 %v5880_v14, %v4270_v33  ;;  %7629 = vmatprep.subr.bf16.mxu1 %v8506_v21 }
 0x4be   :  { %v7656_v18 = vadd.f32 %v5882_v16, %v4274_v8  ;;  %6347 = vmatpush1.bf16.msra.mxu0 %v8204_v7  ;;  %v5884_v19 = vpop.f32.mrb[14].mxu1  ;;  %v7565_v7 = vld [vmem:[#allocation13] ss:$0 sm:$0xff] }
 0x4bf   :  { %v5885_v10 = vpop.f32.mrb[15].mxu1  ;;  %6348 = vmatprep.subr.bf16.mxu0 %v8209_v11  ;;  %v5889_v12 = vmax.f32 %v7655_v35, 0.0 }
 0x4c0   :  { %v5890_v9 = vmax.f32 %v7656_v18, 0.0  ;;  %7630 = vmatpush3.bf16.msra.mxu1 %v8250_v13 }
 0x4c1   :  { %v5893_v34 = vpack.c.bf16 %v5889_v12, %v5889_v12  ;;  %7635 = vmatprep.subr.bf16.mxu1 %v8506_v21 }
 0x4c2   :  { %v5894_v15 = vpack.c.bf16 %v5890_v9, %v5890_v9  ;;  %6349 = vmatpush1.bf16.msra.mxu0 %v8207_v46  ;;  %v8251_v46 = vld [vmem:[%s8943_s11] sm:$0xff]  }
 0x4c3   :  { %6350 = vmatprep.subr.bf16.mxu0 %v8212_v20  ;;  %v8252_v20 = vld [vmem:[%s8943_s11 + $0x8] ss:$0 sps:$4 sm:$0x33]   ;;  %s8508_s11 = smov [#allocation17]  }
 0x4c4   :  { %6364 = vmatprep.mubr.bf16.mxu0 %v5894_v15  ;;  %v6664_v9 = vsel %vm6662_vm2, %v8252_v20, 0  ;;  %v7582_v15 = vld [vmem:[#allocation14] ss:$0 sm:$0xff]  ;;  %s6720_s14 = sshll.u32 %s8508_s11, 4  ;;  %s6721_s14 = int_to_ptr.vmem [resolvable:$true] %s6720_s14 }
 0x4c5   :  { %s8456_s2 = scalar_lea.vmem %s6721_s14, 32  ;;  %p8461_p3 = scmp.lt.s32.totalorder %s6721_s14, %s6721_s14 }
 0x4c6   :  { %6351 = vmatpush1.bf16.msra.mxu0 %v8210_v24  ;;  %p8457_p2 = scmp.ne.s32.totalorder %s6721_s14, %s8456_s2  ;;  %p8462_p4 = scmp.lt.s32.totalorder %s8456_s2, %s8456_s2 }
 0x4c7   :  { %6352 = vmatprep.subr.bf16.mxu0 %v8215_v3 }
 0x4c8   :  { %p8463_p5 = por %p8462_p4, %p8461_p3 }
 0x4ca   :  { %6353 = vmatpush1.bf16.msra.mxu0 %v8213_v55  ;;  %p8464_p6 = pnand %p8463_p5, %p8457_p2 }
 0x4cb   :  { %6354 = vmatprep.subr.bf16.mxu0 %v8218_v25 }
 0x4ce   :  { %6355 = vmatpush1.bf16.msra.mxu0 %v8216_v26 }
 0x4cf   :  { %6356 = vmatprep.subr.bf16.mxu0 %v8221_v27 }
 0x4d2   :  { %6357 = vmatpush1.bf16.msra.mxu0 %v8219_v29 }
 0x4d3   :  { %6358 = vmatprep.subr.bf16.mxu0 %v8224_v30  ;;  %v7588_v30 = vld [vmem:[#allocation16] ss:$0 sm:$0xff] }
 0x4d6   :  { %6359 = vmatpush1.bf16.msra.mxu0 %v8222_v22 }
 0x4d7   :  { %6360 = vmatprep.subr.bf16.mxu0 %v8227_v2 }
 0x4da   :  { %6361 = vmatpush1.bf16.msra.mxu0 %v8225_v63 }
 0x4db   :  { %6362 = vmatprep.subr.bf16.mxu0 %v8230_v50 }
 0x4de   :  { %6363 = vmatpush1.bf16.msra.mxu0 %v8228_v60 }
 0x4df   :  { %7593 = vmatprep.subr.bf16.mxu0 %v8231_v36 }
 0x4e1   :  { %6365 = vmatmul.mubr.bf16.vlgmr.msra.gmra.mrb[12].mxu0 %v5893_v34 }
 0x4e2   :  { %7594 = vmatpush3.bf16.msra.mxu0 %v8232_v43 }
 0x4e3   :  { %7595 = vmatprep.subr.bf16.mxu0 %v8233_v37 }
 0x4e6   :  { %7596 = vmatpush3.bf16.msra.mxu0 %v8234_v31 }
 0x4e7   :  { %7597 = vmatprep.subr.bf16.mxu0 %v8235_v38 }
 0x4ea   :  { %7598 = vmatpush3.bf16.msra.mxu0 %v8236_v39 }
 0x4eb   :  { %7599 = vmatprep.subr.bf16.mxu0 %v8237_v40 }
 0x4ee   :  { %7600 = vmatpush3.bf16.msra.mxu0 %v8238_v41 }
 0x4ef   :  { %7601 = vmatprep.subr.bf16.mxu0 %v8239_v42 }
 0x4f2   :  { %7602 = vmatpush3.bf16.msra.mxu0 %v8240_v32 }
 0x4f3   :  { %7603 = vmatprep.subr.bf16.mxu0 %v8241_v44 }
 0x4f6   :  { %7604 = vmatpush3.bf16.msra.mxu0 %v8242_v45 }
 0x4f7   :  { %7605 = vmatprep.subr.bf16.mxu0 %v8243_v23 }
 0x4fa   :  { %7606 = vmatpush3.bf16.msra.mxu0 %v8244_v48 }
 0x4fb   :  { %7607 = vmatprep.subr.bf16.mxu0 %v8245_v49 }
 0x4fe   :  { %7608 = vmatpush3.bf16.msra.mxu0 %v8246_v53 }
 0x5b4   :  { %v6366_v57 = vpop.f32.mrb[12].mxu0 }
 0x5b5   :  { %v7657_v58 = vadd.f32 %v6366_v57, %v5964_v56  ;;  %v6368_v59 = vpop.f32.mrb[13].mxu0 }
 0x5b6   :  { %v7658_v61 = vadd.f32 %v6368_v59, %v5968_v54  ;;  %v6370_v62 = vpop.f32.mrb[14].mxu0 }
 0x5b7   :  { %v6373_v0 = vmax.f32 %v7657_v58, 0.0  ;;  %v6371_v1 = vpop.f32.mrb[15].mxu0 }
 0x5b8   :  { %v6374_v4 = vmax.f32 %v7658_v61, 0.0 }
 0x5b9   :  { %v6375_v28 = vpack.c.bf16 %v6373_v0, %v6373_v0 }
 0x5ba   :  { %v6376_v5 = vpack.c.bf16 %v6374_v4, %v6374_v4 }
 0x5bc   :  { %6544 = vmatprep.mubr.bf16.mxu0 %v6376_v5 }
 0x5bd   :  { %6545 = vmatmul.mubr.bf16.vlgmr.msra.gmra.mrb[16].mxu0 %v6375_v28 }
 0x690   :  { %v7609_v47 = vpop.f32.mrb[16].mxu0 }
 0x691   :  { %v7610_v8 = vpop.f32.mrb[17].mxu0 }
 0x692   :  { %v7611_v11 = vadd.f32 %v7610_v8, %v7609_v47  ;;  %v7612_v14 = vpop.f32.mrb[18].mxu0 }
 0x693   :  { %v7613_v16 = vpop.f32.mrb[19].mxu0 }
 0x694   :  { %v6547_v18 = vadd.f32 %v7611_v11, %v7565_v7 }
 0x696   :  { %v6552_v19 = vmax.f32 %v6547_v18, 0.0 }
 0x698   :  { %v6553_v10 = vpack.c.bf16 %v6552_v19, %v6552_v19 }
 0x69a   :  { %7632 = vmatmul.mubr.msk.bf16.vlgmr.msra.gmra.mrb[16].mxu1 %vm6593_vm1, %v6553_v10 }
 0x69b   :  { %7636 = vmatpush3.bf16.msra.mxu1 %v8251_v46  ;;  %7639 = vmatprep.mubr.msk.bf16.mxu1 %vm8507_vm0, %v8506_v21 }
 0x69c   :  { %7637 = vmatprep.subr.bf16.mxu1 %v8506_v21 }
 0x69f   :  { %7638 = vmatpush3.bf16.msra.mxu1 %v6664_v9 }
 0x76d   :  { %v6631_v24 = vpop.f32.mrb[16].mxu1 }
 0x76e   :  { %v6632_v3 = vadd.f32 %v7582_v15, %v6631_v24  ;;  %v7633_v55 = vpop.f32.mrb[17].mxu1 }
 0x76f   :  { %v6634_v25 = vpop.f32.mrb[18].mxu1 }
 0x770   :  { %v6637_v26 = vmax.f32 %v6632_v3, 0.0  ;;  %v7634_v27 = vpop.f32.mrb[19].mxu1 }
 0x772   :  { %v6638_v29 = vpack.c.bf16 %v6637_v26, %v6637_v26 }
 0x774   :  { %7640 = vmatmul.mubr.msk.bf16.vlgmr.msra.gmra.mrb[20].mxu1 %vm6658_vm3, %v6638_v29 }
 0x847   :  { %v6700_v22 = vpop.f32.mrb[20].mxu1 }
 0x848   :  { %v6701_v33 = vadd.f32 %v7588_v30, %v6700_v22  ;;  %v7641_v2 = vpop.f32.mrb[21].mxu1 }
 0x849   :  { %v6703_v63 = vpop.f32.mrb[22].mxu1 }
 0x84a   :  { %v7592_v35 = vmul.f32 -1.442695, %v6701_v33  ;;  %v7642_v50 = vpop.f32.mrb[23].mxu1 }
 0x84c   :  { %8253 = vpow2.f32 %v7592_v35 }
 0x856   :  { %v8254_v60 = vpop.eup %8253 }
 0x857   :  { %v6709_v12 = vadd.f32 1.0, %v8254_v60 }
 0x859   :  { %8255 = vrcp.f32 %v6709_v12 }
 0x863   :  { %v8256_v36 = vpop.eup %8255 }
 0x864   :  { %6713 = vst.msk [vmem:[#allocation17] sm:$0x3] %vm6712_vm4, %v8256_v36 }
 0x865   :  { %8467 = shalt.err (!%p8464_p6)
}
 0x866   :  { %s8468_s3 = scalar_lea.hbm %s8945_s13, 32 }
 0x867   :  { %p8469_p7 = scmp.ne.s32.totalorder %s8945_s13, %s8468_s3  ;;  %p8472_p8 = scmp.lt.u32.totalorder %s8468_s3, %s8945_s13 }
 0x869   :  { %p8474_p9 = pnand %p8472_p8, %p8469_p7 }
 0x86b   :  { %8477 = shalt.err (!%p8474_p9)
}
 0x86c   :  { %6723 = dma.vmem_to_hbm [thread:$0]  %s6721_s14, 32, %s8945_s13, [#allocation4]  }
 0x86d   :  { %8488 = dma.done.wait [#allocation4], 32  }
 0x86e   :  { %8489 = vsyncadd [#allocation4], 4294967264 }
 0x86f   :  { %6727 = vsyncpa [#allocation3], 1 }
 0x870   :  { %6728 = vsyncpa [#allocation6], 1 }
 0x871   :  { %6729 = vsyncpa [#allocation9], 1 }
 0x872   :  { %6730 = vsyncpa [#allocation12], 1 }
 0x873   :  { %6731 = vsyncpa [#allocation15], 1 }
 0x874   :  { %6732 = vsyncpa [#allocation4], 1 }

</bundles_post_ra>
